<compile_context>
chip_gen: v6e
topology: v6e:2x2x1
jax: 0.10.0
libtpu: 0.0.40
codegen_flags: <defaults>
</compile_context>

<pallas_src>
import numpy as np
import jax
import jax.numpy as jnp
from jax.experimental import pallas as pl
from jax.experimental.pallas import tpu as pltpu

EPS = 1e-5


# --------------------------- host-side slab packing ----------------------------

def _round_up8(n):
    return ((n + 7) // 8) * 8


class _SlabPacker:
    """Packs many small 2-D parameter blocks into one (rows, width) slab.

    Every block starts at an 8-aligned (sublane-aligned) row offset; the kernel
    addresses blocks with static row/col slices, so the whole slab is a single
    VMEM input instead of one BlockSpec/DMA per parameter leaf."""

    def __init__(self, width):
        self.width = width
        self.blocks = []
        self.entries = {}   # name -> (row_offset, rows, cols)
        self.off = 0

    def add(self, name, arr):
        arr = np.asarray(arr, dtype=np.float32)
        if arr.ndim == 1:
            arr = arr[:, None]
        r, c = arr.shape
        assert c <= self.width, (name, arr.shape)
        rp = _round_up8(r)
        blk = np.zeros((rp, self.width), np.float32)
        blk[:r, :c] = arr
        self.entries[name] = (self.off, r, c)
        self.blocks.append(blk)
        self.off += rp

    def finalize(self, dtype):
        return jnp.asarray(np.concatenate(self.blocks, axis=0), dtype=dtype)


def pack_params(folded, *, B, L, in_ch, out_ch, feat):
    """One-time host-side repack of folded params into two slabs + metadata."""
    lengths = []
    l = L
    for _ in range(5):
        lengths.append(l)
        l = l // 2
    # Skip / upsample length consistency (same implicit PyTorch constraint).
    assert 2 * (lengths[4] - 1) + 3 == lengths[3]
    for i in (3, 2, 1):
        assert 2 * lengths[i] == lengths[i - 1]

    bp = _SlabPacker(width=128)   # bf16: weights + exact 0/1 structural matrices
    fp = _SlabPacker(width=128)   # f32 : BN shifts, biases, boundary masks

    def add_conv(name, w, h):
        w = np.asarray(w, np.float32)
        cout, cin, _ = w.shape
        # (Cout, Cin, 3) -> (3*Cout, Cin): rows [k*Cout + o] = w[o, :, k]
        bp.add(f'{name}.w', np.transpose(w, (2, 0, 1)).reshape(3 * cout, cin))
        fp.add(f'{name}.h', np.asarray(h, np.float32).reshape(cout, 1))

    for name in ('enc1', 'enc2', 'enc3', 'enc4', 'bott',
                 'dec4', 'dec3', 'dec2', 'dec1'):
        add_conv(f'{name}.c1', folded[name]['w1'], folded[name]['h1'])
        add_conv(f'{name}.c2', folded[name]['w2'], folded[name]['h2'])

    upspec = [('up4', 4, 3, 3), ('up3', 3, 2, 2), ('up2', 2, 1, 2), ('up1', 1, 0, 2)]
    for name, _, _, K in upspec:
        w = np.asarray(folded[name]['w'], np.float32)   # torch layout (Cin, Cout, K)
        cin, cout, k = w.shape
        assert k == K
        # (Cin, Cout, K) -> (K*Cout, Cin)
        bp.add(f'{name}.w', np.transpose(w, (2, 1, 0)).reshape(K * cout, cin))
        fp.add(f'{name}.b', np.asarray(folded[name]['b'], np.float32).reshape(cout, 1))

    bp.add('final.w', np.asarray(folded['final']['w'], np.float32))
    fp.add('final.b', np.asarray(folded['final']['b'], np.float32).reshape(-1, 1))

    # MaxPool even/odd gather matrices (exact 0/1; block-diagonal over batch).
    for lvl in range(4):
        li, lo = lengths[lvl], lengths[lvl] // 2
        E = np.zeros((B * li, B * lo), np.float32)
        O = np.zeros((B * li, B * lo), np.float32)
        for b in range(B):
            for r in range(lo):
                E[b * li + 2 * r, b * lo + r] = 1.0
                O[b * li + 2 * r + 1, b * lo + r] = 1.0
        bp.add(f'pool_even.{lvl}', E)
        bp.add(f'pool_odd.{lvl}', O)

    # ConvTranspose1d(stride=2) scatter matrices (exact 0/1, incl. overlap-add).
    for name, li, lo, K in upspec:
        lin, lout = lengths[li], lengths[lo]
        for k in range(K):
            S = np.zeros((B * lin, B * lout), np.float32)
            for b in range(B):
                for r in range(lin):
                    S[b * lin + r, b * lout + 2 * r + k] = 1.0
            bp.add(f'{name}.s{k}', S)

    # Conv(k=3, pad=1) boundary masks: zero the pad column of each batch segment.
    for lvl in range(5):
        ll = lengths[lvl]
        mp = np.ones((1, B * ll), np.float32)
        mn = np.ones((1, B * ll), np.float32)
        for b in range(B):
            mp[0, b * ll] = 0.0               # out col l uses x[l-1]: zero at seg start
            mn[0, b * ll + ll - 1] = 0.0      # out col l uses x[l+1]: zero at seg end
        fp.add(f'mask_prev.{lvl}', mp)
        fp.add(f'mask_next.{lvl}', mn)

    bslab = bp.finalize(jnp.bfloat16)
    fslab = fp.finalize(jnp.float32)
    meta = dict(eb=bp.entries, ef=fp.entries, B=B, L=L, lengths=lengths,
                in_ch=in_ch, out_ch=out_ch, feat=feat)
    return bslab, fslab, meta


# --------------------------- fused forward (one pallas_call) -------------------

def make_unet1d_forward(meta):
    eb, ef = meta['eb'], meta['ef']
    B, L = meta['B'], meta['L']
    in_ch, out_ch = meta['in_ch'], meta['out_ch']
    W0 = B * L

    def kernel(x_ref, b_ref, f_ref, o_ref):
        def bsl(name):
            off, r, c = eb[name]
            return b_ref[off:off + r, 0:c]

        def fsl(name):
            off, r, c = ef[name]
            return f_ref[off:off + r, 0:c]

        def wmm(w, x):
            # Weight matmul: bf16 operands, f32 accumulation (single MXU pass).
            return jnp.dot(w, x.astype(jnp.bfloat16),
                           preferred_element_type=jnp.float32)

        def gmm(a, g):
            # Structural gather/scatter against an exact 0/1 bf16 matrix
            # (single MXU pass; each output column has <= 2 nonzero terms).
            return jnp.dot(a.astype(jnp.bfloat16), g,
                           preferred_element_type=jnp.float32)

        def conv3(x, name, lvl):
            # Conv1d(k=3, pad=1) + folded BN + tanh, batch folded on lanes.
            t = wmm(bsl(f'{name}.w'), x)                 # (3*Cout, B*Ll): all 3 taps
            cout = ef[f'{name}.h'][1]
            t0, t1, t2 = t[0:cout], t[cout:2 * cout], t[2 * cout:3 * cout]
            zc = jnp.zeros((cout, 1), jnp.float32)
            # +-1 lane shifts via zero-pad slice+concat (no selection matmul),
            # masked so shifts never bleed across batch segments.
            prev = jnp.concatenate([zc, t0[:, :-1]], axis=1) * fsl(f'mask_prev.{lvl}')
            nxt = jnp.concatenate([t2[:, 1:], zc], axis=1) * fsl(f'mask_next.{lvl}')
            return jnp.tanh(t1 + prev + nxt + fsl(f'{name}.h'))

        def block(x, name, lvl):
            return conv3(conv3(x, f'{name}.c1', lvl), f'{name}.c2', lvl)

        def pool(y, lvl):
            # MaxPool1d(2,2): exact even/odd gathers + elementwise max.
            e = gmm(y, bsl(f'pool_even.{lvl}'))
            o = gmm(y, bsl(f'pool_odd.{lvl}'))
            return jnp.maximum(e, o)

        def upconv(x, name):
            # ConvTranspose1d(stride=2): one stacked-tap matmul + exact scatter.
            cout = ef[f'{name}.b'][1]
            K = eb[f'{name}.w'][1] // cout
            t = wmm(bsl(f'{name}.w'), x)                 # (K*Cout, B*Lin)
            out = None
            for k in range(K):
                term = gmm(t[k * cout:(k + 1) * cout], bsl(f'{name}.s{k}'))
                out = term if out is None else out + term
            return out + fsl(f'{name}.b')

        x = x_ref[...]                                   # (Cin, B*L) f32
        e1 = block(x, 'enc1', 0)
        e2 = block(pool(e1, 0), 'enc2', 1)
        e3 = block(pool(e2, 1), 'enc3', 2)
        e4 = block(pool(e3, 2), 'enc4', 3)
        bo = block(pool(e4, 3), 'bott', 4)

        # Skip connections: channel concat is a cheap sublane concat in (C, B*L).
        d4 = block(jnp.concatenate([upconv(bo, 'up4'), e4], axis=0), 'dec4', 3)
        d3 = block(jnp.concatenate([upconv(d4, 'up3'), e3], axis=0), 'dec3', 2)
        d2 = block(jnp.concatenate([upconv(d3, 'up2'), e2], axis=0), 'dec2', 1)
        d1 = block(jnp.concatenate([upconv(d2, 'up1'), e1], axis=0), 'dec1', 0)

        o_ref[...] = wmm(bsl('final.w'), d1) + fsl('final.b')   # 1x1 conv head

    def forward(bslab, fslab, x):
        # Layout plumbing (outside the kernel): fold batch into the lane axis.
        xf = jnp.transpose(x, (1, 0, 2)).reshape(in_ch, W0)
        of = pl.pallas_call(
            kernel,
            out_shape=jax.ShapeDtypeStruct((out_ch, W0), jnp.float32),
            in_specs=[pl.BlockSpec(memory_space=pltpu.MemorySpace.VMEM)] * 3,
            out_specs=pl.BlockSpec(memory_space=pltpu.MemorySpace.VMEM),
        )(xf, bslab, fslab)
        return jnp.transpose(of.reshape(out_ch, B, L), (1, 0, 2))

    return forward


# --------------------------- parameters ----------------------------------------

def _init_conv3(key, cout, cin):
    return 0.1 * jax.random.normal(key, (cout, cin, 3), jnp.float32)


def _init_bn(key, c):
    k1, k2, k3, k4 = jax.random.split(key, 4)
    return dict(gamma=1.0 + 0.1 * jax.random.normal(k1, (c,), jnp.float32),
                beta=0.1 * jax.random.normal(k2, (c,), jnp.float32),
                mean=0.1 * jax.random.normal(k3, (c,), jnp.float32),
                var=1.0 + 0.1 * jnp.abs(jax.random.normal(k4, (c,), jnp.float32)))


def _init_block(key, cin, feat):
    k1, k2, k3, k4 = jax.random.split(key, 4)
    return dict(w1=_init_conv3(k1, feat, cin), bn1=_init_bn(k2, feat),
                w2=_init_conv3(k3, feat, feat), bn2=_init_bn(k4, feat))


def _init_upconv(key, cin, cout, k):
    k1, k2 = jax.random.split(key)
    return dict(w=0.1 * jax.random.normal(k1, (cin, cout, k), jnp.float32),
                b=0.1 * jax.random.normal(k2, (cout,), jnp.float32))


def init_unet1d_params(key, in_channels, out_channels, features):
    keys = jax.random.split(key, 16)
    f = features
    p = {}
    p['enc1'] = _init_block(keys[0], in_channels, f)
    p['enc2'] = _init_block(keys[1], f, f * 2)
    p['enc3'] = _init_block(keys[2], f * 2, f * 4)
    p['enc4'] = _init_block(keys[3], f * 4, f * 8)
    p['bott'] = _init_block(keys[4], f * 8, f * 16)
    p['up4'] = _init_upconv(keys[5], f * 16, f * 8, 3)     # ConvTranspose1d(k=3, s=2)
    p['dec4'] = _init_block(keys[6], f * 16, f * 8)
    p['up3'] = _init_upconv(keys[7], f * 8, f * 4, 2)
    p['dec3'] = _init_block(keys[8], f * 8, f * 4)
    p['up2'] = _init_upconv(keys[9], f * 4, f * 2, 2)
    p['dec2'] = _init_block(keys[10], f * 4, f * 2)
    p['up1'] = _init_upconv(keys[11], f * 2, f, 2)
    p['dec1'] = _init_block(keys[12], f * 2, f)
    kf1, kf2 = jax.random.split(keys[13])
    p['final'] = dict(w=0.1 * jax.random.normal(kf1, (out_channels, f), jnp.float32),
                      b=0.1 * jax.random.normal(kf2, (out_channels,), jnp.float32))
    return p


def fold_batchnorm(p):
    """Eval-mode BN fold: scale into conv weights (f32), keep per-channel shift."""
    out = {}
    for name in ('enc1', 'enc2', 'enc3', 'enc4', 'bott',
                 'dec4', 'dec3', 'dec2', 'dec1'):
        blk, fb = p[name], {}
        for i in (1, 2):
            bn = blk[f'bn{i}']
            scale = bn['gamma'] / jnp.sqrt(bn['var'] + EPS)
            fb[f'w{i}'] = blk[f'w{i}'] * scale[:, None, None]
            fb[f'h{i}'] = bn['beta'] - bn['mean'] * scale
        out[name] = fb
    for name in ('up4', 'up3', 'up2', 'up1', 'final'):
        out[name] = p[name]
    return out


# --------------------------- pure-JAX reference (no Pallas) --------------------
# Mirrors the PyTorch forward op-by-op on the same folded weights.  Only the
# intentional precision choices of the kernel are mirrored (bf16 operands for
# weight matmuls, one bf16 rounding of the transposed-conv taps); all structural
# ops (pad/shift/pool/interleave) are exact on both sides.

def _bf16(a):
    return a.astype(jnp.bfloat16)


def _ref_conv3(x, w, h):
    Lx = x.shape[-1]
    xp = jnp.pad(x, ((0, 0), (0, 0), (1, 1)))
    z = sum(jnp.einsum('oi,bil->bol', _bf16(w[:, :, k]), _bf16(xp[:, :, k:k + Lx]),
                       preferred_element_type=jnp.float32)
            for k in range(3))
    return jnp.tanh(z + h[None, :, None])


def _ref_block(x, bp):
    x = _ref_conv3(x, bp['w1'], bp['h1'])
    return _ref_conv3(x, bp['w2'], bp['h2'])


def _ref_pool(x):
    lo = x.shape[-1] // 2
    return jnp.maximum(x[:, :, 0:2 * lo:2], x[:, :, 1:2 * lo:2])


def _ref_upconv(x, w, bias, stride=2):
    bsz, cin, lin = x.shape
    cout, k_taps = w.shape[1], w.shape[2]
    lout = (lin - 1) * stride + k_taps
    out = jnp.zeros((bsz, cout, lout), jnp.float32)
    for k in range(k_taps):
        tap = jnp.einsum('io,bil->bol', _bf16(w[:, :, k]), _bf16(x),
                         preferred_element_type=jnp.float32)
        # mirror the kernel's single-pass structural scatter (taps pass through
        # one bf16 rounding before the exact overlap-add)
        tap = tap.astype(jnp.bfloat16).astype(jnp.float32)
        out = out.at[:, :, k:k + stride * (lin - 1) + 1:stride].add(tap)
    return out + bias[None, :, None]


def unet1d_reference(fp, x):
    e1 = _ref_block(x, fp['enc1'])
    e2 = _ref_block(_ref_pool(e1), fp['enc2'])
    e3 = _ref_block(_ref_pool(e2), fp['enc3'])
    e4 = _ref_block(_ref_pool(e3), fp['enc4'])
    bo = _ref_block(_ref_pool(e4), fp['bott'])
    d4 = _ref_block(jnp.concatenate(
        [_ref_upconv(bo, fp['up4']['w'], fp['up4']['b']), e4], axis=1), fp['dec4'])
    d3 = _ref_block(jnp.concatenate(
        [_ref_upconv(d4, fp['up3']['w'], fp['up3']['b']), e3], axis=1), fp['dec3'])
    d2 = _ref_block(jnp.concatenate(
        [_ref_upconv(d3, fp['up2']['w'], fp['up2']['b']), e2], axis=1), fp['dec2'])
    d1 = _ref_block(jnp.concatenate(
        [_ref_upconv(d2, fp['up1']['w'], fp['up1']['b']), e1], axis=1), fp['dec1'])
    return (jnp.einsum('oi,bil->bol', _bf16(fp['final']['w']), _bf16(d1),
                       preferred_element_type=jnp.float32)
            + fp['final']['b'][None, :, None])


# --------------------------- main ----------------------------------------------

if __name__ == "__main__":
    IN_CH, OUT_CH, FEAT = 4, 3, 8
    B, L = 2, 40   # L = 8 * odd so the K=3 upconv recreates enc4's length and all
                   # skip concatenations line up (same implicit PyTorch constraint)

    key = jax.random.PRNGKey(0)
    kp_key, kx_key = jax.random.split(key)
    raw_params = init_unet1d_params(kp_key, IN_CH, OUT_CH, FEAT)
    folded = fold_batchnorm(raw_params)                         # one-time, host-side
    bslab, fslab, meta = pack_params(folded, B=B, L=L, in_ch=IN_CH,
                                     out_ch=OUT_CH, feat=FEAT)  # one-time repack
    x = jax.random.normal(kx_key, (B, IN_CH, L), jnp.float32)

    fwd = jax.jit(make_unet1d_forward(meta))
    out = jax.block_until_ready(fwd(bslab, fslab, x))
    ref = jax.block_until_ready(unet1d_reference(folded, x))

    assert out.shape == (B, OUT_CH, L), out.shape
    assert bool(jnp.all(jnp.isfinite(out)))
    err = float(jnp.max(jnp.abs(out - ref)))
    assert err < 1e-2, f"max abs err vs reference: {err}"
    print("KERNEL_OK")
</pallas_src>

<mosaic_0001>
module attributes {stable_mosaic.version = 11 : i64} {
  func.func @kernel(%arg0: memref<4x80xf32, #tpu.memory_space<vmem>>, %arg1: memref<3024x128xbf16, #tpu.memory_space<vmem>>, %arg2: memref<944x128xf32, #tpu.memory_space<vmem>>, %arg3: memref<3x80xf32, #tpu.memory_space<vmem>>) attributes {dimension_semantics = [], scalar_prefetch = 0 : i64, scratch_operands = 0 : i64, tpu.core_type = #tpu.core_type<tc>} {
    %c0 = arith.constant 0 : index
    %c0_0 = arith.constant 0 : index
    %0 = vector.load %arg0[%c0, %c0_0] : memref<4x80xf32, #tpu.memory_space<vmem>>, vector<4x80xf32>
    %c0_1 = arith.constant 0 : index
    %c0_2 = arith.constant 0 : index
    %1 = vector.load %arg1[%c0_1, %c0_2] : memref<3024x128xbf16, #tpu.memory_space<vmem>>, vector<24x4xbf16>
    %2 = arith.truncf %0 : vector<4x80xf32> to vector<4x80xbf16>
    %cst = arith.constant dense<0.000000e+00> : vector<24x80xf32>
    %3 = tpu.matmul %1, %2, %cst {dimension_numbers = #tpu.dot_dimension_numbers<[1], [0], [0], [1], [0, 0, 1, 1], [], []>} : vector<24x4xbf16>, vector<4x80xbf16>, vector<24x80xf32> -> vector<24x80xf32>
    %4 = vector.extract_strided_slice %3 {offsets = [0, 0], sizes = [8, 80], strides = [1, 1]} : vector<24x80xf32> to vector<8x80xf32>
    %5 = vector.extract_strided_slice %3 {offsets = [8, 0], sizes = [8, 80], strides = [1, 1]} : vector<24x80xf32> to vector<8x80xf32>
    %6 = vector.extract_strided_slice %3 {offsets = [16, 0], sizes = [8, 80], strides = [1, 1]} : vector<24x80xf32> to vector<8x80xf32>
    %cst_3 = arith.constant 0.000000e+00 : f32
    %7 = vector.broadcast %cst_3 : f32 to vector<8x1xf32>
    %8 = vector.extract_strided_slice %4 {offsets = [0, 0], sizes = [8, 79], strides = [1, 1]} : vector<8x80xf32> to vector<8x79xf32>
    %9 = tpu.concatenate %7, %8 in 1 : vector<8x1xf32>, vector<8x79xf32> -> vector<8x80xf32>
    %c864 = arith.constant 864 : index
    %c0_4 = arith.constant 0 : index
    %10 = vector.load %arg2[%c864, %c0_4] : memref<944x128xf32, #tpu.memory_space<vmem>>, vector<1x80xf32>
    %11 = vector.broadcast %10 : vector<1x80xf32> to vector<8x80xf32>
    %12 = arith.mulf %9, %11 : vector<8x80xf32>
    %13 = vector.extract_strided_slice %6 {offsets = [0, 1], sizes = [8, 79], strides = [1, 1]} : vector<8x80xf32> to vector<8x79xf32>
    %14 = tpu.concatenate %13, %7 in 1 : vector<8x79xf32>, vector<8x1xf32> -> vector<8x80xf32>
    %c872 = arith.constant 872 : index
    %c0_5 = arith.constant 0 : index
    %15 = vector.load %arg2[%c872, %c0_5] : memref<944x128xf32, #tpu.memory_space<vmem>>, vector<1x80xf32>
    %16 = vector.broadcast %15 : vector<1x80xf32> to vector<8x80xf32>
    %17 = arith.mulf %14, %16 : vector<8x80xf32>
    %18 = arith.addf %5, %12 : vector<8x80xf32>
    %19 = arith.addf %18, %17 : vector<8x80xf32>
    %c0_6 = arith.constant 0 : index
    %c0_7 = arith.constant 0 : index
    %20 = vector.load %arg2[%c0_6, %c0_7] : memref<944x128xf32, #tpu.memory_space<vmem>>, vector<8x1xf32>
    %21 = vector.broadcast %20 : vector<8x1xf32> to vector<8x80xf32>
    %22 = arith.addf %19, %21 : vector<8x80xf32>
    %23 = math.tanh %22 : vector<8x80xf32>
    %c24 = arith.constant 24 : index
    %c0_8 = arith.constant 0 : index
    %24 = vector.load %arg1[%c24, %c0_8] : memref<3024x128xbf16, #tpu.memory_space<vmem>>, vector<24x8xbf16>
    %25 = arith.truncf %23 : vector<8x80xf32> to vector<8x80xbf16>
    %cst_9 = arith.constant dense<0.000000e+00> : vector<24x80xf32>
    %26 = tpu.matmul %24, %25, %cst_9 {dimension_numbers = #tpu.dot_dimension_numbers<[1], [0], [0], [1], [0, 0, 1, 1], [], []>} : vector<24x8xbf16>, vector<8x80xbf16>, vector<24x80xf32> -> vector<24x80xf32>
    %27 = vector.extract_strided_slice %26 {offsets = [0, 0], sizes = [8, 80], strides = [1, 1]} : vector<24x80xf32> to vector<8x80xf32>
    %28 = vector.extract_strided_slice %26 {offsets = [8, 0], sizes = [8, 80], strides = [1, 1]} : vector<24x80xf32> to vector<8x80xf32>
    %29 = vector.extract_strided_slice %26 {offsets = [16, 0], sizes = [8, 80], strides = [1, 1]} : vector<24x80xf32> to vector<8x80xf32>
    %cst_10 = arith.constant 0.000000e+00 : f32
    %30 = vector.broadcast %cst_10 : f32 to vector<8x1xf32>
    %31 = vector.extract_strided_slice %27 {offsets = [0, 0], sizes = [8, 79], strides = [1, 1]} : vector<8x80xf32> to vector<8x79xf32>
    %32 = tpu.concatenate %30, %31 in 1 : vector<8x1xf32>, vector<8x79xf32> -> vector<8x80xf32>
    %c864_11 = arith.constant 864 : index
    %c0_12 = arith.constant 0 : index
    %33 = vector.load %arg2[%c864_11, %c0_12] : memref<944x128xf32, #tpu.memory_space<vmem>>, vector<1x80xf32>
    %34 = vector.broadcast %33 : vector<1x80xf32> to vector<8x80xf32>
    %35 = arith.mulf %32, %34 : vector<8x80xf32>
    %36 = vector.extract_strided_slice %29 {offsets = [0, 1], sizes = [8, 79], strides = [1, 1]} : vector<8x80xf32> to vector<8x79xf32>
    %37 = tpu.concatenate %36, %30 in 1 : vector<8x79xf32>, vector<8x1xf32> -> vector<8x80xf32>
    %c872_13 = arith.constant 872 : index
    %c0_14 = arith.constant 0 : index
    %38 = vector.load %arg2[%c872_13, %c0_14] : memref<944x128xf32, #tpu.memory_space<vmem>>, vector<1x80xf32>
    %39 = vector.broadcast %38 : vector<1x80xf32> to vector<8x80xf32>
    %40 = arith.mulf %37, %39 : vector<8x80xf32>
    %41 = arith.addf %28, %35 : vector<8x80xf32>
    %42 = arith.addf %41, %40 : vector<8x80xf32>
    %c8 = arith.constant 8 : index
    %c0_15 = arith.constant 0 : index
    %43 = vector.load %arg2[%c8, %c0_15] : memref<944x128xf32, #tpu.memory_space<vmem>>, vector<8x1xf32>
    %44 = vector.broadcast %43 : vector<8x1xf32> to vector<8x80xf32>
    %45 = arith.addf %42, %44 : vector<8x80xf32>
    %46 = math.tanh %45 : vector<8x80xf32>
    %c2520 = arith.constant 2520 : index
    %c0_16 = arith.constant 0 : index
    %47 = vector.load %arg1[%c2520, %c0_16] : memref<3024x128xbf16, #tpu.memory_space<vmem>>, vector<80x40xbf16>
    %48 = arith.truncf %46 : vector<8x80xf32> to vector<8x80xbf16>
    %cst_17 = arith.constant dense<0.000000e+00> : vector<8x40xf32>
    %49 = tpu.matmul %48, %47, %cst_17 {dimension_numbers = #tpu.dot_dimension_numbers<[1], [0], [0], [1], [0, 0, 1, 1], [], []>} : vector<8x80xbf16>, vector<80x40xbf16>, vector<8x40xf32> -> vector<8x40xf32>
    %c2600 = arith.constant 2600 : index
    %c0_18 = arith.constant 0 : index
    %50 = vector.load %arg1[%c2600, %c0_18] : memref<3024x128xbf16, #tpu.memory_space<vmem>>, vector<80x40xbf16>
    %51 = arith.truncf %46 : vector<8x80xf32> to vector<8x80xbf16>
    %cst_19 = arith.constant dense<0.000000e+00> : vector<8x40xf32>
    %52 = tpu.matmul %51, %50, %cst_19 {dimension_numbers = #tpu.dot_dimension_numbers<[1], [0], [0], [1], [0, 0, 1, 1], [], []>} : vector<8x80xbf16>, vector<80x40xbf16>, vector<8x40xf32> -> vector<8x40xf32>
    %53 = arith.maximumf %49, %52 : vector<8x40xf32>
    %c48 = arith.constant 48 : index
    %c0_20 = arith.constant 0 : index
    %54 = vector.load %arg1[%c48, %c0_20] : memref<3024x128xbf16, #tpu.memory_space<vmem>>, vector<48x8xbf16>
    %55 = arith.truncf %53 : vector<8x40xf32> to vector<8x40xbf16>
    %cst_21 = arith.constant dense<0.000000e+00> : vector<48x40xf32>
    %56 = tpu.matmul %54, %55, %cst_21 {dimension_numbers = #tpu.dot_dimension_numbers<[1], [0], [0], [1], [0, 0, 1, 1], [], []>} : vector<48x8xbf16>, vector<8x40xbf16>, vector<48x40xf32> -> vector<48x40xf32>
    %57 = vector.extract_strided_slice %56 {offsets = [0, 0], sizes = [16, 40], strides = [1, 1]} : vector<48x40xf32> to vector<16x40xf32>
    %58 = vector.extract_strided_slice %56 {offsets = [16, 0], sizes = [16, 40], strides = [1, 1]} : vector<48x40xf32> to vector<16x40xf32>
    %59 = vector.extract_strided_slice %56 {offsets = [32, 0], sizes = [16, 40], strides = [1, 1]} : vector<48x40xf32> to vector<16x40xf32>
    %cst_22 = arith.constant 0.000000e+00 : f32
    %60 = vector.broadcast %cst_22 : f32 to vector<16x1xf32>
    %61 = vector.extract_strided_slice %57 {offsets = [0, 0], sizes = [16, 39], strides = [1, 1]} : vector<16x40xf32> to vector<16x39xf32>
    %62 = tpu.concatenate %60, %61 in 1 : vector<16x1xf32>, vector<16x39xf32> -> vector<16x40xf32>
    %c880 = arith.constant 880 : index
    %c0_23 = arith.constant 0 : index
    %63 = vector.load %arg2[%c880, %c0_23] : memref<944x128xf32, #tpu.memory_space<vmem>>, vector<1x40xf32>
    %64 = vector.broadcast %63 : vector<1x40xf32> to vector<16x40xf32>
    %65 = arith.mulf %62, %64 : vector<16x40xf32>
    %66 = vector.extract_strided_slice %59 {offsets = [0, 1], sizes = [16, 39], strides = [1, 1]} : vector<16x40xf32> to vector<16x39xf32>
    %67 = tpu.concatenate %66, %60 in 1 : vector<16x39xf32>, vector<16x1xf32> -> vector<16x40xf32>
    %c888 = arith.constant 888 : index
    %c0_24 = arith.constant 0 : index
    %68 = vector.load %arg2[%c888, %c0_24] : memref<944x128xf32, #tpu.memory_space<vmem>>, vector<1x40xf32>
    %69 = vector.broadcast %68 : vector<1x40xf32> to vector<16x40xf32>
    %70 = arith.mulf %67, %69 : vector<16x40xf32>
    %71 = arith.addf %58, %65 : vector<16x40xf32>
    %72 = arith.addf %71, %70 : vector<16x40xf32>
    %c16 = arith.constant 16 : index
    %c0_25 = arith.constant 0 : index
    %73 = vector.load %arg2[%c16, %c0_25] : memref<944x128xf32, #tpu.memory_space<vmem>>, vector<16x1xf32>
    %74 = vector.broadcast %73 : vector<16x1xf32> to vector<16x40xf32>
    %75 = arith.addf %72, %74 : vector<16x40xf32>
    %76 = math.tanh %75 : vector<16x40xf32>
    %c96 = arith.constant 96 : index
    %c0_26 = arith.constant 0 : index
    %77 = vector.load %arg1[%c96, %c0_26] : memref<3024x128xbf16, #tpu.memory_space<vmem>>, vector<48x16xbf16>
    %78 = arith.truncf %76 : vector<16x40xf32> to vector<16x40xbf16>
    %cst_27 = arith.constant dense<0.000000e+00> : vector<48x40xf32>
    %79 = tpu.matmul %77, %78, %cst_27 {dimension_numbers = #tpu.dot_dimension_numbers<[1], [0], [0], [1], [0, 0, 1, 1], [], []>} : vector<48x16xbf16>, vector<16x40xbf16>, vector<48x40xf32> -> vector<48x40xf32>
    %80 = vector.extract_strided_slice %79 {offsets = [0, 0], sizes = [16, 40], strides = [1, 1]} : vector<48x40xf32> to vector<16x40xf32>
    %81 = vector.extract_strided_slice %79 {offsets = [16, 0], sizes = [16, 40], strides = [1, 1]} : vector<48x40xf32> to vector<16x40xf32>
    %82 = vector.extract_strided_slice %79 {offsets = [32, 0], sizes = [16, 40], strides = [1, 1]} : vector<48x40xf32> to vector<16x40xf32>
    %cst_28 = arith.constant 0.000000e+00 : f32
    %83 = vector.broadcast %cst_28 : f32 to vector<16x1xf32>
    %84 = vector.extract_strided_slice %80 {offsets = [0, 0], sizes = [16, 39], strides = [1, 1]} : vector<16x40xf32> to vector<16x39xf32>
    %85 = tpu.concatenate %83, %84 in 1 : vector<16x1xf32>, vector<16x39xf32> -> vector<16x40xf32>
    %c880_29 = arith.constant 880 : index
    %c0_30 = arith.constant 0 : index
    %86 = vector.load %arg2[%c880_29, %c0_30] : memref<944x128xf32, #tpu.memory_space<vmem>>, vector<1x40xf32>
    %87 = vector.broadcast %86 : vector<1x40xf32> to vector<16x40xf32>
    %88 = arith.mulf %85, %87 : vector<16x40xf32>
    %89 = vector.extract_strided_slice %82 {offsets = [0, 1], sizes = [16, 39], strides = [1, 1]} : vector<16x40xf32> to vector<16x39xf32>
    %90 = tpu.concatenate %89, %83 in 1 : vector<16x39xf32>, vector<16x1xf32> -> vector<16x40xf32>
    %c888_31 = arith.constant 888 : index
    %c0_32 = arith.constant 0 : index
    %91 = vector.load %arg2[%c888_31, %c0_32] : memref<944x128xf32, #tpu.memory_space<vmem>>, vector<1x40xf32>
    %92 = vector.broadcast %91 : vector<1x40xf32> to vector<16x40xf32>
    %93 = arith.mulf %90, %92 : vector<16x40xf32>
    %94 = arith.addf %81, %88 : vector<16x40xf32>
    %95 = arith.addf %94, %93 : vector<16x40xf32>
    %c32 = arith.constant 32 : index
    %c0_33 = arith.constant 0 : index
    %96 = vector.load %arg2[%c32, %c0_33] : memref<944x128xf32, #tpu.memory_space<vmem>>, vector<16x1xf32>
    %97 = vector.broadcast %96 : vector<16x1xf32> to vector<16x40xf32>
    %98 = arith.addf %95, %97 : vector<16x40xf32>
    %99 = math.tanh %98 : vector<16x40xf32>
    %c2680 = arith.constant 2680 : index
    %c0_34 = arith.constant 0 : index
    %100 = vector.load %arg1[%c2680, %c0_34] : memref<3024x128xbf16, #tpu.memory_space<vmem>>, vector<40x20xbf16>
    %101 = arith.truncf %99 : vector<16x40xf32> to vector<16x40xbf16>
    %cst_35 = arith.constant dense<0.000000e+00> : vector<16x20xf32>
    %102 = tpu.matmul %101, %100, %cst_35 {dimension_numbers = #tpu.dot_dimension_numbers<[1], [0], [0], [1], [0, 0, 1, 1], [], []>} : vector<16x40xbf16>, vector<40x20xbf16>, vector<16x20xf32> -> vector<16x20xf32>
    %c2720 = arith.constant 2720 : index
    %c0_36 = arith.constant 0 : index
    %103 = vector.load %arg1[%c2720, %c0_36] : memref<3024x128xbf16, #tpu.memory_space<vmem>>, vector<40x20xbf16>
    %104 = arith.truncf %99 : vector<16x40xf32> to vector<16x40xbf16>
    %cst_37 = arith.constant dense<0.000000e+00> : vector<16x20xf32>
    %105 = tpu.matmul %104, %103, %cst_37 {dimension_numbers = #tpu.dot_dimension_numbers<[1], [0], [0], [1], [0, 0, 1, 1], [], []>} : vector<16x40xbf16>, vector<40x20xbf16>, vector<16x20xf32> -> vector<16x20xf32>
    %106 = arith.maximumf %102, %105 : vector<16x20xf32>
    %c144 = arith.constant 144 : index
    %c0_38 = arith.constant 0 : index
    %107 = vector.load %arg1[%c144, %c0_38] : memref<3024x128xbf16, #tpu.memory_space<vmem>>, vector<96x16xbf16>
    %108 = arith.truncf %106 : vector<16x20xf32> to vector<16x20xbf16>
    %cst_39 = arith.constant dense<0.000000e+00> : vector<96x20xf32>
    %109 = tpu.matmul %107, %108, %cst_39 {dimension_numbers = #tpu.dot_dimension_numbers<[1], [0], [0], [1], [0, 0, 1, 1], [], []>} : vector<96x16xbf16>, vector<16x20xbf16>, vector<96x20xf32> -> vector<96x20xf32>
    %110 = vector.extract_strided_slice %109 {offsets = [0, 0], sizes = [32, 20], strides = [1, 1]} : vector<96x20xf32> to vector<32x20xf32>
    %111 = vector.extract_strided_slice %109 {offsets = [32, 0], sizes = [32, 20], strides = [1, 1]} : vector<96x20xf32> to vector<32x20xf32>
    %112 = vector.extract_strided_slice %109 {offsets = [64, 0], sizes = [32, 20], strides = [1, 1]} : vector<96x20xf32> to vector<32x20xf32>
    %cst_40 = arith.constant 0.000000e+00 : f32
    %113 = vector.broadcast %cst_40 : f32 to vector<32x1xf32>
    %114 = vector.extract_strided_slice %110 {offsets = [0, 0], sizes = [32, 19], strides = [1, 1]} : vector<32x20xf32> to vector<32x19xf32>
    %115 = tpu.concatenate %113, %114 in 1 : vector<32x1xf32>, vector<32x19xf32> -> vector<32x20xf32>
    %c896 = arith.constant 896 : index
    %c0_41 = arith.constant 0 : index
    %116 = vector.load %arg2[%c896, %c0_41] : memref<944x128xf32, #tpu.memory_space<vmem>>, vector<1x20xf32>
    %117 = vector.broadcast %116 : vector<1x20xf32> to vector<32x20xf32>
    %118 = arith.mulf %115, %117 : vector<32x20xf32>
    %119 = vector.extract_strided_slice %112 {offsets = [0, 1], sizes = [32, 19], strides = [1, 1]} : vector<32x20xf32> to vector<32x19xf32>
    %120 = tpu.concatenate %119, %113 in 1 : vector<32x19xf32>, vector<32x1xf32> -> vector<32x20xf32>
    %c904 = arith.constant 904 : index
    %c0_42 = arith.constant 0 : index
    %121 = vector.load %arg2[%c904, %c0_42] : memref<944x128xf32, #tpu.memory_space<vmem>>, vector<1x20xf32>
    %122 = vector.broadcast %121 : vector<1x20xf32> to vector<32x20xf32>
    %123 = arith.mulf %120, %122 : vector<32x20xf32>
    %124 = arith.addf %111, %118 : vector<32x20xf32>
    %125 = arith.addf %124, %123 : vector<32x20xf32>
    %c48_43 = arith.constant 48 : index
    %c0_44 = arith.constant 0 : index
    %126 = vector.load %arg2[%c48_43, %c0_44] : memref<944x128xf32, #tpu.memory_space<vmem>>, vector<32x1xf32>
    %127 = vector.broadcast %126 : vector<32x1xf32> to vector<32x20xf32>
    %128 = arith.addf %125, %127 : vector<32x20xf32>
    %129 = math.tanh %128 : vector<32x20xf32>
    %c240 = arith.constant 240 : index
    %c0_45 = arith.constant 0 : index
    %130 = vector.load %arg1[%c240, %c0_45] : memref<3024x128xbf16, #tpu.memory_space<vmem>>, vector<96x32xbf16>
    %131 = arith.truncf %129 : vector<32x20xf32> to vector<32x20xbf16>
    %cst_46 = arith.constant dense<0.000000e+00> : vector<96x20xf32>
    %132 = tpu.matmul %130, %131, %cst_46 {dimension_numbers = #tpu.dot_dimension_numbers<[1], [0], [0], [1], [0, 0, 1, 1], [], []>} : vector<96x32xbf16>, vector<32x20xbf16>, vector<96x20xf32> -> vector<96x20xf32>
    %133 = vector.extract_strided_slice %132 {offsets = [0, 0], sizes = [32, 20], strides = [1, 1]} : vector<96x20xf32> to vector<32x20xf32>
    %134 = vector.extract_strided_slice %132 {offsets = [32, 0], sizes = [32, 20], strides = [1, 1]} : vector<96x20xf32> to vector<32x20xf32>
    %135 = vector.extract_strided_slice %132 {offsets = [64, 0], sizes = [32, 20], strides = [1, 1]} : vector<96x20xf32> to vector<32x20xf32>
    %cst_47 = arith.constant 0.000000e+00 : f32
    %136 = vector.broadcast %cst_47 : f32 to vector<32x1xf32>
    %137 = vector.extract_strided_slice %133 {offsets = [0, 0], sizes = [32, 19], strides = [1, 1]} : vector<32x20xf32> to vector<32x19xf32>
    %138 = tpu.concatenate %136, %137 in 1 : vector<32x1xf32>, vector<32x19xf32> -> vector<32x20xf32>
    %c896_48 = arith.constant 896 : index
    %c0_49 = arith.constant 0 : index
    %139 = vector.load %arg2[%c896_48, %c0_49] : memref<944x128xf32, #tpu.memory_space<vmem>>, vector<1x20xf32>
    %140 = vector.broadcast %139 : vector<1x20xf32> to vector<32x20xf32>
    %141 = arith.mulf %138, %140 : vector<32x20xf32>
    %142 = vector.extract_strided_slice %135 {offsets = [0, 1], sizes = [32, 19], strides = [1, 1]} : vector<32x20xf32> to vector<32x19xf32>
    %143 = tpu.concatenate %142, %136 in 1 : vector<32x19xf32>, vector<32x1xf32> -> vector<32x20xf32>
    %c904_50 = arith.constant 904 : index
    %c0_51 = arith.constant 0 : index
    %144 = vector.load %arg2[%c904_50, %c0_51] : memref<944x128xf32, #tpu.memory_space<vmem>>, vector<1x20xf32>
    %145 = vector.broadcast %144 : vector<1x20xf32> to vector<32x20xf32>
    %146 = arith.mulf %143, %145 : vector<32x20xf32>
    %147 = arith.addf %134, %141 : vector<32x20xf32>
    %148 = arith.addf %147, %146 : vector<32x20xf32>
    %c80 = arith.constant 80 : index
    %c0_52 = arith.constant 0 : index
    %149 = vector.load %arg2[%c80, %c0_52] : memref<944x128xf32, #tpu.memory_space<vmem>>, vector<32x1xf32>
    %150 = vector.broadcast %149 : vector<32x1xf32> to vector<32x20xf32>
    %151 = arith.addf %148, %150 : vector<32x20xf32>
    %152 = math.tanh %151 : vector<32x20xf32>
    %c2760 = arith.constant 2760 : index
    %c0_53 = arith.constant 0 : index
    %153 = vector.load %arg1[%c2760, %c0_53] : memref<3024x128xbf16, #tpu.memory_space<vmem>>, vector<20x10xbf16>
    %154 = arith.truncf %152 : vector<32x20xf32> to vector<32x20xbf16>
    %cst_54 = arith.constant dense<0.000000e+00> : vector<32x10xf32>
    %155 = tpu.matmul %154, %153, %cst_54 {dimension_numbers = #tpu.dot_dimension_numbers<[1], [0], [0], [1], [0, 0, 1, 1], [], []>} : vector<32x20xbf16>, vector<20x10xbf16>, vector<32x10xf32> -> vector<32x10xf32>
    %c2784 = arith.constant 2784 : index
    %c0_55 = arith.constant 0 : index
    %156 = vector.load %arg1[%c2784, %c0_55] : memref<3024x128xbf16, #tpu.memory_space<vmem>>, vector<20x10xbf16>
    %157 = arith.truncf %152 : vector<32x20xf32> to vector<32x20xbf16>
    %cst_56 = arith.constant dense<0.000000e+00> : vector<32x10xf32>
    %158 = tpu.matmul %157, %156, %cst_56 {dimension_numbers = #tpu.dot_dimension_numbers<[1], [0], [0], [1], [0, 0, 1, 1], [], []>} : vector<32x20xbf16>, vector<20x10xbf16>, vector<32x10xf32> -> vector<32x10xf32>
    %159 = arith.maximumf %155, %158 : vector<32x10xf32>
    %c336 = arith.constant 336 : index
    %c0_57 = arith.constant 0 : index
    %160 = vector.load %arg1[%c336, %c0_57] : memref<3024x128xbf16, #tpu.memory_space<vmem>>, vector<192x32xbf16>
    %161 = arith.truncf %159 : vector<32x10xf32> to vector<32x10xbf16>
    %cst_58 = arith.constant dense<0.000000e+00> : vector<192x10xf32>
    %162 = tpu.matmul %160, %161, %cst_58 {dimension_numbers = #tpu.dot_dimension_numbers<[1], [0], [0], [1], [0, 0, 1, 1], [], []>} : vector<192x32xbf16>, vector<32x10xbf16>, vector<192x10xf32> -> vector<192x10xf32>
    %163 = vector.extract_strided_slice %162 {offsets = [0, 0], sizes = [64, 10], strides = [1, 1]} : vector<192x10xf32> to vector<64x10xf32>
    %164 = vector.extract_strided_slice %162 {offsets = [64, 0], sizes = [64, 10], strides = [1, 1]} : vector<192x10xf32> to vector<64x10xf32>
    %165 = vector.extract_strided_slice %162 {offsets = [128, 0], sizes = [64, 10], strides = [1, 1]} : vector<192x10xf32> to vector<64x10xf32>
    %cst_59 = arith.constant 0.000000e+00 : f32
    %166 = vector.broadcast %cst_59 : f32 to vector<64x1xf32>
    %167 = vector.extract_strided_slice %163 {offsets = [0, 0], sizes = [64, 9], strides = [1, 1]} : vector<64x10xf32> to vector<64x9xf32>
    %168 = tpu.concatenate %166, %167 in 1 : vector<64x1xf32>, vector<64x9xf32> -> vector<64x10xf32>
    %c912 = arith.constant 912 : index
    %c0_60 = arith.constant 0 : index
    %169 = vector.load %arg2[%c912, %c0_60] : memref<944x128xf32, #tpu.memory_space<vmem>>, vector<1x10xf32>
    %170 = vector.broadcast %169 : vector<1x10xf32> to vector<64x10xf32>
    %171 = arith.mulf %168, %170 : vector<64x10xf32>
    %172 = vector.extract_strided_slice %165 {offsets = [0, 1], sizes = [64, 9], strides = [1, 1]} : vector<64x10xf32> to vector<64x9xf32>
    %173 = tpu.concatenate %172, %166 in 1 : vector<64x9xf32>, vector<64x1xf32> -> vector<64x10xf32>
    %c920 = arith.constant 920 : index
    %c0_61 = arith.constant 0 : index
    %174 = vector.load %arg2[%c920, %c0_61] : memref<944x128xf32, #tpu.memory_space<vmem>>, vector<1x10xf32>
    %175 = vector.broadcast %174 : vector<1x10xf32> to vector<64x10xf32>
    %176 = arith.mulf %173, %175 : vector<64x10xf32>
    %177 = arith.addf %164, %171 : vector<64x10xf32>
    %178 = arith.addf %177, %176 : vector<64x10xf32>
    %c112 = arith.constant 112 : index
    %c0_62 = arith.constant 0 : index
    %179 = vector.load %arg2[%c112, %c0_62] : memref<944x128xf32, #tpu.memory_space<vmem>>, vector<64x1xf32>
    %180 = vector.broadcast %179 : vector<64x1xf32> to vector<64x10xf32>
    %181 = arith.addf %178, %180 : vector<64x10xf32>
    %182 = math.tanh %181 : vector<64x10xf32>
    %c528 = arith.constant 528 : index
    %c0_63 = arith.constant 0 : index
    %183 = vector.load %arg1[%c528, %c0_63] : memref<3024x128xbf16, #tpu.memory_space<vmem>>, vector<192x64xbf16>
    %184 = arith.truncf %182 : vector<64x10xf32> to vector<64x10xbf16>
    %cst_64 = arith.constant dense<0.000000e+00> : vector<192x10xf32>
    %185 = tpu.matmul %183, %184, %cst_64 {dimension_numbers = #tpu.dot_dimension_numbers<[1], [0], [0], [1], [0, 0, 1, 1], [], []>} : vector<192x64xbf16>, vector<64x10xbf16>, vector<192x10xf32> -> vector<192x10xf32>
    %186 = vector.extract_strided_slice %185 {offsets = [0, 0], sizes = [64, 10], strides = [1, 1]} : vector<192x10xf32> to vector<64x10xf32>
    %187 = vector.extract_strided_slice %185 {offsets = [64, 0], sizes = [64, 10], strides = [1, 1]} : vector<192x10xf32> to vector<64x10xf32>
    %188 = vector.extract_strided_slice %185 {offsets = [128, 0], sizes = [64, 10], strides = [1, 1]} : vector<192x10xf32> to vector<64x10xf32>
    %cst_65 = arith.constant 0.000000e+00 : f32
    %189 = vector.broadcast %cst_65 : f32 to vector<64x1xf32>
    %190 = vector.extract_strided_slice %186 {offsets = [0, 0], sizes = [64, 9], strides = [1, 1]} : vector<64x10xf32> to vector<64x9xf32>
    %191 = tpu.concatenate %189, %190 in 1 : vector<64x1xf32>, vector<64x9xf32> -> vector<64x10xf32>
    %c912_66 = arith.constant 912 : index
    %c0_67 = arith.constant 0 : index
    %192 = vector.load %arg2[%c912_66, %c0_67] : memref<944x128xf32, #tpu.memory_space<vmem>>, vector<1x10xf32>
    %193 = vector.broadcast %192 : vector<1x10xf32> to vector<64x10xf32>
    %194 = arith.mulf %191, %193 : vector<64x10xf32>
    %195 = vector.extract_strided_slice %188 {offsets = [0, 1], sizes = [64, 9], strides = [1, 1]} : vector<64x10xf32> to vector<64x9xf32>
    %196 = tpu.concatenate %195, %189 in 1 : vector<64x9xf32>, vector<64x1xf32> -> vector<64x10xf32>
    %c920_68 = arith.constant 920 : index
    %c0_69 = arith.constant 0 : index
    %197 = vector.load %arg2[%c920_68, %c0_69] : memref<944x128xf32, #tpu.memory_space<vmem>>, vector<1x10xf32>
    %198 = vector.broadcast %197 : vector<1x10xf32> to vector<64x10xf32>
    %199 = arith.mulf %196, %198 : vector<64x10xf32>
    %200 = arith.addf %187, %194 : vector<64x10xf32>
    %201 = arith.addf %200, %199 : vector<64x10xf32>
    %c176 = arith.constant 176 : index
    %c0_70 = arith.constant 0 : index
    %202 = vector.load %arg2[%c176, %c0_70] : memref<944x128xf32, #tpu.memory_space<vmem>>, vector<64x1xf32>
    %203 = vector.broadcast %202 : vector<64x1xf32> to vector<64x10xf32>
    %204 = arith.addf %201, %203 : vector<64x10xf32>
    %205 = math.tanh %204 : vector<64x10xf32>
    %c2808 = arith.constant 2808 : index
    %c0_71 = arith.constant 0 : index
    %206 = vector.load %arg1[%c2808, %c0_71] : memref<3024x128xbf16, #tpu.memory_space<vmem>>, vector<10x4xbf16>
    %207 = arith.truncf %205 : vector<64x10xf32> to vector<64x10xbf16>
    %cst_72 = arith.constant dense<0.000000e+00> : vector<64x4xf32>
    %208 = tpu.matmul %207, %206, %cst_72 {dimension_numbers = #tpu.dot_dimension_numbers<[1], [0], [0], [1], [0, 0, 1, 1], [], []>} : vector<64x10xbf16>, vector<10x4xbf16>, vector<64x4xf32> -> vector<64x4xf32>
    %c2824 = arith.constant 2824 : index
    %c0_73 = arith.constant 0 : index
    %209 = vector.load %arg1[%c2824, %c0_73] : memref<3024x128xbf16, #tpu.memory_space<vmem>>, vector<10x4xbf16>
    %210 = arith.truncf %205 : vector<64x10xf32> to vector<64x10xbf16>
    %cst_74 = arith.constant dense<0.000000e+00> : vector<64x4xf32>
    %211 = tpu.matmul %210, %209, %cst_74 {dimension_numbers = #tpu.dot_dimension_numbers<[1], [0], [0], [1], [0, 0, 1, 1], [], []>} : vector<64x10xbf16>, vector<10x4xbf16>, vector<64x4xf32> -> vector<64x4xf32>
    %212 = arith.maximumf %208, %211 : vector<64x4xf32>
    %c720 = arith.constant 720 : index
    %c0_75 = arith.constant 0 : index
    %213 = vector.load %arg1[%c720, %c0_75] : memref<3024x128xbf16, #tpu.memory_space<vmem>>, vector<384x64xbf16>
    %214 = arith.truncf %212 : vector<64x4xf32> to vector<64x4xbf16>
    %cst_76 = arith.constant dense<0.000000e+00> : vector<384x4xf32>
    %215 = tpu.matmul %213, %214, %cst_76 {dimension_numbers = #tpu.dot_dimension_numbers<[1], [0], [0], [1], [0, 0, 1, 1], [], []>} : vector<384x64xbf16>, vector<64x4xbf16>, vector<384x4xf32> -> vector<384x4xf32>
    %216 = vector.extract_strided_slice %215 {offsets = [0, 0], sizes = [128, 4], strides = [1, 1]} : vector<384x4xf32> to vector<128x4xf32>
    %217 = vector.extract_strided_slice %215 {offsets = [128, 0], sizes = [128, 4], strides = [1, 1]} : vector<384x4xf32> to vector<128x4xf32>
    %218 = vector.extract_strided_slice %215 {offsets = [256, 0], sizes = [128, 4], strides = [1, 1]} : vector<384x4xf32> to vector<128x4xf32>
    %cst_77 = arith.constant 0.000000e+00 : f32
    %219 = vector.broadcast %cst_77 : f32 to vector<128x1xf32>
    %220 = vector.extract_strided_slice %216 {offsets = [0, 0], sizes = [128, 3], strides = [1, 1]} : vector<128x4xf32> to vector<128x3xf32>
    %221 = tpu.concatenate %219, %220 in 1 : vector<128x1xf32>, vector<128x3xf32> -> vector<128x4xf32>
    %c928 = arith.constant 928 : index
    %c0_78 = arith.constant 0 : index
    %222 = vector.load %arg2[%c928, %c0_78] : memref<944x128xf32, #tpu.memory_space<vmem>>, vector<1x4xf32>
    %223 = vector.broadcast %222 : vector<1x4xf32> to vector<128x4xf32>
    %224 = arith.mulf %221, %223 : vector<128x4xf32>
    %225 = vector.extract_strided_slice %218 {offsets = [0, 1], sizes = [128, 3], strides = [1, 1]} : vector<128x4xf32> to vector<128x3xf32>
    %226 = tpu.concatenate %225, %219 in 1 : vector<128x3xf32>, vector<128x1xf32> -> vector<128x4xf32>
    %c936 = arith.constant 936 : index
    %c0_79 = arith.constant 0 : index
    %227 = vector.load %arg2[%c936, %c0_79] : memref<944x128xf32, #tpu.memory_space<vmem>>, vector<1x4xf32>
    %228 = vector.broadcast %227 : vector<1x4xf32> to vector<128x4xf32>
    %229 = arith.mulf %226, %228 : vector<128x4xf32>
    %230 = arith.addf %217, %224 : vector<128x4xf32>
    %231 = arith.addf %230, %229 : vector<128x4xf32>
    %c240_80 = arith.constant 240 : index
    %c0_81 = arith.constant 0 : index
    %232 = vector.load %arg2[%c240_80, %c0_81] : memref<944x128xf32, #tpu.memory_space<vmem>>, vector<128x1xf32>
    %233 = vector.broadcast %232 : vector<128x1xf32> to vector<128x4xf32>
    %234 = arith.addf %231, %233 : vector<128x4xf32>
    %235 = math.tanh %234 : vector<128x4xf32>
    %c1104 = arith.constant 1104 : index
    %c0_82 = arith.constant 0 : index
    %236 = vector.load %arg1[%c1104, %c0_82] : memref<3024x128xbf16, #tpu.memory_space<vmem>>, vector<384x128xbf16>
    %237 = arith.truncf %235 : vector<128x4xf32> to vector<128x4xbf16>
    %cst_83 = arith.constant dense<0.000000e+00> : vector<384x4xf32>
    %238 = tpu.matmul %236, %237, %cst_83 {dimension_numbers = #tpu.dot_dimension_numbers<[1], [0], [0], [1], [0, 0, 1, 1], [], []>} : vector<384x128xbf16>, vector<128x4xbf16>, vector<384x4xf32> -> vector<384x4xf32>
    %239 = vector.extract_strided_slice %238 {offsets = [0, 0], sizes = [128, 4], strides = [1, 1]} : vector<384x4xf32> to vector<128x4xf32>
    %240 = vector.extract_strided_slice %238 {offsets = [128, 0], sizes = [128, 4], strides = [1, 1]} : vector<384x4xf32> to vector<128x4xf32>
    %241 = vector.extract_strided_slice %238 {offsets = [256, 0], sizes = [128, 4], strides = [1, 1]} : vector<384x4xf32> to vector<128x4xf32>
    %cst_84 = arith.constant 0.000000e+00 : f32
    %242 = vector.broadcast %cst_84 : f32 to vector<128x1xf32>
    %243 = vector.extract_strided_slice %239 {offsets = [0, 0], sizes = [128, 3], strides = [1, 1]} : vector<128x4xf32> to vector<128x3xf32>
    %244 = tpu.concatenate %242, %243 in 1 : vector<128x1xf32>, vector<128x3xf32> -> vector<128x4xf32>
    %c928_85 = arith.constant 928 : index
    %c0_86 = arith.constant 0 : index
    %245 = vector.load %arg2[%c928_85, %c0_86] : memref<944x128xf32, #tpu.memory_space<vmem>>, vector<1x4xf32>
    %246 = vector.broadcast %245 : vector<1x4xf32> to vector<128x4xf32>
    %247 = arith.mulf %244, %246 : vector<128x4xf32>
    %248 = vector.extract_strided_slice %241 {offsets = [0, 1], sizes = [128, 3], strides = [1, 1]} : vector<128x4xf32> to vector<128x3xf32>
    %249 = tpu.concatenate %248, %242 in 1 : vector<128x3xf32>, vector<128x1xf32> -> vector<128x4xf32>
    %c936_87 = arith.constant 936 : index
    %c0_88 = arith.constant 0 : index
    %250 = vector.load %arg2[%c936_87, %c0_88] : memref<944x128xf32, #tpu.memory_space<vmem>>, vector<1x4xf32>
    %251 = vector.broadcast %250 : vector<1x4xf32> to vector<128x4xf32>
    %252 = arith.mulf %249, %251 : vector<128x4xf32>
    %253 = arith.addf %240, %247 : vector<128x4xf32>
    %254 = arith.addf %253, %252 : vector<128x4xf32>
    %c368 = arith.constant 368 : index
    %c0_89 = arith.constant 0 : index
    %255 = vector.load %arg2[%c368, %c0_89] : memref<944x128xf32, #tpu.memory_space<vmem>>, vector<128x1xf32>
    %256 = vector.broadcast %255 : vector<128x1xf32> to vector<128x4xf32>
    %257 = arith.addf %254, %256 : vector<128x4xf32>
    %258 = math.tanh %257 : vector<128x4xf32>
    %c2208 = arith.constant 2208 : index
    %c0_90 = arith.constant 0 : index
    %259 = vector.load %arg1[%c2208, %c0_90] : memref<3024x128xbf16, #tpu.memory_space<vmem>>, vector<192x128xbf16>
    %260 = arith.truncf %258 : vector<128x4xf32> to vector<128x4xbf16>
    %cst_91 = arith.constant dense<0.000000e+00> : vector<192x4xf32>
    %261 = tpu.matmul %259, %260, %cst_91 {dimension_numbers = #tpu.dot_dimension_numbers<[1], [0], [0], [1], [0, 0, 1, 1], [], []>} : vector<192x128xbf16>, vector<128x4xbf16>, vector<192x4xf32> -> vector<192x4xf32>
    %262 = vector.extract_strided_slice %261 {offsets = [0, 0], sizes = [64, 4], strides = [1, 1]} : vector<192x4xf32> to vector<64x4xf32>
    %c2840 = arith.constant 2840 : index
    %c0_92 = arith.constant 0 : index
    %263 = vector.load %arg1[%c2840, %c0_92] : memref<3024x128xbf16, #tpu.memory_space<vmem>>, vector<4x10xbf16>
    %264 = arith.truncf %262 : vector<64x4xf32> to vector<64x4xbf16>
    %cst_93 = arith.constant dense<0.000000e+00> : vector<64x10xf32>
    %265 = tpu.matmul %264, %263, %cst_93 {dimension_numbers = #tpu.dot_dimension_numbers<[1], [0], [0], [1], [0, 0, 1, 1], [], []>} : vector<64x4xbf16>, vector<4x10xbf16>, vector<64x10xf32> -> vector<64x10xf32>
    %266 = vector.extract_strided_slice %261 {offsets = [64, 0], sizes = [64, 4], strides = [1, 1]} : vector<192x4xf32> to vector<64x4xf32>
    %c2848 = arith.constant 2848 : index
    %c0_94 = arith.constant 0 : index
    %267 = vector.load %arg1[%c2848, %c0_94] : memref<3024x128xbf16, #tpu.memory_space<vmem>>, vector<4x10xbf16>
    %268 = arith.truncf %266 : vector<64x4xf32> to vector<64x4xbf16>
    %cst_95 = arith.constant dense<0.000000e+00> : vector<64x10xf32>
    %269 = tpu.matmul %268, %267, %cst_95 {dimension_numbers = #tpu.dot_dimension_numbers<[1], [0], [0], [1], [0, 0, 1, 1], [], []>} : vector<64x4xbf16>, vector<4x10xbf16>, vector<64x10xf32> -> vector<64x10xf32>
    %270 = arith.addf %265, %269 : vector<64x10xf32>
    %271 = vector.extract_strided_slice %261 {offsets = [128, 0], sizes = [64, 4], strides = [1, 1]} : vector<192x4xf32> to vector<64x4xf32>
    %c2856 = arith.constant 2856 : index
    %c0_96 = arith.constant 0 : index
    %272 = vector.load %arg1[%c2856, %c0_96] : memref<3024x128xbf16, #tpu.memory_space<vmem>>, vector<4x10xbf16>
    %273 = arith.truncf %271 : vector<64x4xf32> to vector<64x4xbf16>
    %cst_97 = arith.constant dense<0.000000e+00> : vector<64x10xf32>
    %274 = tpu.matmul %273, %272, %cst_97 {dimension_numbers = #tpu.dot_dimension_numbers<[1], [0], [0], [1], [0, 0, 1, 1], [], []>} : vector<64x4xbf16>, vector<4x10xbf16>, vector<64x10xf32> -> vector<64x10xf32>
    %275 = arith.addf %270, %274 : vector<64x10xf32>
    %c736 = arith.constant 736 : index
    %c0_98 = arith.constant 0 : index
    %276 = vector.load %arg2[%c736, %c0_98] : memref<944x128xf32, #tpu.memory_space<vmem>>, vector<64x1xf32>
    %277 = vector.broadcast %276 : vector<64x1xf32> to vector<64x10xf32>
    %278 = arith.addf %275, %277 : vector<64x10xf32>
    %279 = tpu.concatenate %278, %205 in 0 : vector<64x10xf32>, vector<64x10xf32> -> vector<128x10xf32>
    %c1488 = arith.constant 1488 : index
    %c0_99 = arith.constant 0 : index
    %280 = vector.load %arg1[%c1488, %c0_99] : memref<3024x128xbf16, #tpu.memory_space<vmem>>, vector<192x128xbf16>
    %281 = arith.truncf %279 : vector<128x10xf32> to vector<128x10xbf16>
    %cst_100 = arith.constant dense<0.000000e+00> : vector<192x10xf32>
    %282 = tpu.matmul %280, %281, %cst_100 {dimension_numbers = #tpu.dot_dimension_numbers<[1], [0], [0], [1], [0, 0, 1, 1], [], []>} : vector<192x128xbf16>, vector<128x10xbf16>, vector<192x10xf32> -> vector<192x10xf32>
    %283 = vector.extract_strided_slice %282 {offsets = [0, 0], sizes = [64, 10], strides = [1, 1]} : vector<192x10xf32> to vector<64x10xf32>
    %284 = vector.extract_strided_slice %282 {offsets = [64, 0], sizes = [64, 10], strides = [1, 1]} : vector<192x10xf32> to vector<64x10xf32>
    %285 = vector.extract_strided_slice %282 {offsets = [128, 0], sizes = [64, 10], strides = [1, 1]} : vector<192x10xf32> to vector<64x10xf32>
    %cst_101 = arith.constant 0.000000e+00 : f32
    %286 = vector.broadcast %cst_101 : f32 to vector<64x1xf32>
    %287 = vector.extract_strided_slice %283 {offsets = [0, 0], sizes = [64, 9], strides = [1, 1]} : vector<64x10xf32> to vector<64x9xf32>
    %288 = tpu.concatenate %286, %287 in 1 : vector<64x1xf32>, vector<64x9xf32> -> vector<64x10xf32>
    %c912_102 = arith.constant 912 : index
    %c0_103 = arith.constant 0 : index
    %289 = vector.load %arg2[%c912_102, %c0_103] : memref<944x128xf32, #tpu.memory_space<vmem>>, vector<1x10xf32>
    %290 = vector.broadcast %289 : vector<1x10xf32> to vector<64x10xf32>
    %291 = arith.mulf %288, %290 : vector<64x10xf32>
    %292 = vector.extract_strided_slice %285 {offsets = [0, 1], sizes = [64, 9], strides = [1, 1]} : vector<64x10xf32> to vector<64x9xf32>
    %293 = tpu.concatenate %292, %286 in 1 : vector<64x9xf32>, vector<64x1xf32> -> vector<64x10xf32>
    %c920_104 = arith.constant 920 : index
    %c0_105 = arith.constant 0 : index
    %294 = vector.load %arg2[%c920_104, %c0_105] : memref<944x128xf32, #tpu.memory_space<vmem>>, vector<1x10xf32>
    %295 = vector.broadcast %294 : vector<1x10xf32> to vector<64x10xf32>
    %296 = arith.mulf %293, %295 : vector<64x10xf32>
    %297 = arith.addf %284, %291 : vector<64x10xf32>
    %298 = arith.addf %297, %296 : vector<64x10xf32>
    %c496 = arith.constant 496 : index
    %c0_106 = arith.constant 0 : index
    %299 = vector.load %arg2[%c496, %c0_106] : memref<944x128xf32, #tpu.memory_space<vmem>>, vector<64x1xf32>
    %300 = vector.broadcast %299 : vector<64x1xf32> to vector<64x10xf32>
    %301 = arith.addf %298, %300 : vector<64x10xf32>
    %302 = math.tanh %301 : vector<64x10xf32>
    %c1680 = arith.constant 1680 : index
    %c0_107 = arith.constant 0 : index
    %303 = vector.load %arg1[%c1680, %c0_107] : memref<3024x128xbf16, #tpu.memory_space<vmem>>, vector<192x64xbf16>
    %304 = arith.truncf %302 : vector<64x10xf32> to vector<64x10xbf16>
    %cst_108 = arith.constant dense<0.000000e+00> : vector<192x10xf32>
    %305 = tpu.matmul %303, %304, %cst_108 {dimension_numbers = #tpu.dot_dimension_numbers<[1], [0], [0], [1], [0, 0, 1, 1], [], []>} : vector<192x64xbf16>, vector<64x10xbf16>, vector<192x10xf32> -> vector<192x10xf32>
    %306 = vector.extract_strided_slice %305 {offsets = [0, 0], sizes = [64, 10], strides = [1, 1]} : vector<192x10xf32> to vector<64x10xf32>
    %307 = vector.extract_strided_slice %305 {offsets = [64, 0], sizes = [64, 10], strides = [1, 1]} : vector<192x10xf32> to vector<64x10xf32>
    %308 = vector.extract_strided_slice %305 {offsets = [128, 0], sizes = [64, 10], strides = [1, 1]} : vector<192x10xf32> to vector<64x10xf32>
    %cst_109 = arith.constant 0.000000e+00 : f32
    %309 = vector.broadcast %cst_109 : f32 to vector<64x1xf32>
    %310 = vector.extract_strided_slice %306 {offsets = [0, 0], sizes = [64, 9], strides = [1, 1]} : vector<64x10xf32> to vector<64x9xf32>
    %311 = tpu.concatenate %309, %310 in 1 : vector<64x1xf32>, vector<64x9xf32> -> vector<64x10xf32>
    %c912_110 = arith.constant 912 : index
    %c0_111 = arith.constant 0 : index
    %312 = vector.load %arg2[%c912_110, %c0_111] : memref<944x128xf32, #tpu.memory_space<vmem>>, vector<1x10xf32>
    %313 = vector.broadcast %312 : vector<1x10xf32> to vector<64x10xf32>
    %314 = arith.mulf %311, %313 : vector<64x10xf32>
    %315 = vector.extract_strided_slice %308 {offsets = [0, 1], sizes = [64, 9], strides = [1, 1]} : vector<64x10xf32> to vector<64x9xf32>
    %316 = tpu.concatenate %315, %309 in 1 : vector<64x9xf32>, vector<64x1xf32> -> vector<64x10xf32>
    %c920_112 = arith.constant 920 : index
    %c0_113 = arith.constant 0 : index
    %317 = vector.load %arg2[%c920_112, %c0_113] : memref<944x128xf32, #tpu.memory_space<vmem>>, vector<1x10xf32>
    %318 = vector.broadcast %317 : vector<1x10xf32> to vector<64x10xf32>
    %319 = arith.mulf %316, %318 : vector<64x10xf32>
    %320 = arith.addf %307, %314 : vector<64x10xf32>
    %321 = arith.addf %320, %319 : vector<64x10xf32>
    %c560 = arith.constant 560 : index
    %c0_114 = arith.constant 0 : index
    %322 = vector.load %arg2[%c560, %c0_114] : memref<944x128xf32, #tpu.memory_space<vmem>>, vector<64x1xf32>
    %323 = vector.broadcast %322 : vector<64x1xf32> to vector<64x10xf32>
    %324 = arith.addf %321, %323 : vector<64x10xf32>
    %325 = math.tanh %324 : vector<64x10xf32>
    %c2400 = arith.constant 2400 : index
    %c0_115 = arith.constant 0 : index
    %326 = vector.load %arg1[%c2400, %c0_115] : memref<3024x128xbf16, #tpu.memory_space<vmem>>, vector<64x64xbf16>
    %327 = arith.truncf %325 : vector<64x10xf32> to vector<64x10xbf16>
    %cst_116 = arith.constant dense<0.000000e+00> : vector<64x10xf32>
    %328 = tpu.matmul %326, %327, %cst_116 {dimension_numbers = #tpu.dot_dimension_numbers<[1], [0], [0], [1], [0, 0, 1, 1], [], []>} : vector<64x64xbf16>, vector<64x10xbf16>, vector<64x10xf32> -> vector<64x10xf32>
    %329 = vector.extract_strided_slice %328 {offsets = [0, 0], sizes = [32, 10], strides = [1, 1]} : vector<64x10xf32> to vector<32x10xf32>
    %c2864 = arith.constant 2864 : index
    %c0_117 = arith.constant 0 : index
    %330 = vector.load %arg1[%c2864, %c0_117] : memref<3024x128xbf16, #tpu.memory_space<vmem>>, vector<10x20xbf16>
    %331 = arith.truncf %329 : vector<32x10xf32> to vector<32x10xbf16>
    %cst_118 = arith.constant dense<0.000000e+00> : vector<32x20xf32>
    %332 = tpu.matmul %331, %330, %cst_118 {dimension_numbers = #tpu.dot_dimension_numbers<[1], [0], [0], [1], [0, 0, 1, 1], [], []>} : vector<32x10xbf16>, vector<10x20xbf16>, vector<32x20xf32> -> vector<32x20xf32>
    %333 = vector.extract_strided_slice %328 {offsets = [32, 0], sizes = [32, 10], strides = [1, 1]} : vector<64x10xf32> to vector<32x10xf32>
    %c2880 = arith.constant 2880 : index
    %c0_119 = arith.constant 0 : index
    %334 = vector.load %arg1[%c2880, %c0_119] : memref<3024x128xbf16, #tpu.memory_space<vmem>>, vector<10x20xbf16>
    %335 = arith.truncf %333 : vector<32x10xf32> to vector<32x10xbf16>
    %cst_120 = arith.constant dense<0.000000e+00> : vector<32x20xf32>
    %336 = tpu.matmul %335, %334, %cst_120 {dimension_numbers = #tpu.dot_dimension_numbers<[1], [0], [0], [1], [0, 0, 1, 1], [], []>} : vector<32x10xbf16>, vector<10x20xbf16>, vector<32x20xf32> -> vector<32x20xf32>
    %337 = arith.addf %332, %336 : vector<32x20xf32>
    %c800 = arith.constant 800 : index
    %c0_121 = arith.constant 0 : index
    %338 = vector.load %arg2[%c800, %c0_121] : memref<944x128xf32, #tpu.memory_space<vmem>>, vector<32x1xf32>
    %339 = vector.broadcast %338 : vector<32x1xf32> to vector<32x20xf32>
    %340 = arith.addf %337, %339 : vector<32x20xf32>
    %341 = tpu.concatenate %340, %152 in 0 : vector<32x20xf32>, vector<32x20xf32> -> vector<64x20xf32>
    %c1872 = arith.constant 1872 : index
    %c0_122 = arith.constant 0 : index
    %342 = vector.load %arg1[%c1872, %c0_122] : memref<3024x128xbf16, #tpu.memory_space<vmem>>, vector<96x64xbf16>
    %343 = arith.truncf %341 : vector<64x20xf32> to vector<64x20xbf16>
    %cst_123 = arith.constant dense<0.000000e+00> : vector<96x20xf32>
    %344 = tpu.matmul %342, %343, %cst_123 {dimension_numbers = #tpu.dot_dimension_numbers<[1], [0], [0], [1], [0, 0, 1, 1], [], []>} : vector<96x64xbf16>, vector<64x20xbf16>, vector<96x20xf32> -> vector<96x20xf32>
    %345 = vector.extract_strided_slice %344 {offsets = [0, 0], sizes = [32, 20], strides = [1, 1]} : vector<96x20xf32> to vector<32x20xf32>
    %346 = vector.extract_strided_slice %344 {offsets = [32, 0], sizes = [32, 20], strides = [1, 1]} : vector<96x20xf32> to vector<32x20xf32>
    %347 = vector.extract_strided_slice %344 {offsets = [64, 0], sizes = [32, 20], strides = [1, 1]} : vector<96x20xf32> to vector<32x20xf32>
    %cst_124 = arith.constant 0.000000e+00 : f32
    %348 = vector.broadcast %cst_124 : f32 to vector<32x1xf32>
    %349 = vector.extract_strided_slice %345 {offsets = [0, 0], sizes = [32, 19], strides = [1, 1]} : vector<32x20xf32> to vector<32x19xf32>
    %350 = tpu.concatenate %348, %349 in 1 : vector<32x1xf32>, vector<32x19xf32> -> vector<32x20xf32>
    %c896_125 = arith.constant 896 : index
    %c0_126 = arith.constant 0 : index
    %351 = vector.load %arg2[%c896_125, %c0_126] : memref<944x128xf32, #tpu.memory_space<vmem>>, vector<1x20xf32>
    %352 = vector.broadcast %351 : vector<1x20xf32> to vector<32x20xf32>
    %353 = arith.mulf %350, %352 : vector<32x20xf32>
    %354 = vector.extract_strided_slice %347 {offsets = [0, 1], sizes = [32, 19], strides = [1, 1]} : vector<32x20xf32> to vector<32x19xf32>
    %355 = tpu.concatenate %354, %348 in 1 : vector<32x19xf32>, vector<32x1xf32> -> vector<32x20xf32>
    %c904_127 = arith.constant 904 : index
    %c0_128 = arith.constant 0 : index
    %356 = vector.load %arg2[%c904_127, %c0_128] : memref<944x128xf32, #tpu.memory_space<vmem>>, vector<1x20xf32>
    %357 = vector.broadcast %356 : vector<1x20xf32> to vector<32x20xf32>
    %358 = arith.mulf %355, %357 : vector<32x20xf32>
    %359 = arith.addf %346, %353 : vector<32x20xf32>
    %360 = arith.addf %359, %358 : vector<32x20xf32>
    %c624 = arith.constant 624 : index
    %c0_129 = arith.constant 0 : index
    %361 = vector.load %arg2[%c624, %c0_129] : memref<944x128xf32, #tpu.memory_space<vmem>>, vector<32x1xf32>
    %362 = vector.broadcast %361 : vector<32x1xf32> to vector<32x20xf32>
    %363 = arith.addf %360, %362 : vector<32x20xf32>
    %364 = math.tanh %363 : vector<32x20xf32>
    %c1968 = arith.constant 1968 : index
    %c0_130 = arith.constant 0 : index
    %365 = vector.load %arg1[%c1968, %c0_130] : memref<3024x128xbf16, #tpu.memory_space<vmem>>, vector<96x32xbf16>
    %366 = arith.truncf %364 : vector<32x20xf32> to vector<32x20xbf16>
    %cst_131 = arith.constant dense<0.000000e+00> : vector<96x20xf32>
    %367 = tpu.matmul %365, %366, %cst_131 {dimension_numbers = #tpu.dot_dimension_numbers<[1], [0], [0], [1], [0, 0, 1, 1], [], []>} : vector<96x32xbf16>, vector<32x20xbf16>, vector<96x20xf32> -> vector<96x20xf32>
    %368 = vector.extract_strided_slice %367 {offsets = [0, 0], sizes = [32, 20], strides = [1, 1]} : vector<96x20xf32> to vector<32x20xf32>
    %369 = vector.extract_strided_slice %367 {offsets = [32, 0], sizes = [32, 20], strides = [1, 1]} : vector<96x20xf32> to vector<32x20xf32>
    %370 = vector.extract_strided_slice %367 {offsets = [64, 0], sizes = [32, 20], strides = [1, 1]} : vector<96x20xf32> to vector<32x20xf32>
    %cst_132 = arith.constant 0.000000e+00 : f32
    %371 = vector.broadcast %cst_132 : f32 to vector<32x1xf32>
    %372 = vector.extract_strided_slice %368 {offsets = [0, 0], sizes = [32, 19], strides = [1, 1]} : vector<32x20xf32> to vector<32x19xf32>
    %373 = tpu.concatenate %371, %372 in 1 : vector<32x1xf32>, vector<32x19xf32> -> vector<32x20xf32>
    %c896_133 = arith.constant 896 : index
    %c0_134 = arith.constant 0 : index
    %374 = vector.load %arg2[%c896_133, %c0_134] : memref<944x128xf32, #tpu.memory_space<vmem>>, vector<1x20xf32>
    %375 = vector.broadcast %374 : vector<1x20xf32> to vector<32x20xf32>
    %376 = arith.mulf %373, %375 : vector<32x20xf32>
    %377 = vector.extract_strided_slice %370 {offsets = [0, 1], sizes = [32, 19], strides = [1, 1]} : vector<32x20xf32> to vector<32x19xf32>
    %378 = tpu.concatenate %377, %371 in 1 : vector<32x19xf32>, vector<32x1xf32> -> vector<32x20xf32>
    %c904_135 = arith.constant 904 : index
    %c0_136 = arith.constant 0 : index
    %379 = vector.load %arg2[%c904_135, %c0_136] : memref<944x128xf32, #tpu.memory_space<vmem>>, vector<1x20xf32>
    %380 = vector.broadcast %379 : vector<1x20xf32> to vector<32x20xf32>
    %381 = arith.mulf %378, %380 : vector<32x20xf32>
    %382 = arith.addf %369, %376 : vector<32x20xf32>
    %383 = arith.addf %382, %381 : vector<32x20xf32>
    %c656 = arith.constant 656 : index
    %c0_137 = arith.constant 0 : index
    %384 = vector.load %arg2[%c656, %c0_137] : memref<944x128xf32, #tpu.memory_space<vmem>>, vector<32x1xf32>
    %385 = vector.broadcast %384 : vector<32x1xf32> to vector<32x20xf32>
    %386 = arith.addf %383, %385 : vector<32x20xf32>
    %387 = math.tanh %386 : vector<32x20xf32>
    %c2464 = arith.constant 2464 : index
    %c0_138 = arith.constant 0 : index
    %388 = vector.load %arg1[%c2464, %c0_138] : memref<3024x128xbf16, #tpu.memory_space<vmem>>, vector<32x32xbf16>
    %389 = arith.truncf %387 : vector<32x20xf32> to vector<32x20xbf16>
    %cst_139 = arith.constant dense<0.000000e+00> : vector<32x20xf32>
    %390 = tpu.matmul %388, %389, %cst_139 {dimension_numbers = #tpu.dot_dimension_numbers<[1], [0], [0], [1], [0, 0, 1, 1], [], []>} : vector<32x32xbf16>, vector<32x20xbf16>, vector<32x20xf32> -> vector<32x20xf32>
    %391 = vector.extract_strided_slice %390 {offsets = [0, 0], sizes = [16, 20], strides = [1, 1]} : vector<32x20xf32> to vector<16x20xf32>
    %c2896 = arith.constant 2896 : index
    %c0_140 = arith.constant 0 : index
    %392 = vector.load %arg1[%c2896, %c0_140] : memref<3024x128xbf16, #tpu.memory_space<vmem>>, vector<20x40xbf16>
    %393 = arith.truncf %391 : vector<16x20xf32> to vector<16x20xbf16>
    %cst_141 = arith.constant dense<0.000000e+00> : vector<16x40xf32>
    %394 = tpu.matmul %393, %392, %cst_141 {dimension_numbers = #tpu.dot_dimension_numbers<[1], [0], [0], [1], [0, 0, 1, 1], [], []>} : vector<16x20xbf16>, vector<20x40xbf16>, vector<16x40xf32> -> vector<16x40xf32>
    %395 = vector.extract_strided_slice %390 {offsets = [16, 0], sizes = [16, 20], strides = [1, 1]} : vector<32x20xf32> to vector<16x20xf32>
    %c2920 = arith.constant 2920 : index
    %c0_142 = arith.constant 0 : index
    %396 = vector.load %arg1[%c2920, %c0_142] : memref<3024x128xbf16, #tpu.memory_space<vmem>>, vector<20x40xbf16>
    %397 = arith.truncf %395 : vector<16x20xf32> to vector<16x20xbf16>
    %cst_143 = arith.constant dense<0.000000e+00> : vector<16x40xf32>
    %398 = tpu.matmul %397, %396, %cst_143 {dimension_numbers = #tpu.dot_dimension_numbers<[1], [0], [0], [1], [0, 0, 1, 1], [], []>} : vector<16x20xbf16>, vector<20x40xbf16>, vector<16x40xf32> -> vector<16x40xf32>
    %399 = arith.addf %394, %398 : vector<16x40xf32>
    %c832 = arith.constant 832 : index
    %c0_144 = arith.constant 0 : index
    %400 = vector.load %arg2[%c832, %c0_144] : memref<944x128xf32, #tpu.memory_space<vmem>>, vector<16x1xf32>
    %401 = vector.broadcast %400 : vector<16x1xf32> to vector<16x40xf32>
    %402 = arith.addf %399, %401 : vector<16x40xf32>
    %403 = tpu.concatenate %402, %99 in 0 : vector<16x40xf32>, vector<16x40xf32> -> vector<32x40xf32>
    %c2064 = arith.constant 2064 : index
    %c0_145 = arith.constant 0 : index
    %404 = vector.load %arg1[%c2064, %c0_145] : memref<3024x128xbf16, #tpu.memory_space<vmem>>, vector<48x32xbf16>
    %405 = arith.truncf %403 : vector<32x40xf32> to vector<32x40xbf16>
    %cst_146 = arith.constant dense<0.000000e+00> : vector<48x40xf32>
    %406 = tpu.matmul %404, %405, %cst_146 {dimension_numbers = #tpu.dot_dimension_numbers<[1], [0], [0], [1], [0, 0, 1, 1], [], []>} : vector<48x32xbf16>, vector<32x40xbf16>, vector<48x40xf32> -> vector<48x40xf32>
    %407 = vector.extract_strided_slice %406 {offsets = [0, 0], sizes = [16, 40], strides = [1, 1]} : vector<48x40xf32> to vector<16x40xf32>
    %408 = vector.extract_strided_slice %406 {offsets = [16, 0], sizes = [16, 40], strides = [1, 1]} : vector<48x40xf32> to vector<16x40xf32>
    %409 = vector.extract_strided_slice %406 {offsets = [32, 0], sizes = [16, 40], strides = [1, 1]} : vector<48x40xf32> to vector<16x40xf32>
    %cst_147 = arith.constant 0.000000e+00 : f32
    %410 = vector.broadcast %cst_147 : f32 to vector<16x1xf32>
    %411 = vector.extract_strided_slice %407 {offsets = [0, 0], sizes = [16, 39], strides = [1, 1]} : vector<16x40xf32> to vector<16x39xf32>
    %412 = tpu.concatenate %410, %411 in 1 : vector<16x1xf32>, vector<16x39xf32> -> vector<16x40xf32>
    %c880_148 = arith.constant 880 : index
    %c0_149 = arith.constant 0 : index
    %413 = vector.load %arg2[%c880_148, %c0_149] : memref<944x128xf32, #tpu.memory_space<vmem>>, vector<1x40xf32>
    %414 = vector.broadcast %413 : vector<1x40xf32> to vector<16x40xf32>
    %415 = arith.mulf %412, %414 : vector<16x40xf32>
    %416 = vector.extract_strided_slice %409 {offsets = [0, 1], sizes = [16, 39], strides = [1, 1]} : vector<16x40xf32> to vector<16x39xf32>
    %417 = tpu.concatenate %416, %410 in 1 : vector<16x39xf32>, vector<16x1xf32> -> vector<16x40xf32>
    %c888_150 = arith.constant 888 : index
    %c0_151 = arith.constant 0 : index
    %418 = vector.load %arg2[%c888_150, %c0_151] : memref<944x128xf32, #tpu.memory_space<vmem>>, vector<1x40xf32>
    %419 = vector.broadcast %418 : vector<1x40xf32> to vector<16x40xf32>
    %420 = arith.mulf %417, %419 : vector<16x40xf32>
    %421 = arith.addf %408, %415 : vector<16x40xf32>
    %422 = arith.addf %421, %420 : vector<16x40xf32>
    %c688 = arith.constant 688 : index
    %c0_152 = arith.constant 0 : index
    %423 = vector.load %arg2[%c688, %c0_152] : memref<944x128xf32, #tpu.memory_space<vmem>>, vector<16x1xf32>
    %424 = vector.broadcast %423 : vector<16x1xf32> to vector<16x40xf32>
    %425 = arith.addf %422, %424 : vector<16x40xf32>
    %426 = math.tanh %425 : vector<16x40xf32>
    %c2112 = arith.constant 2112 : index
    %c0_153 = arith.constant 0 : index
    %427 = vector.load %arg1[%c2112, %c0_153] : memref<3024x128xbf16, #tpu.memory_space<vmem>>, vector<48x16xbf16>
    %428 = arith.truncf %426 : vector<16x40xf32> to vector<16x40xbf16>
    %cst_154 = arith.constant dense<0.000000e+00> : vector<48x40xf32>
    %429 = tpu.matmul %427, %428, %cst_154 {dimension_numbers = #tpu.dot_dimension_numbers<[1], [0], [0], [1], [0, 0, 1, 1], [], []>} : vector<48x16xbf16>, vector<16x40xbf16>, vector<48x40xf32> -> vector<48x40xf32>
    %430 = vector.extract_strided_slice %429 {offsets = [0, 0], sizes = [16, 40], strides = [1, 1]} : vector<48x40xf32> to vector<16x40xf32>
    %431 = vector.extract_strided_slice %429 {offsets = [16, 0], sizes = [16, 40], strides = [1, 1]} : vector<48x40xf32> to vector<16x40xf32>
    %432 = vector.extract_strided_slice %429 {offsets = [32, 0], sizes = [16, 40], strides = [1, 1]} : vector<48x40xf32> to vector<16x40xf32>
    %cst_155 = arith.constant 0.000000e+00 : f32
    %433 = vector.broadcast %cst_155 : f32 to vector<16x1xf32>
    %434 = vector.extract_strided_slice %430 {offsets = [0, 0], sizes = [16, 39], strides = [1, 1]} : vector<16x40xf32> to vector<16x39xf32>
    %435 = tpu.concatenate %433, %434 in 1 : vector<16x1xf32>, vector<16x39xf32> -> vector<16x40xf32>
    %c880_156 = arith.constant 880 : index
    %c0_157 = arith.constant 0 : index
    %436 = vector.load %arg2[%c880_156, %c0_157] : memref<944x128xf32, #tpu.memory_space<vmem>>, vector<1x40xf32>
    %437 = vector.broadcast %436 : vector<1x40xf32> to vector<16x40xf32>
    %438 = arith.mulf %435, %437 : vector<16x40xf32>
    %439 = vector.extract_strided_slice %432 {offsets = [0, 1], sizes = [16, 39], strides = [1, 1]} : vector<16x40xf32> to vector<16x39xf32>
    %440 = tpu.concatenate %439, %433 in 1 : vector<16x39xf32>, vector<16x1xf32> -> vector<16x40xf32>
    %c888_158 = arith.constant 888 : index
    %c0_159 = arith.constant 0 : index
    %441 = vector.load %arg2[%c888_158, %c0_159] : memref<944x128xf32, #tpu.memory_space<vmem>>, vector<1x40xf32>
    %442 = vector.broadcast %441 : vector<1x40xf32> to vector<16x40xf32>
    %443 = arith.mulf %440, %442 : vector<16x40xf32>
    %444 = arith.addf %431, %438 : vector<16x40xf32>
    %445 = arith.addf %444, %443 : vector<16x40xf32>
    %c704 = arith.constant 704 : index
    %c0_160 = arith.constant 0 : index
    %446 = vector.load %arg2[%c704, %c0_160] : memref<944x128xf32, #tpu.memory_space<vmem>>, vector<16x1xf32>
    %447 = vector.broadcast %446 : vector<16x1xf32> to vector<16x40xf32>
    %448 = arith.addf %445, %447 : vector<16x40xf32>
    %449 = math.tanh %448 : vector<16x40xf32>
    %c2496 = arith.constant 2496 : index
    %c0_161 = arith.constant 0 : index
    %450 = vector.load %arg1[%c2496, %c0_161] : memref<3024x128xbf16, #tpu.memory_space<vmem>>, vector<16x16xbf16>
    %451 = arith.truncf %449 : vector<16x40xf32> to vector<16x40xbf16>
    %cst_162 = arith.constant dense<0.000000e+00> : vector<16x40xf32>
    %452 = tpu.matmul %450, %451, %cst_162 {dimension_numbers = #tpu.dot_dimension_numbers<[1], [0], [0], [1], [0, 0, 1, 1], [], []>} : vector<16x16xbf16>, vector<16x40xbf16>, vector<16x40xf32> -> vector<16x40xf32>
    %453 = vector.extract_strided_slice %452 {offsets = [0, 0], sizes = [8, 40], strides = [1, 1]} : vector<16x40xf32> to vector<8x40xf32>
    %c2944 = arith.constant 2944 : index
    %c0_163 = arith.constant 0 : index
    %454 = vector.load %arg1[%c2944, %c0_163] : memref<3024x128xbf16, #tpu.memory_space<vmem>>, vector<40x80xbf16>
    %455 = arith.truncf %453 : vector<8x40xf32> to vector<8x40xbf16>
    %cst_164 = arith.constant dense<0.000000e+00> : vector<8x80xf32>
    %456 = tpu.matmul %455, %454, %cst_164 {dimension_numbers = #tpu.dot_dimension_numbers<[1], [0], [0], [1], [0, 0, 1, 1], [], []>} : vector<8x40xbf16>, vector<40x80xbf16>, vector<8x80xf32> -> vector<8x80xf32>
    %457 = vector.extract_strided_slice %452 {offsets = [8, 0], sizes = [8, 40], strides = [1, 1]} : vector<16x40xf32> to vector<8x40xf32>
    %c2984 = arith.constant 2984 : index
    %c0_165 = arith.constant 0 : index
    %458 = vector.load %arg1[%c2984, %c0_165] : memref<3024x128xbf16, #tpu.memory_space<vmem>>, vector<40x80xbf16>
    %459 = arith.truncf %457 : vector<8x40xf32> to vector<8x40xbf16>
    %cst_166 = arith.constant dense<0.000000e+00> : vector<8x80xf32>
    %460 = tpu.matmul %459, %458, %cst_166 {dimension_numbers = #tpu.dot_dimension_numbers<[1], [0], [0], [1], [0, 0, 1, 1], [], []>} : vector<8x40xbf16>, vector<40x80xbf16>, vector<8x80xf32> -> vector<8x80xf32>
    %461 = arith.addf %456, %460 : vector<8x80xf32>
    %c848 = arith.constant 848 : index
    %c0_167 = arith.constant 0 : index
    %462 = vector.load %arg2[%c848, %c0_167] : memref<944x128xf32, #tpu.memory_space<vmem>>, vector<8x1xf32>
    %463 = vector.broadcast %462 : vector<8x1xf32> to vector<8x80xf32>
    %464 = arith.addf %461, %463 : vector<8x80xf32>
    %465 = tpu.concatenate %464, %46 in 0 : vector<8x80xf32>, vector<8x80xf32> -> vector<16x80xf32>
    %c2160 = arith.constant 2160 : index
    %c0_168 = arith.constant 0 : index
    %466 = vector.load %arg1[%c2160, %c0_168] : memref<3024x128xbf16, #tpu.memory_space<vmem>>, vector<24x16xbf16>
    %467 = arith.truncf %465 : vector<16x80xf32> to vector<16x80xbf16>
    %cst_169 = arith.constant dense<0.000000e+00> : vector<24x80xf32>
    %468 = tpu.matmul %466, %467, %cst_169 {dimension_numbers = #tpu.dot_dimension_numbers<[1], [0], [0], [1], [0, 0, 1, 1], [], []>} : vector<24x16xbf16>, vector<16x80xbf16>, vector<24x80xf32> -> vector<24x80xf32>
    %469 = vector.extract_strided_slice %468 {offsets = [0, 0], sizes = [8, 80], strides = [1, 1]} : vector<24x80xf32> to vector<8x80xf32>
    %470 = vector.extract_strided_slice %468 {offsets = [8, 0], sizes = [8, 80], strides = [1, 1]} : vector<24x80xf32> to vector<8x80xf32>
    %471 = vector.extract_strided_slice %468 {offsets = [16, 0], sizes = [8, 80], strides = [1, 1]} : vector<24x80xf32> to vector<8x80xf32>
    %cst_170 = arith.constant 0.000000e+00 : f32
    %472 = vector.broadcast %cst_170 : f32 to vector<8x1xf32>
    %473 = vector.extract_strided_slice %469 {offsets = [0, 0], sizes = [8, 79], strides = [1, 1]} : vector<8x80xf32> to vector<8x79xf32>
    %474 = tpu.concatenate %472, %473 in 1 : vector<8x1xf32>, vector<8x79xf32> -> vector<8x80xf32>
    %c864_171 = arith.constant 864 : index
    %c0_172 = arith.constant 0 : index
    %475 = vector.load %arg2[%c864_171, %c0_172] : memref<944x128xf32, #tpu.memory_space<vmem>>, vector<1x80xf32>
    %476 = vector.broadcast %475 : vector<1x80xf32> to vector<8x80xf32>
    %477 = arith.mulf %474, %476 : vector<8x80xf32>
    %478 = vector.extract_strided_slice %471 {offsets = [0, 1], sizes = [8, 79], strides = [1, 1]} : vector<8x80xf32> to vector<8x79xf32>
    %479 = tpu.concatenate %478, %472 in 1 : vector<8x79xf32>, vector<8x1xf32> -> vector<8x80xf32>
    %c872_173 = arith.constant 872 : index
    %c0_174 = arith.constant 0 : index
    %480 = vector.load %arg2[%c872_173, %c0_174] : memref<944x128xf32, #tpu.memory_space<vmem>>, vector<1x80xf32>
    %481 = vector.broadcast %480 : vector<1x80xf32> to vector<8x80xf32>
    %482 = arith.mulf %479, %481 : vector<8x80xf32>
    %483 = arith.addf %470, %477 : vector<8x80xf32>
    %484 = arith.addf %483, %482 : vector<8x80xf32>
    %c720_175 = arith.constant 720 : index
    %c0_176 = arith.constant 0 : index
    %485 = vector.load %arg2[%c720_175, %c0_176] : memref<944x128xf32, #tpu.memory_space<vmem>>, vector<8x1xf32>
    %486 = vector.broadcast %485 : vector<8x1xf32> to vector<8x80xf32>
    %487 = arith.addf %484, %486 : vector<8x80xf32>
    %488 = math.tanh %487 : vector<8x80xf32>
    %c2184 = arith.constant 2184 : index
    %c0_177 = arith.constant 0 : index
    %489 = vector.load %arg1[%c2184, %c0_177] : memref<3024x128xbf16, #tpu.memory_space<vmem>>, vector<24x8xbf16>
    %490 = arith.truncf %488 : vector<8x80xf32> to vector<8x80xbf16>
    %cst_178 = arith.constant dense<0.000000e+00> : vector<24x80xf32>
    %491 = tpu.matmul %489, %490, %cst_178 {dimension_numbers = #tpu.dot_dimension_numbers<[1], [0], [0], [1], [0, 0, 1, 1], [], []>} : vector<24x8xbf16>, vector<8x80xbf16>, vector<24x80xf32> -> vector<24x80xf32>
    %492 = vector.extract_strided_slice %491 {offsets = [0, 0], sizes = [8, 80], strides = [1, 1]} : vector<24x80xf32> to vector<8x80xf32>
    %493 = vector.extract_strided_slice %491 {offsets = [8, 0], sizes = [8, 80], strides = [1, 1]} : vector<24x80xf32> to vector<8x80xf32>
    %494 = vector.extract_strided_slice %491 {offsets = [16, 0], sizes = [8, 80], strides = [1, 1]} : vector<24x80xf32> to vector<8x80xf32>
    %cst_179 = arith.constant 0.000000e+00 : f32
    %495 = vector.broadcast %cst_179 : f32 to vector<8x1xf32>
    %496 = vector.extract_strided_slice %492 {offsets = [0, 0], sizes = [8, 79], strides = [1, 1]} : vector<8x80xf32> to vector<8x79xf32>
    %497 = tpu.concatenate %495, %496 in 1 : vector<8x1xf32>, vector<8x79xf32> -> vector<8x80xf32>
    %c864_180 = arith.constant 864 : index
    %c0_181 = arith.constant 0 : index
    %498 = vector.load %arg2[%c864_180, %c0_181] : memref<944x128xf32, #tpu.memory_space<vmem>>, vector<1x80xf32>
    %499 = vector.broadcast %498 : vector<1x80xf32> to vector<8x80xf32>
    %500 = arith.mulf %497, %499 : vector<8x80xf32>
    %501 = vector.extract_strided_slice %494 {offsets = [0, 1], sizes = [8, 79], strides = [1, 1]} : vector<8x80xf32> to vector<8x79xf32>
    %502 = tpu.concatenate %501, %495 in 1 : vector<8x79xf32>, vector<8x1xf32> -> vector<8x80xf32>
    %c872_182 = arith.constant 872 : index
    %c0_183 = arith.constant 0 : index
    %503 = vector.load %arg2[%c872_182, %c0_183] : memref<944x128xf32, #tpu.memory_space<vmem>>, vector<1x80xf32>
    %504 = vector.broadcast %503 : vector<1x80xf32> to vector<8x80xf32>
    %505 = arith.mulf %502, %504 : vector<8x80xf32>
    %506 = arith.addf %493, %500 : vector<8x80xf32>
    %507 = arith.addf %506, %505 : vector<8x80xf32>
    %c728 = arith.constant 728 : index
    %c0_184 = arith.constant 0 : index
    %508 = vector.load %arg2[%c728, %c0_184] : memref<944x128xf32, #tpu.memory_space<vmem>>, vector<8x1xf32>
    %509 = vector.broadcast %508 : vector<8x1xf32> to vector<8x80xf32>
    %510 = arith.addf %507, %509 : vector<8x80xf32>
    %511 = math.tanh %510 : vector<8x80xf32>
    %c2512 = arith.constant 2512 : index
    %c0_185 = arith.constant 0 : index
    %512 = vector.load %arg1[%c2512, %c0_185] : memref<3024x128xbf16, #tpu.memory_space<vmem>>, vector<3x8xbf16>
    %513 = arith.truncf %511 : vector<8x80xf32> to vector<8x80xbf16>
    %cst_186 = arith.constant dense<0.000000e+00> : vector<3x80xf32>
    %514 = tpu.matmul %512, %513, %cst_186 {dimension_numbers = #tpu.dot_dimension_numbers<[1], [0], [0], [1], [0, 0, 1, 1], [], []>} : vector<3x8xbf16>, vector<8x80xbf16>, vector<3x80xf32> -> vector<3x80xf32>
    %c856 = arith.constant 856 : index
    %c0_187 = arith.constant 0 : index
    %515 = vector.load %arg2[%c856, %c0_187] : memref<944x128xf32, #tpu.memory_space<vmem>>, vector<3x1xf32>
    %516 = vector.broadcast %515 : vector<3x1xf32> to vector<3x80xf32>
    %517 = arith.addf %514, %516 : vector<3x80xf32>
    %c0_188 = arith.constant 0 : index
    %c0_189 = arith.constant 0 : index
    %518 = vector.load %arg3[%c0_188, %c0_189] : memref<3x80xf32, #tpu.memory_space<vmem>>, vector<3x80xf32>
    tpu.vector_store %arg3[%c0_188, %c0_189], %517 {strides = array<i32>} : memref<3x80xf32, #tpu.memory_space<vmem>>, vector<3x80xf32>,
    return
  }
}

</mosaic_0001>

<bundles_post_ra>
// kernel: forward.1
= control target key start
LH: loop header
LB: loop body
LE: loop exit
PB: predicated region body
PF: predicated region fallthrough
CT: control target
= control target key end

     0   :  { %8 = vsyncpa [#allocation3], 0  ;;  %s10115_s0 = inlined_call_operand.vmem [shape: f32[4,80], index: 0, kind: input, shape index: {}]   ;;  %s10116_s1 = inlined_call_operand.hbm [shape: bf16[3024,128], index: 1, kind: input, shape index: {}]   ;;  %s10117_s2 = inlined_call_operand.hbm [shape: f32[944,128], index: 2, kind: input, shape index: {}]   ;;  %s10118_s3 = inlined_call_operand.vmem [shape: f32[3,80], index: 3, kind: output, shape index: {}]  }
   0x1   :  { %9 = vsyncpa [#allocation5], 0  ;;  %s8853_s12 = smov [#allocation2]  }
   0x2   :  { %s17_s13 = sshll.u32 %s8853_s12, 4  ;;  %s18_s13 = int_to_ptr.vmem [resolvable:$true] %s17_s13 }
   0x3   :  { %s8817_s14 = scalar_lea.vmem %s18_s13, 24192  ;;  %p8822_p1 = scmp.lt.s32.totalorder %s18_s13, %s18_s13 }
   0x4   :  { %p8818_p0 = scmp.ne.s32.totalorder %s18_s13, %s8817_s14  ;;  %p8823_p2 = scmp.lt.s32.totalorder %s8817_s14, %s8817_s14 }
   0x6   :  { %p8824_p3 = por %p8823_p2, %p8822_p1 }
   0x8   :  { %p8825_p4 = pnand %p8824_p3, %p8818_p0 }
   0xa   :  { %8828 = shalt.err (!%p8825_p4)
}
   0xb   :  { %s8854_s15 = smov 64   ;;  %s8855_s16 = smov 4  }
   0xc   :  { %23 = dma.hbm_to_vmem [thread:$0]  %s10116_s1, 24192, %s18_s13, [#allocation3], %s8854_s15, %s8854_s15, %s8855_s16  }
   0xd   :  { %s8856_s19 = smov [#allocation4]  }
   0xe   :  { %s29_s20 = sshll.u32 %s8856_s19, 4  ;;  %s30_s20 = int_to_ptr.vmem [resolvable:$true] %s29_s20 }
   0xf   :  { %s8837_s21 = scalar_lea.vmem %s30_s20, 15104  ;;  %p8842_p6 = scmp.lt.s32.totalorder %s30_s20, %s30_s20 }
  0x10   :  { %p8838_p5 = scmp.ne.s32.totalorder %s30_s20, %s8837_s21  ;;  %p8843_p7 = scmp.lt.s32.totalorder %s8837_s21, %s8837_s21 }
  0x12   :  { %p8844_p8 = por %p8843_p7, %p8842_p6 }
  0x14   :  { %p8845_p9 = pnand %p8844_p8, %p8838_p5 }
  0x16   :  { %8848 = shalt.err (!%p8845_p9)
}
  0x17   :  { %s8857_s22 = smov 128   ;;  %s8858_s23 = smov 8  }
  0x18   :  { %35 = dma.hbm_to_vmem [thread:$0]  %s10117_s2, 15104, %s30_s20, [#allocation5], %s8857_s22, %s8857_s22, %s8858_s23  }
  0x19   :  { %8849 = dma.done.wait [#allocation3], 24192  }
  0x1a   :  { %8850 = vsyncadd [#allocation3], 4294943104 }
  0x1b   :  { %8851 = dma.done.wait [#allocation5], 15104  }
  0x1c   :  { %8852 = vsyncadd [#allocation5], 4294952192  ;;  %vm63_vm0 = vcmask 1041408   ;;  %vm56_vm1 = vcmask 31744   ;;  %v43_v0 = vld [vmem:[%s10115_s0] sm:$0xf] }
  0x1d   :  { %v47_v1 = vpack.c.bf16 %v43_v0, %v43_v0  ;;  %v8422_v2 = vld [vmem:[#allocation2] sm:$0xff]   ;;  %v8423_v3 = vld [vmem:[#allocation2 + $0x8] ss:$0 sps:$4 sm:$0xff]   ;;  %v8859_v5 = vmov 0   ;;  %s8860_s0 = smov 1   ;;  %s8861_s2 = smov 127  }
  0x1e   :  { %7761 = vmatprep.mubr.msk.bf16.mxu0 %vm56_vm1, %v8422_v2  ;;  %8420 = vset.pattern.permute.xlu1 %v8859_v5  ;;  %v141_v6 = vld [vmem:[#allocation4] sm:$0xff]  ;;  %vm10120_vm2 = vcmask 64512   ;;  %vm119_vm3 = vcmask 7168   ;;  %vm10119_vm4 = vcmask 646144   ;;  %v8904_v15 = vld [vmem:[#allocation4 + $0x368] ss:$0 sm:$0xff] }
  0x1f   :  { %8397 = vmatprep.subr.msk.bf16.mxu0 %vm63_vm0, %v47_v1  ;;  %v65_v4 = vsel %vm63_vm0, %v47_v1, 0  ;;  %8421 = vset.pattern.permute.xlu0 %v8859_v5  ;;  %v8424_v10 = vld [vmem:[#allocation2 + $0xc] sm:$0xff]   ;;  %v8900_v11 = vld [vmem:[#allocation4 + $0x360] ss:$0 sm:$0xff]  ;;  %vm168_vm5 = vcmask 1043456   ;;  %v8427_v29 = vld [vmem:[#allocation2 + $0x534] sm:$0xff]  }
  0x20   :  { %7760 = vmatpush3.bf16.msra.mxu0 %v65_v4  ;;  %144 = vperm.xlu1 %8420, %v141_v6   ;;  %v8425_v27 = vld [vmem:[#allocation2 + $0x14] ss:$0 sps:$4 sm:$0xff]   ;;  %v8426_v28 = vld [vmem:[#allocation2 + $0x50c] sm:$0xff]   ;;  %v10121_v30 = vmov 0.0   ;;  %v8428_v35 = vld [vmem:[#allocation2 + $0x504] sm:$0xff]   ;;  %vm8863_vm6 = vmmov 0  }
  0x21   :  { %7767 = vmatprep.mubr.msk.bf16.mxu1 %vm10120_vm2, %v8424_v10  ;;  %7771 = vmatprep.subr.bf16.mxu0 %v10121_v30  ;;  %v234_v34 = vld [vmem:[#allocation4 + $0x8] sm:$0xff]  ;;  %v8430_v37 = vld [vmem:[#allocation2 + $0x4fc] sm:$0xff]   ;;  %v8431_v38 = vld [vmem:[#allocation2 + $0x524] sm:$0xff]   ;;  %vm283_vm7 = vcmask 654336   ;;  %vm524_vm8 = vcmask 318464   ;;  %vm576_vm9 = vcmask 130048  }
  0x22   :  { %v8429_v36 = vld [vmem:[#allocation2 + $0x52c] sm:$0xff]   ;;  %v8432_v39 = vld [vmem:[#allocation2 + $0x4f4] sm:$0xff]   ;;  %v8433_v40 = vld [vmem:[#allocation2 + $0x51c] sm:$0xff]   ;;  %vm708_vm10 = vcmask 326656   ;;  %vm1107_vm11 = vcmask 261120   ;;  %vm1009_vm12 = vcmask 154624  }
  0x23   :  { %7762 = vmatmul.mubr.msk.bf16.vlgmr.msra.gmra.mxu0 %vm56_vm1, %v8423_v3  ;;  %v8434_v41 = vld [vmem:[#allocation2 + $0x4ec] sm:$0xff]   ;;  %v8435_v42 = vld [vmem:[#allocation2 + $0x514] sm:$0xff]   ;;  %v8437_v4 = vld [vmem:[#allocation2 + $0x20] sm:$0xff]   ;;  %vm1309_vm13 = vcmask 162816   ;;  %vm1962_vm14 = vcmask 523264   ;;  %vm1772_vm15 = vcmask 72704  }
  0x24   :  { %7772 = vmatpush3.bf16.msra.mxu0 %v8426_v28  ;;  %7781 = vmatprep.mubr.msk.bf16.mxu0 %vm8863_vm6, %v10121_v30  ;;  %v8436_v1 = vld [vmem:[#allocation2 + $0x18] sm:$0xff]   ;;  %v8438_v5 = vld [vmem:[#allocation2 + $0x28] sm:$0xff]  }
  0x25   :  { %7773 = vmatprep.subr.bf16.mxu0 %v10121_v30 }
  0x28   :  { %7774 = vmatpush3.bf16.msra.mxu0 %v8428_v35 }
  0x29   :  { %7775 = vmatprep.subr.bf16.mxu0 %v10121_v30 }
  0x2c   :  { %7776 = vmatpush3.bf16.msra.mxu0 %v8430_v37 }
  0x2d   :  { %7777 = vmatprep.subr.bf16.mxu0 %v10121_v30 }
  0x30   :  { %7778 = vmatpush3.bf16.msra.mxu0 %v8432_v39 }
  0x31   :  { %7779 = vmatprep.subr.bf16.mxu0 %v10121_v30 }
  0x34   :  { %7780 = vmatpush3.bf16.msra.mxu0 %v8434_v41 }
  0x35   :  { %7799 = vmatprep.subr.bf16.mxu0 %v10121_v30 }
  0x9b   :  { %v145_v21 = vpop.permute.xlu1 %144 }
  0xe3   :  { %v7763_v7 = vpop.f32.mrf.mxu0 }
  0xe5   :  { %v101_v8 = vpop.f32.mrf.mxu0 }
  0xe6   :  { %116 = vrot.lane.b32.xlu0 %v101_v8, %s8860_s0 }
  0xe7   :  { %v7764_v9 = vpop.f32.mrf.mxu0 }
  0xe9   :  { %v104_v17 = vpop.f32.mrf.mxu0 }
  0xea   :  { %128 = vrot.lane.b32.xlu0 %v7763_v7, %s8861_s2 }
 0x158   :  { %v117_v12 = vpop.permute.xlu0 %116 }
 0x159   :  { %v120_v13 = vsel %vm119_vm3, 0.0, %v117_v12 }
 0x15a   :  { %v126_v14 = vmul.f32 %v8900_v11, %v120_v13 }
 0x15c   :  { %v129_v16 = vpop.permute.xlu0 %128  ;;  %v139_v19 = vadd.f32 %v126_v14, %v104_v17 }
 0x15d   :  { %v132_v18 = vsel %vm10119_vm4, %v129_v16, 0.0  ;;  %v538_v16 = vld [vmem:[#allocation4 + $0x10] sm:$0xff] }
 0x15e   :  { %v138_v20 = vmul.f32 %v8904_v15, %v132_v18 }
 0x160   :  { %v140_v22 = vadd.f32 %v139_v19, %v138_v20  ;;  %v539_v19 = vld [vmem:[#allocation4 + $0x18] sm:$0xff] }
 0x162   :  { %v147_v23 = vadd.f32 %v145_v21, %v140_v22 }
 0x164   :  { %8615 = vtanh.f32 %v147_v23  ;;  %v8956_v23 = vld [vmem:[#allocation4 + $0x370] ss:$0 sm:$0xff] }
 0x171   :  { %v8616_v24 = vpop.eup %8615 }
 0x172   :  { %v152_v25 = vpack.c.bf16 %v8616_v24, %v8616_v24 }
 0x174   :  { %8398 = vmatprep.subr.msk.bf16.mxu1 %vm168_vm5, %v152_v25  ;;  %v170_v26 = vsel %vm168_vm5, %v152_v25, 0  ;;  %v8959_v25 = vld [vmem:[#allocation4 + $0x378] ss:$0 sm:$0xff] }
 0x175   :  { %7766 = vmatpush3.bf16.msra.mxu1 %v170_v26 }
 0x176   :  { %7785 = vmatprep.subr.bf16.mxu1 %v10121_v30 }
 0x178   :  { %7768 = vmatmul.mubr.msk.bf16.vlgmr.msra.gmra.mxu1 %vm10120_vm2, %v8425_v27 }
 0x179   :  { %7786 = vmatpush3.bf16.msra.mxu1 %v8427_v29  ;;  %7795 = vmatprep.mubr.msk.bf16.mxu1 %vm8863_vm6, %v10121_v30 }
 0x17a   :  { %7787 = vmatprep.subr.bf16.mxu1 %v10121_v30 }
 0x17d   :  { %7788 = vmatpush3.bf16.msra.mxu1 %v8429_v36 }
 0x17e   :  { %7789 = vmatprep.subr.bf16.mxu1 %v10121_v30 }
 0x181   :  { %7790 = vmatpush3.bf16.msra.mxu1 %v8431_v38 }
 0x182   :  { %7791 = vmatprep.subr.bf16.mxu1 %v10121_v30 }
 0x185   :  { %7792 = vmatpush3.bf16.msra.mxu1 %v8433_v40 }
 0x186   :  { %7793 = vmatprep.subr.bf16.mxu1 %v10121_v30 }
 0x189   :  { %7794 = vmatpush3.bf16.msra.mxu1 %v8435_v42 }
 0x18a   :  { %7813 = vmatprep.subr.bf16.mxu1 %v10121_v30 }
 0x238   :  { %v7769_v31 = vpop.f32.mrf.mxu1 }
 0x239   :  { %227 = vrot.lane.b32.xlu0 %v7769_v31, %s8861_s2 }
 0x23a   :  { %v206_v32 = vpop.f32.mrf.mxu1 }
 0x23b   :  { %221 = vrot.lane.b32.xlu1 %v206_v32, %s8860_s0 }
 0x23c   :  { %v7770_v33 = vpop.f32.mrf.mxu1 }
 0x23e   :  { %v209_v47 = vpop.f32.mrf.mxu1 }
 0x23f   :  { %237 = vperm.xlu1 %8420, %v234_v34  }
 0x2ab   :  { %v228_v45 = vpop.permute.xlu0 %227 }
 0x2ac   :  { %v230_v48 = vsel %vm10119_vm4, %v228_v45, 0.0  ;;  %vm2315_vm4 = vcmask 80896  }
 0x2ad   :  { %v222_v43 = vpop.permute.xlu1 %221  ;;  %v231_v50 = vmul.f32 %v8904_v15, %v230_v48  ;;  %v8441_v48 = vld [vmem:[#allocation2 + $0x40] sm:$0xff]  }
 0x2ae   :  { %v224_v44 = vsel %vm119_vm3, 0.0, %v222_v43 }
 0x2af   :  { %v225_v46 = vmul.f32 %v8900_v11, %v224_v44 }
 0x2b1   :  { %v232_v49 = vadd.f32 %v225_v46, %v209_v47  ;;  %v8439_v46 = vld [vmem:[#allocation2 + $0x30] sm:$0xff]   ;;  %v8440_v47 = vld [vmem:[#allocation2 + $0x38] sm:$0xff]  }
 0x2b3   :  { %v233_v51 = vadd.f32 %v232_v49, %v231_v50 }
 0x2ba   :  { %v238_v52 = vpop.permute.xlu1 %237 }
 0x2bb   :  { %v240_v53 = vadd.f32 %v238_v52, %v233_v51 }
 0x2bd   :  { %8617 = vtanh.f32 %v240_v53 }
 0x2ca   :  { %v8933_v54 = vpop.eup %8617 }
 0x2cb   :  { %10133 = vst [vmem:[#allocation8_spill] sm:$0xff] %v8933_v54  ;;  %v252_v55 = vpack.c.bf16 %v8933_v54, %v8933_v54 }
 0x2cd   :  { %7782 = vmatmul.mubr.msk.bf16.vlgmr.msra.gmra.mxu0 %vm283_vm7, %v252_v55  ;;  %7796 = vmatmul.mubr.msk.bf16.vlgmr.msra.gmra.mxu1 %vm283_vm7, %v252_v55  ;;  %vm2328_vm7 = vcmask 1044480  }
 0x2ce   :  { %7801 = vmatprep.mubr.msk.bf16.mxu0 %vm8863_vm6, %v10121_v30  ;;  %7815 = vmatprep.mubr.msk.bf16.mxu1 %vm8863_vm6, %v10121_v30 }
 0x38d   :  { %v321_v56 = vpop.f32.mrf.mxu0  ;;  %v401_v57 = vpop.f32.mrf.mxu1 }
 0x38e   :  { %v407_v58 = vmax.f32 %v321_v56, %v401_v57 }
 0x38f   :  { %v7783_v59 = vpop.f32.mrf.mxu0  ;;  %v7797_v60 = vpop.f32.mrf.mxu1 }
 0x390   :  { %v414_v61 = vpack.c.bf16 %v407_v58, %v407_v58  ;;  %v671_v60 = vld [vmem:[#allocation4 + $0x20] sm:$0xff] }
 0x391   :  { %v324_v62 = vpop.f32.mrf.mxu0  ;;  %v404_v63 = vpop.f32.mrf.mxu1 }
 0x392   :  { %v440_v0 = vsel %vm168_vm5, %v414_v61, 0  ;;  %v1033_v63 = vld [vmem:[#allocation4 + $0x40] sm:$0xff] }
 0x393   :  { %v7784_v2 = vpop.f32.mrf.mxu0  ;;  %v7798_v3 = vpop.f32.mrf.mxu1  ;;  %7800 = vmatpush3.bf16.msra.mxu0 %v440_v0  ;;  %v672_v0 = vld [vmem:[#allocation4 + $0x28] sm:$0xff] }
 0x394   :  { %7827 = vmatprep.subr.bf16.mxu0 %v10121_v30  ;;  %v8443_v2 = vld [vmem:[#allocation2 + $0x560] ss:$0 sps:$4 sm:$0xff]   ;;  %v1034_v3 = vld [vmem:[#allocation4 + $0x48] sm:$0xff] }
 0x396   :  { %7802 = vmatmul.mubr.msk.bf16.vlgmr.msra.gmra.mxu0 %vm10120_vm2, %v8436_v1  ;;  %v8442_v1 = vld [vmem:[#allocation2 + $0x54c] ss:$0 sps:$4 sm:$0xff]  }
 0x397   :  { %7805 = vmatprep.mubr.msk.bf16.mxu0 %vm8863_vm6, %v10121_v30 }
 0x39e   :  { %7806 = vmatmul.mubr.msk.bf16.gmra.mxu0 %vm10120_vm2, %v8437_v4  ;;  %v713_v4 = vsel %vm168_vm5, %v8442_v1, 0  ;;  %v1263_v1 = vld [vmem:[#allocation4 + $0x50] sm:$0xff] }
 0x39f   :  { %7809 = vmatprep.mubr.msk.bf16.mxu0 %vm8863_vm6, %v10121_v30  ;;  %7828 = vmatpush3.bf16.msra.mxu0 %v713_v4  ;;  %v8454_v4 = vld [vmem:[#allocation2 + $0x78] sm:$0xff]  }
 0x3a0   :  { %7829 = vmatprep.subr.bf16.mxu0 %v10121_v30 }
 0x3a6   :  { %7810 = vmatmul.mubr.msk.bf16.gmra.mxu0 %vm10120_vm2, %v8438_v5  ;;  %v777_v5 = vsel %vm168_vm5, %v8443_v2, 0  ;;  %v1032_v2 = vld [vmem:[#allocation4 + $0x38] sm:$0xff]  ;;  %vm3114_vm2 = vcmask 23552  }
 0x3a7   :  { %7833 = vmatprep.mubr.msk.bf16.mxu0 %vm8863_vm6, %v10121_v30 }
 0x456   :  { %v476_v6 = vpop.f32.mrf.mxu0 }
 0x457   :  { %501 = vrot.lane.b32.xlu0 %v476_v6, %s8860_s0  ;;  %v8444_v6 = vld [vmem:[#allocation2 + $0x544] sm:$0xff]  }
 0x458   :  { %v7803_v7 = vpop.f32.mrf.mxu0  ;;  %7830 = vmatpush3.bf16.msra.mxu0 %v8444_v6 }
 0x459   :  { %v8445_v7 = vld [vmem:[#allocation2 + $0x558] sm:$0xff]   ;;  %7831 = vmatprep.subr.bf16.mxu0 %v10121_v30 }
 0x45a   :  { %v479_v8 = vpop.f32.mrf.mxu0 }
 0x45b   :  { %503 = vrot.lane.b32.xlu1 %v479_v8, %s8860_s0  ;;  %v8446_v8 = vld [vmem:[#allocation2 + $0x53c] sm:$0xff]  }
 0x45c   :  { %v7804_v9 = vpop.f32.mrf.mxu0  ;;  %7832 = vmatpush3.bf16.msra.mxu0 %v8446_v8 }
 0x45d   :  { %v8447_v9 = vld [vmem:[#allocation2 + $0x550] sm:$0xff]  }
 0x45e   :  { %v484_v10 = vpop.f32.mrf.mxu0 }
 0x460   :  { %v7807_v11 = vpop.f32.mrf.mxu0 }
 0x462   :  { %v487_v12 = vpop.f32.mrf.mxu0 }
 0x464   :  { %v7808_v13 = vpop.f32.mrf.mxu0 }
 0x466   :  { %v492_v14 = vpop.f32.mrf.mxu0 }
 0x467   :  { %518 = vrot.lane.b32.xlu0 %v492_v14, %s8861_s2 }
 0x468   :  { %v7811_v15 = vpop.f32.mrf.mxu0 }
 0x46a   :  { %v495_v17 = vpop.f32.mrf.mxu0 }
 0x46b   :  { %542 = vperm.xlu0 %8421, %v538_v16   ;;  %520 = vrot.lane.b32.xlu1 %v495_v17, %s8861_s2 }
 0x46c   :  { %v7812_v18 = vpop.f32.mrf.mxu0 }
 0x46f   :  { %547 = vperm.xlu1 %8420, %v539_v19  }
 0x4c9   :  { %v502_v20 = vpop.permute.xlu0 %501 }
 0x4ca   :  { %v507_v24 = vsel %vm119_vm3, 0.0, %v502_v20 }
 0x4cb   :  { %v514_v28 = vmul.f32 %v8956_v23, %v507_v24 }
 0x4cd   :  { %v504_v21 = vpop.permute.xlu1 %503  ;;  %v534_v34 = vadd.f32 %v514_v28, %v484_v10 }
 0x4ce   :  { %v508_v29 = vsel %vm119_vm3, 0.0, %v504_v21 }
 0x4cf   :  { %v515_v33 = vmul.f32 %v8956_v23, %v508_v29 }
 0x4d1   :  { %v535_v38 = vadd.f32 %v515_v33, %v487_v12 }
 0x4d9   :  { %v519_v22 = vpop.permute.xlu0 %518 }
 0x4da   :  { %v525_v26 = vsel %vm524_vm8, %v519_v22, 0.0 }
 0x4db   :  { %v532_v31 = vmul.f32 %v8959_v25, %v525_v26 }
 0x4dd   :  { %v521_v27 = vpop.permute.xlu1 %520  ;;  %v536_v36 = vadd.f32 %v534_v34, %v532_v31 }
 0x4de   :  { %v526_v32 = vsel %vm524_vm8, %v521_v27, 0.0 }
 0x4df   :  { %v533_v35 = vmul.f32 %v8959_v25, %v526_v32 }
 0x4e1   :  { %v537_v40 = vadd.f32 %v535_v38, %v533_v35 }
 0x4e6   :  { %v543_v37 = vpop.permute.xlu0 %542 }
 0x4e7   :  { %v550_v39 = vadd.f32 %v543_v37, %v536_v36 }
 0x4e9   :  { %8619 = vtanh.f32 %v550_v39 }
 0x4ea   :  { %v548_v41 = vpop.permute.xlu1 %547 }
 0x4eb   :  { %v551_v42 = vadd.f32 %v548_v41, %v537_v40 }
 0x4ed   :  { %8621 = vtanh.f32 %v551_v42 }
 0x4f6   :  { %v8620_v43 = vpop.eup %8619 }
 0x4fa   :  { %v8622_v44 = vpop.eup %8621 }
 0x4fb   :  { %v560_v45 = vpack.c.bf16 %v8622_v44, %v8620_v43 }
 0x4fd   :  { %7814 = vmatpush3.bf16.msra.mxu1 %v560_v45 }
 0x4fe   :  { %7837 = vmatprep.subr.bf16.mxu1 %v10121_v30 }
 0x500   :  { %7816 = vmatmul.mubr.msk.bf16.vlgmr.msra.gmra.mxu1 %vm576_vm9, %v8439_v46  ;;  %v8449_v46 = vld [vmem:[#allocation2 + $0x50] sm:$0xff]  }
 0x501   :  { %7819 = vmatprep.mubr.msk.bf16.mxu1 %vm8863_vm6, %v10121_v30  ;;  %7838 = vmatpush3.bf16.msra.mxu1 %v777_v5 }
 0x502   :  { %7839 = vmatprep.subr.bf16.mxu1 %v10121_v30 }
 0x505   :  { %7840 = vmatpush3.bf16.msra.mxu1 %v8445_v7 }
 0x506   :  { %7841 = vmatprep.subr.bf16.mxu1 %v10121_v30 }
 0x508   :  { %7820 = vmatmul.mubr.msk.bf16.gmra.mxu1 %vm576_vm9, %v8440_v47  ;;  %v8450_v47 = vld [vmem:[#allocation2 + $0x58] sm:$0xff]  }
 0x509   :  { %7823 = vmatprep.mubr.msk.bf16.mxu1 %vm8863_vm6, %v10121_v30  ;;  %7842 = vmatpush3.bf16.msra.mxu1 %v8447_v9  ;;  %v9017_v9 = vld [vmem:[#allocation4 + $0x380] ss:$0 sm:$0xff] }
 0x510   :  { %7824 = vmatmul.mubr.msk.bf16.gmra.mxu1 %vm576_vm9, %v8441_v48  ;;  %v8451_v48 = vld [vmem:[#allocation2 + $0x60] sm:$0xff]  }
 0x511   :  { %7843 = vmatprep.mubr.msk.bf16.mxu1 %vm8863_vm6, %v10121_v30 }
 0x5c0   :  { %v620_v49 = vpop.f32.mrf.mxu1 }
 0x5c1   :  { %645 = vrot.lane.b32.xlu1 %v620_v49, %s8860_s0  ;;  %v8452_v49 = vld [vmem:[#allocation2 + $0x68] sm:$0xff]  }
 0x5c2   :  { %v7817_v50 = vpop.f32.mrf.mxu1 }
 0x5c3   :  { %v8453_v50 = vld [vmem:[#allocation2 + $0x70] sm:$0xff]  }
 0x5c4   :  { %v623_v51 = vpop.f32.mrf.mxu1 }
 0x5c5   :  { %647 = vrot.lane.b32.xlu0 %v623_v51, %s8860_s0 }
 0x5c6   :  { %v7818_v52 = vpop.f32.mrf.mxu1 }
 0x5c8   :  { %v628_v53 = vpop.f32.mrf.mxu1 }
 0x5ca   :  { %v7821_v55 = vpop.f32.mrf.mxu1 }
 0x5cc   :  { %v631_v56 = vpop.f32.mrf.mxu1 }
 0x5ce   :  { %v7822_v57 = vpop.f32.mrf.mxu1 }
 0x5d0   :  { %v636_v58 = vpop.f32.mrf.mxu1 }
 0x5d1   :  { %657 = vrot.lane.b32.xlu1 %v636_v58, %s8861_s2 }
 0x5d2   :  { %v7825_v59 = vpop.f32.mrf.mxu1 }
 0x5d4   :  { %v639_v61 = vpop.f32.mrf.mxu1 }
 0x5d5   :  { %675 = vperm.xlu1 %8420, %v671_v60   ;;  %659 = vrot.lane.b32.xlu0 %v639_v61, %s8861_s2 }
 0x5d6   :  { %v7826_v62 = vpop.f32.mrf.mxu1 }
 0x5d9   :  { %1047 = vperm.xlu1 %8420, %v1033_v63   ;;  %680 = vperm.xlu0 %8421, %v672_v0   ;;  %v1031_v63 = vld [vmem:[#allocation4 + $0x30] sm:$0xff] }
 0x5dd   :  { %1052 = vperm.xlu0 %8421, %v1034_v3   ;;  %v1264_v3 = vld [vmem:[#allocation4 + $0x58] sm:$0xff] }
 0x633   :  { %v646_v10 = vpop.permute.xlu1 %645 }
 0x634   :  { %v651_v13 = vsel %vm119_vm3, 0.0, %v646_v10 }
 0x635   :  { %v653_v16 = vmul.f32 %v8956_v23, %v651_v13 }
 0x637   :  { %v648_v11 = vpop.permute.xlu0 %647  ;;  %v667_v21 = vadd.f32 %v653_v16, %v628_v53 }
 0x638   :  { %v652_v17 = vsel %vm119_vm3, 0.0, %v648_v11 }
 0x639   :  { %v654_v20 = vmul.f32 %v8956_v23, %v652_v17  ;;  %v8448_v23 = vld [vmem:[#allocation2 + $0x48] sm:$0xff]  }
 0x63b   :  { %v668_v27 = vadd.f32 %v654_v20, %v631_v56 }
 0x643   :  { %v658_v12 = vpop.permute.xlu1 %657 }
 0x644   :  { %v663_v14 = vsel %vm524_vm8, %v658_v12, 0.0 }
 0x645   :  { %v665_v18 = vmul.f32 %v8959_v25, %v663_v14  ;;  %v9022_v14 = vld [vmem:[#allocation4 + $0x388] ss:$0 sm:$0xff] }
 0x647   :  { %v660_v15 = vpop.permute.xlu0 %659  ;;  %v669_v24 = vadd.f32 %v667_v21, %v665_v18 }
 0x648   :  { %v664_v19 = vsel %vm524_vm8, %v660_v15, 0.0 }
 0x649   :  { %v666_v22 = vmul.f32 %v8959_v25, %v664_v19 }
 0x64b   :  { %v670_v29 = vadd.f32 %v668_v27, %v666_v22 }
 0x650   :  { %v676_v26 = vpop.permute.xlu1 %675 }
 0x651   :  { %v683_v28 = vadd.f32 %v676_v26, %v669_v24 }
 0x653   :  { %8623 = vtanh.f32 %v683_v28 }
 0x654   :  { %v681_v31 = vpop.permute.xlu0 %680  ;;  %v1048_v5 = vpop.permute.xlu1 %1047 }
 0x655   :  { %v684_v32 = vadd.f32 %v681_v31, %v670_v29 }
 0x657   :  { %8625 = vtanh.f32 %v684_v32 }
 0x658   :  { %v1053_v6 = vpop.permute.xlu0 %1052 }
 0x660   :  { %v8624_v33 = vpop.eup %8623 }
 0x664   :  { %v8626_v34 = vpop.eup %8625 }
 0x665   :  { %v8996_v35 = vpack.c.bf16 %v8626_v34, %v8624_v33 }
 0x667   :  { %10134 = vst [vmem:[#allocation9_spill] sm:$0xff] %v8996_v35  ;;  %7834 = vmatmul.mubr.msk.bf16.vlgmr.msra.gmra.mxu0 %vm708_vm10, %v8996_v35  ;;  %7844 = vmatmul.mubr.msk.bf16.vlgmr.msra.gmra.mxu1 %vm708_vm10, %v8996_v35 }
 0x668   :  { %7849 = vmatprep.mubr.msk.bf16.mxu0 %vm576_vm9, %v8448_v23  ;;  %7865 = vmatprep.mubr.msk.bf16.mxu1 %vm1107_vm11, %v8454_v4 }
 0x727   :  { %v749_v25 = vpop.f32.mrf.mxu0  ;;  %v813_v36 = vpop.f32.mrf.mxu1 }
 0x728   :  { %v820_v41 = vmax.f32 %v749_v25, %v813_v36 }
 0x729   :  { %v7835_v37 = vpop.f32.mrf.mxu0  ;;  %v7845_v38 = vpop.f32.mrf.mxu1 }
 0x72b   :  { %v752_v39 = vpop.f32.mrf.mxu0  ;;  %v816_v40 = vpop.f32.mrf.mxu1 }
 0x72c   :  { %v821_v42 = vmax.f32 %v752_v39, %v816_v40 }
 0x72d   :  { %v7836_v43 = vpop.f32.mrf.mxu0  ;;  %v7846_v44 = vpop.f32.mrf.mxu1 }
 0x72e   :  { %v834_v45 = vpack.c.bf16 %v821_v42, %v820_v41 }
 0x730   :  { %7847 = vmatprep.subr.bf16.mxu0 %v834_v45 }
 0x731   :  { %7848 = vmatpush3.bf16.msra.mxu0 %v834_v45 }
 0x734   :  { %7850 = vmatmul.mubr.msk.bf16.vlgmr.msra.gmra.mxu0 %vm576_vm9, %v8449_v46 }
 0x735   :  { %7853 = vmatprep.mubr.msk.bf16.mxu0 %vm576_vm9, %v8450_v47 }
 0x73c   :  { %7854 = vmatmul.mubr.msk.bf16.gmra.mxu0 %vm576_vm9, %v8451_v48 }
 0x73d   :  { %7857 = vmatprep.mubr.msk.bf16.mxu0 %vm576_vm9, %v8452_v49 }
 0x744   :  { %7858 = vmatmul.mubr.msk.bf16.gmra.mxu0 %vm576_vm9, %v8453_v50 }
 0x7f4   :  { %v7851_v51 = vpop.f32.mrf.mxu0 }
 0x7f5   :  { %972 = vrot.lane.b32.xlu1 %v7851_v51, %s8860_s0 }
 0x7f6   :  { %v917_v52 = vpop.f32.mrf.mxu0 }
 0x7f8   :  { %v7852_v53 = vpop.f32.mrf.mxu0 }
 0x7f9   :  { %968 = vrot.lane.b32.xlu1 %v917_v52, %s8860_s0  ;;  %974 = vrot.lane.b32.xlu0 %v7852_v53, %s8860_s0 }
 0x7fa   :  { %v920_v55 = vpop.f32.mrf.mxu0 }
 0x7fc   :  { %v7855_v56 = vpop.f32.mrf.mxu0 }
 0x7fd   :  { %970 = vrot.lane.b32.xlu0 %v920_v55, %s8860_s0 }
 0x7fe   :  { %v933_v57 = vpop.f32.mrf.mxu0 }
 0x800   :  { %v7856_v58 = vpop.f32.mrf.mxu0 }
 0x802   :  { %v936_v59 = vpop.f32.mrf.mxu0 }
 0x804   :  { %v7859_v60 = vpop.f32.mrf.mxu0 }
 0x805   :  { %1001 = vrot.lane.b32.xlu1 %v7859_v60, %s8861_s2  ;;  %v8459_v60 = vld [vmem:[#allocation2 + $0xa0] sm:$0xff]  }
 0x806   :  { %v949_v61 = vpop.f32.mrf.mxu0 }
 0x808   :  { %v7860_v62 = vpop.f32.mrf.mxu0 }
 0x809   :  { %997 = vrot.lane.b32.xlu1 %v949_v61, %s8861_s2  ;;  %1003 = vrot.lane.b32.xlu0 %v7860_v62, %s8861_s2 }
 0x80a   :  { %v952_v0 = vpop.f32.mrf.mxu0 }
 0x80d   :  { %1037 = vperm.xlu1 %8420, %v1031_v63   ;;  %999 = vrot.lane.b32.xlu0 %v952_v0, %s8861_s2 }
 0x811   :  { %1269 = vperm.xlu1 %8420, %v1263_v1   ;;  %1042 = vperm.xlu0 %8421, %v1032_v2  }
 0x815   :  { %1274 = vperm.xlu0 %8421, %v1264_v3  }
 0x867   :  { %v973_v7 = vpop.permute.xlu1 %972 }
 0x868   :  { %v982_v10 = vsel %vm119_vm3, 0.0, %v973_v7 }
 0x869   :  { %v991_v12 = vmul.f32 %v9017_v9, %v982_v10 }
 0x86b   :  { %v975_v8 = vpop.permute.xlu0 %974  ;;  %v969_v11 = vpop.permute.xlu1 %968  ;;  %v1025_v18 = vadd.f32 %v7855_v56, %v991_v12  ;;  %v8455_v56 = vld [vmem:[#allocation2 + $0x80] sm:$0xff]   ;;  %v1266_v12 = vld [vmem:[#allocation4 + $0x68] sm:$0xff] }
 0x86c   :  { %v983_v13 = vsel %vm119_vm3, 0.0, %v975_v8  ;;  %v980_v31 = vsel %vm119_vm3, 0.0, %v969_v11  ;;  %v1265_v8 = vld [vmem:[#allocation4 + $0x60] sm:$0xff] }
 0x86d   :  { %v992_v19 = vmul.f32 %v9017_v9, %v983_v13  ;;  %v989_v25 = vmul.f32 %v9017_v9, %v980_v31  ;;  %v1816_v11 = vld [vmem:[#allocation4 + $0xa0] sm:$0xff]  ;;  %v1814_v13 = vld [vmem:[#allocation4 + $0x90] sm:$0xff] }
 0x86f   :  { %v971_v15 = vpop.permute.xlu0 %970  ;;  %v1026_v26 = vadd.f32 %v7856_v58, %v992_v19  ;;  %v1023_v40 = vadd.f32 %v989_v25, %v933_v57  ;;  %v8456_v57 = vld [vmem:[#allocation2 + $0x88] sm:$0xff]   ;;  %v8457_v58 = vld [vmem:[#allocation2 + $0x90] sm:$0xff]   ;;  %v1815_v19 = vld [vmem:[#allocation4 + $0x98] sm:$0xff] }
 0x870   :  { %v981_v36 = vsel %vm119_vm3, 0.0, %v971_v15  ;;  %v1817_v15 = vld [vmem:[#allocation4 + $0xa8] sm:$0xff] }
 0x871   :  { %v990_v39 = vmul.f32 %v9017_v9, %v981_v36 }
 0x873   :  { %v1024_v44 = vadd.f32 %v990_v39, %v936_v59  ;;  %v8458_v59 = vld [vmem:[#allocation2 + $0x98] sm:$0xff]  }
 0x877   :  { %v1002_v16 = vpop.permute.xlu1 %1001 }
 0x878   :  { %v1012_v17 = vsel %vm1009_vm12, %v1002_v16, 0.0  ;;  %v8460_v16 = vld [vmem:[#allocation2 + $0x56c] ss:$0 sps:$4 sm:$0x33]  }
 0x879   :  { %v1021_v20 = vmul.f32 %v9022_v14, %v1012_v17  ;;  %v8461_v17 = vld [vmem:[#allocation2 + $0x578] ss:$0 sps:$4 sm:$0x33]   ;;  %8399 = vmatprep.subr.msk.bf16.mxu0 %vm63_vm0, %v8460_v16 }
 0x87b   :  { %v1029_v21 = vadd.f32 %v1025_v18, %v1021_v20  ;;  %v1004_v22 = vpop.permute.xlu0 %1003  ;;  %v998_v29 = vpop.permute.xlu1 %997  ;;  %v1812_v18 = vld [vmem:[#allocation4 + $0x80] sm:$0xff]  ;;  %v1317_v20 = vsel %vm63_vm0, %v8460_v16, 0 }
 0x87c   :  { %v1013_v24 = vsel %vm1009_vm12, %v1004_v22, 0.0  ;;  %v1010_v33 = vsel %vm1009_vm12, %v998_v29, 0.0  ;;  %7878 = vmatpush3.bf16.msra.mxu0 %v1317_v20  ;;  %v8462_v22 = vld [vmem:[#allocation2 + $0x564] sm:$0xff]  }
 0x87d   :  { %v1022_v27 = vmul.f32 %v9022_v14, %v1013_v24  ;;  %v1057_v28 = vadd.f32 %v1048_v5, %v1029_v21  ;;  %v1019_v37 = vmul.f32 %v9022_v14, %v1010_v33  ;;  %v1381_v21 = vsel %vm63_vm0, %v8461_v17, 0  ;;  %v8463_v24 = vld [vmem:[#allocation2 + $0x570] sm:$0xff]   ;;  %7879 = vmatprep.subr.bf16.mxu0 %v8462_v22 }
 0x87f   :  { %v1030_v32 = vadd.f32 %v1026_v26, %v1022_v27  ;;  %v1000_v23 = vpop.permute.xlu0 %999  ;;  %8627 = vtanh.f32 %v1057_v28  ;;  %v1027_v42 = vadd.f32 %v1023_v40, %v1019_v37  ;;  %v1813_v26 = vld [vmem:[#allocation4 + $0x88] sm:$0xff] }
 0x880   :  { %v1011_v38 = vsel %vm1009_vm12, %v1000_v23, 0.0  ;;  %7880 = vmatpush3.bf16.msra.mxu0 %v8462_v22 }
 0x881   :  { %v1058_v34 = vadd.f32 %v1053_v6, %v1030_v32  ;;  %v1020_v41 = vmul.f32 %v9022_v14, %v1011_v38 }
 0x883   :  { %8629 = vtanh.f32 %v1058_v34  ;;  %v1028_v46 = vadd.f32 %v1024_v44, %v1020_v41 }
 0x888   :  { %v1038_v43 = vpop.permute.xlu1 %1037 }
 0x889   :  { %v1055_v45 = vadd.f32 %v1038_v43, %v1027_v42 }
 0x88b   :  { %8631 = vtanh.f32 %v1055_v45 }
 0x88c   :  { %v1043_v47 = vpop.permute.xlu0 %1042  ;;  %v8628_v49 = vpop.eup %8627 }
 0x88d   :  { %v1056_v48 = vadd.f32 %v1043_v47, %v1028_v46  ;;  %v1270_v27 = vpop.permute.xlu1 %1269 }
 0x88f   :  { %8633 = vtanh.f32 %v1056_v48 }
 0x890   :  { %v8630_v50 = vpop.eup %8629  ;;  %v1275_v28 = vpop.permute.xlu0 %1274 }
 0x891   :  { %v1076_v51 = vpack.c.bf16 %v8630_v50, %v8628_v49 }
 0x893   :  { %7861 = vmatprep.subr.bf16.mxu1 %v1076_v51 }
 0x894   :  { %7862 = vmatpush3.bf16.msra.mxu1 %v1076_v51 }
 0x898   :  { %v8632_v52 = vpop.eup %8631 }
 0x89c   :  { %v8634_v53 = vpop.eup %8633 }
 0x89d   :  { %v1075_v55 = vpack.c.bf16 %v8634_v53, %v8632_v52 }
 0x89f   :  { %7863 = vmatprep.subr.bf16.mxu1 %v1075_v55 }
 0x8a0   :  { %7864 = vmatpush3.bf16.msra.mxu1 %v1075_v55 }
 0x8a1   :  { %8400 = vmatprep.subr.msk.bf16.mxu1 %vm63_vm0, %v8461_v17 }
 0x8a3   :  { %7866 = vmatmul.mubr.msk.bf16.vlgmr.msra.gmra.mxu1 %vm1107_vm11, %v8455_v56 }
 0x8a4   :  { %7869 = vmatprep.mubr.msk.bf16.mxu1 %vm1107_vm11, %v8456_v57  ;;  %7886 = vmatpush3.bf16.msra.mxu1 %v1381_v21 }
 0x8a5   :  { %7887 = vmatprep.subr.bf16.mxu1 %v8463_v24 }
 0x8a8   :  { %7888 = vmatpush3.bf16.msra.mxu1 %v8463_v24 }
 0x8ab   :  { %7870 = vmatmul.mubr.msk.bf16.gmra.mxu1 %vm1107_vm11, %v8457_v58 }
 0x8ac   :  { %7873 = vmatprep.mubr.msk.bf16.mxu1 %vm1107_vm11, %v8458_v59 }
 0x8b3   :  { %7874 = vmatmul.mubr.msk.bf16.gmra.mxu1 %vm1107_vm11, %v8459_v60 }
 0x963   :  { %v7867_v61 = vpop.f32.mrf.mxu1 }
 0x964   :  { %1215 = vrot.lane.b32.xlu1 %v7867_v61, %s8860_s0 }
 0x965   :  { %v1160_v62 = vpop.f32.mrf.mxu1 }
 0x967   :  { %v7868_v63 = vpop.f32.mrf.mxu1 }
 0x968   :  { %1211 = vrot.lane.b32.xlu1 %v1160_v62, %s8860_s0  ;;  %1217 = vrot.lane.b32.xlu0 %v7868_v63, %s8860_s0 }
 0x969   :  { %v1163_v0 = vpop.f32.mrf.mxu1 }
 0x96b   :  { %v9045_v1 = vpop.f32.mrf.mxu1 }
 0x96c   :  { %1213 = vrot.lane.b32.xlu0 %v1163_v0, %s8860_s0 }
 0x96d   :  { %v1176_v2 = vpop.f32.mrf.mxu1 }
 0x96f   :  { %v9048_v3 = vpop.f32.mrf.mxu1 }
 0x971   :  { %v1179_v4 = vpop.f32.mrf.mxu1 }
 0x973   :  { %v7875_v5 = vpop.f32.mrf.mxu1 }
 0x974   :  { %1239 = vrot.lane.b32.xlu1 %v7875_v5, %s8861_s2 }
 0x975   :  { %v1192_v6 = vpop.f32.mrf.mxu1 }
 0x977   :  { %v7876_v7 = vpop.f32.mrf.mxu1 }
 0x978   :  { %1235 = vrot.lane.b32.xlu1 %v1192_v6, %s8861_s2  ;;  %1241 = vrot.lane.b32.xlu0 %v7876_v7, %s8861_s2 }
 0x979   :  { %v1195_v10 = vpop.f32.mrf.mxu1 }
 0x97c   :  { %1279 = vperm.xlu1 %8420, %v1265_v8   ;;  %1237 = vrot.lane.b32.xlu0 %v1195_v10, %s8861_s2  ;;  %v8464_v8 = vld [vmem:[#allocation2 + $0xa8] sm:$0xff]  }
 0x980   :  { %1850 = vperm.xlu1 %8420, %v1816_v11   ;;  %1284 = vperm.xlu0 %8421, %v1266_v12  }
 0x984   :  { %1840 = vperm.xlu1 %8420, %v1814_v13   ;;  %1855 = vperm.xlu0 %8421, %v1817_v15  }
 0x988   :  { %1830 = vperm.xlu1 %8420, %v1812_v18   ;;  %1845 = vperm.xlu0 %8421, %v1815_v19  }
 0x98c   :  { %1835 = vperm.xlu0 %8421, %v1813_v26  }
 0x9d6   :  { %v1216_v29 = vpop.permute.xlu1 %1215 }
 0x9d7   :  { %v1225_v43 = vsel %vm119_vm3, 0.0, %v1216_v29  ;;  %v8467_v29 = vld [vmem:[#allocation2 + $0xc0] sm:$0xff]  }
 0x9d8   :  { %v1229_v50 = vmul.f32 %v9017_v9, %v1225_v43 }
 0x9da   :  { %v1218_v31 = vpop.permute.xlu0 %1217  ;;  %v1212_v32 = vpop.permute.xlu1 %1211  ;;  %v1257_v59 = vadd.f32 %v9045_v1, %v1229_v50 }
 0x9db   :  { %v1223_v33 = vsel %vm119_vm3, 0.0, %v1212_v32  ;;  %v1226_v51 = vsel %vm119_vm3, 0.0, %v1218_v31  ;;  %v8468_v31 = vld [vmem:[#allocation2 + $0xc8] sm:$0xff]   ;;  %v8469_v32 = vld [vmem:[#allocation2 + $0xd0] sm:$0xff]  }
 0x9dc   :  { %v1227_v25 = vmul.f32 %v9017_v9, %v1223_v33  ;;  %v1230_v57 = vmul.f32 %v9017_v9, %v1226_v51  ;;  %v8470_v33 = vld [vmem:[#allocation2 + $0xd8] sm:$0xff]  }
 0x9de   :  { %v1214_v34 = vpop.permute.xlu0 %1213  ;;  %v1255_v40 = vadd.f32 %v1227_v25, %v1176_v2  ;;  %v1258_v63 = vadd.f32 %v9048_v3, %v1230_v57  ;;  %v8473_v25 = vld [vmem:[#allocation2 + $0xf0] sm:$0xff]  }
 0x9df   :  { %v1224_v36 = vsel %vm119_vm3, 0.0, %v1214_v34  ;;  %v8471_v34 = vld [vmem:[#allocation2 + $0xe0] sm:$0xff]  }
 0x9e0   :  { %v1228_v41 = vmul.f32 %v9017_v9, %v1224_v36  ;;  %v8474_v36 = vld [vmem:[#allocation2 + $0xf8] sm:$0xff]  }
 0x9e2   :  { %v1256_v47 = vadd.f32 %v1228_v41, %v1179_v4 }
 0x9e6   :  { %v1240_v23 = vpop.permute.xlu1 %1239 }
 0x9e7   :  { %v1249_v48 = vsel %vm1009_vm12, %v1240_v23, 0.0  ;;  %v8472_v23 = vld [vmem:[#allocation2 + $0xe8] sm:$0xff]  }
 0x9e8   :  { %v1253_v55 = vmul.f32 %v9022_v14, %v1249_v48 }
 0x9ea   :  { %v1236_v37 = vpop.permute.xlu1 %1235  ;;  %v1242_v38 = vpop.permute.xlu0 %1241  ;;  %v1261_v61 = vadd.f32 %v1257_v59, %v1253_v55 }
 0x9eb   :  { %v1247_v39 = vsel %vm1009_vm12, %v1236_v37, 0.0  ;;  %v1250_v56 = vsel %vm1009_vm12, %v1242_v38, 0.0  ;;  %v8475_v37 = vld [vmem:[#allocation2 + $0x100] sm:$0xff]  }
 0x9ec   :  { %v1251_v42 = vmul.f32 %v9022_v14, %v1247_v39  ;;  %v1254_v60 = vmul.f32 %v9022_v14, %v1250_v56 }
 0x9ee   :  { %v1259_v44 = vadd.f32 %v1255_v40, %v1251_v42  ;;  %v1238_v45 = vpop.permute.xlu0 %1237  ;;  %v1262_v2 = vadd.f32 %v1258_v63, %v1254_v60  ;;  %v1810_v63 = vld [vmem:[#allocation4 + $0x70] sm:$0xff] }
 0x9ef   :  { %v1248_v46 = vsel %vm1009_vm12, %v1238_v45, 0.0 }
 0x9f0   :  { %v1252_v49 = vmul.f32 %v9022_v14, %v1248_v46  ;;  %v1287_v52 = vadd.f32 %v1270_v27, %v1259_v44  ;;  %v8465_v27 = vld [vmem:[#allocation2 + $0xb0] sm:$0xff]  }
 0x9f2   :  { %v1260_v53 = vadd.f32 %v1256_v47, %v1252_v49  ;;  %8635 = vtanh.f32 %v1287_v52 }
 0x9f4   :  { %v1288_v58 = vadd.f32 %v1275_v28, %v1260_v53  ;;  %v8466_v28 = vld [vmem:[#allocation2 + $0xb8] sm:$0xff]  }
 0x9f6   :  { %8637 = vtanh.f32 %v1288_v58 }
 0x9f7   :  { %v1280_v62 = vpop.permute.xlu1 %1279 }
 0x9f8   :  { %v1289_v0 = vadd.f32 %v1280_v62, %v1261_v61 }
 0x9fa   :  { %8639 = vtanh.f32 %v1289_v0  ;;  %v2240_v0 = vld [vmem:[#allocation4 + $0xb0] sm:$0xff] }
 0x9fb   :  { %v1285_v4 = vpop.permute.xlu0 %1284 }
 0x9fc   :  { %v1290_v5 = vadd.f32 %v1285_v4, %v1262_v2  ;;  %v1811_v2 = vld [vmem:[#allocation4 + $0x78] sm:$0xff]  ;;  %v2242_v4 = vld [vmem:[#allocation4 + $0xc0] sm:$0xff] }
 0x9fe   :  { %8641 = vtanh.f32 %v1290_v5  ;;  %v2241_v5 = vld [vmem:[#allocation4 + $0xb8] sm:$0xff] }
 0x9ff   :  { %v8636_v6 = vpop.eup %8635 }
 0xa03   :  { %v8638_v7 = vpop.eup %8637 }
 0xa04   :  { %v9076_v9 = vpack.c.bf16 %v8638_v7, %v8636_v6  ;;  %v2244_v6 = vld [vmem:[#allocation4 + $0xd0] sm:$0xff]  ;;  %v2243_v7 = vld [vmem:[#allocation4 + $0xc8] sm:$0xff] }
 0xa06   :  { %10135 = vst [vmem:[#allocation10_spill] sm:$0xff] %v9076_v9  ;;  %7881 = vmatprep.mubr.msk.bf16.mxu0 %vm1309_vm13, %v9076_v9  ;;  %7889 = vmatprep.mubr.msk.bf16.mxu1 %vm1309_vm13, %v9076_v9  ;;  %v9449_v9 = vld [vmem:[#allocation4 + $0x3a8] ss:$0 sm:$0xff] }
 0xa07   :  { %v8640_v14 = vpop.eup %8639 }
 0xa0b   :  { %v8642_v1 = vpop.eup %8641 }
 0xa0c   :  { %v9082_v3 = vpack.c.bf16 %v8642_v1, %v8640_v14  ;;  %v2245_v14 = vld [vmem:[#allocation4 + $0xd8] sm:$0xff]  ;;  %v8476_v1 = vld [vmem:[#allocation2 + $0x108] sm:$0xff]  }
 0xa0e   :  { %10136 = vst [vmem:[#allocation11_spill] sm:$0xff] %v9082_v3  ;;  %7882 = vmatmul.mubr.msk.bf16.vlgmr.msra.gmra.mxu0 %vm1309_vm13, %v9082_v3  ;;  %7890 = vmatmul.mubr.msk.bf16.vlgmr.msra.gmra.mxu1 %vm1309_vm13, %v9082_v3 }
 0xa0f   :  { %7897 = vmatprep.mubr.msk.bf16.mxu0 %vm1107_vm11, %v8464_v8  ;;  %7929 = vmatprep.mubr.msk.bf16.mxu1 %vm1962_vm14, %v8476_v1  ;;  %v1851_v8 = vpop.permute.xlu1 %1850 }
 0xace   :  { %v7883_v10 = vpop.f32.mrf.mxu0  ;;  %v7891_v11 = vpop.f32.mrf.mxu1 }
 0xacf   :  { %v1434_v17 = vmax.f32 %v7883_v10, %v7891_v11  ;;  %v1856_v10 = vpop.permute.xlu0 %1855  ;;  %v1841_v11 = vpop.permute.xlu1 %1840 }
 0xad0   :  { %v1353_v12 = vpop.f32.mrf.mxu0  ;;  %v1417_v13 = vpop.f32.mrf.mxu1 }
 0xad1   :  { %v1432_v21 = vmax.f32 %v1353_v12, %v1417_v13 }
 0xad2   :  { %v7884_v15 = vpop.f32.mrf.mxu0  ;;  %v7892_v16 = vpop.f32.mrf.mxu1 }
 0xad3   :  { %v1435_v18 = vmax.f32 %v7884_v15, %v7892_v16  ;;  %v9133_v12 = vpop.permute.xlu0 %1845  ;;  %v9135_v13 = vpop.permute.xlu1 %1830 }
 0xad4   :  { %v1356_v19 = vpop.f32.mrf.mxu0  ;;  %v1420_v20 = vpop.f32.mrf.mxu1 }
 0xad5   :  { %v1461_v22 = vpack.c.bf16 %v1435_v18, %v1434_v17  ;;  %v1433_v24 = vmax.f32 %v1356_v19, %v1420_v20 }
 0xad7   :  { %v1460_v26 = vpack.c.bf16 %v1433_v24, %v1432_v21  ;;  %7893 = vmatprep.subr.bf16.mxu0 %v1461_v22  ;;  %v1836_v15 = vpop.permute.xlu0 %1835 }
 0xad8   :  { %7894 = vmatpush3.bf16.msra.mxu0 %v1461_v22 }
 0xad9   :  { %7895 = vmatprep.subr.bf16.mxu0 %v1460_v26 }
 0xadc   :  { %7896 = vmatpush3.bf16.msra.mxu0 %v1460_v26 }
 0xadf   :  { %7898 = vmatmul.mubr.msk.bf16.vlgmr.msra.gmra.mxu0 %vm1107_vm11, %v8465_v27 }
 0xae0   :  { %7901 = vmatprep.mubr.msk.bf16.mxu0 %vm1107_vm11, %v8466_v28  ;;  %v9138_v28 = vld [vmem:[#allocation4 + $0x390] ss:$0 sm:$0xff] }
 0xae7   :  { %7902 = vmatmul.mubr.msk.bf16.gmra.mxu0 %vm1107_vm11, %v8467_v29 }
 0xae8   :  { %7905 = vmatprep.mubr.msk.bf16.mxu0 %vm1107_vm11, %v8468_v31 }
 0xaef   :  { %7906 = vmatmul.mubr.msk.bf16.gmra.mxu0 %vm1107_vm11, %v8469_v32 }
 0xaf0   :  { %7909 = vmatprep.mubr.msk.bf16.mxu0 %vm1107_vm11, %v8470_v33 }
 0xaf7   :  { %7910 = vmatmul.mubr.msk.bf16.gmra.mxu0 %vm1107_vm11, %v8471_v34 }
 0xaf8   :  { %7913 = vmatprep.mubr.msk.bf16.mxu0 %vm1107_vm11, %v8472_v23 }
 0xaff   :  { %7914 = vmatmul.mubr.msk.bf16.gmra.mxu0 %vm1107_vm11, %v8473_v25 }
 0xb00   :  { %7917 = vmatprep.mubr.msk.bf16.mxu0 %vm1107_vm11, %v8474_v36 }
 0xb07   :  { %7918 = vmatmul.mubr.msk.bf16.gmra.mxu0 %vm1107_vm11, %v8475_v37  ;;  %v9146_v37 = vld [vmem:[#allocation4 + $0x398] ss:$0 sm:$0xff] }
 0xb9f   :  { %v7899_v38 = vpop.f32.mrf.mxu0 }
 0xba0   :  { %1699 = vrot.lane.b32.xlu1 %v7899_v38, %s8860_s0 }
 0xba1   :  { %v1592_v39 = vpop.f32.mrf.mxu0 }
 0xba3   :  { %v7900_v40 = vpop.f32.mrf.mxu0 }
 0xba4   :  { %1695 = vrot.lane.b32.xlu1 %v1592_v39, %s8860_s0  ;;  %1701 = vrot.lane.b32.xlu0 %v7900_v40, %s8860_s0 }
 0xba5   :  { %v1595_v41 = vpop.f32.mrf.mxu0 }
 0xba7   :  { %v7903_v42 = vpop.f32.mrf.mxu0 }
 0xba8   :  { %1697 = vrot.lane.b32.xlu0 %v1595_v41, %s8860_s0  ;;  %1707 = vrot.lane.b32.xlu1 %v7903_v42, %s8860_s0 }
 0xba9   :  { %v1608_v43 = vpop.f32.mrf.mxu0 }
 0xbab   :  { %v7904_v44 = vpop.f32.mrf.mxu0 }
 0xbac   :  { %1703 = vrot.lane.b32.xlu1 %v1608_v43, %s8860_s0  ;;  %1709 = vrot.lane.b32.xlu0 %v7904_v44, %s8860_s0 }
 0xbad   :  { %v1611_v45 = vpop.f32.mrf.mxu0 }
 0xbaf   :  { %v9107_v46 = vpop.f32.mrf.mxu0 }
 0xbb0   :  { %1705 = vrot.lane.b32.xlu0 %v1611_v45, %s8860_s0 }
 0xbb1   :  { %v9110_v47 = vpop.f32.mrf.mxu0 }
 0xbb3   :  { %v9112_v48 = vpop.f32.mrf.mxu0 }
 0xbb5   :  { %v9114_v49 = vpop.f32.mrf.mxu0 }
 0xbb7   :  { %v9116_v50 = vpop.f32.mrf.mxu0 }
 0xbb9   :  { %v9118_v51 = vpop.f32.mrf.mxu0 }
 0xbbb   :  { %v9120_v52 = vpop.f32.mrf.mxu0 }
 0xbbd   :  { %v9122_v53 = vpop.f32.mrf.mxu0 }
 0xbbf   :  { %v7915_v55 = vpop.f32.mrf.mxu0 }
 0xbc0   :  { %1752 = vrot.lane.b32.xlu1 %v7915_v55, %s8861_s2 }
 0xbc1   :  { %v1656_v56 = vpop.f32.mrf.mxu0 }
 0xbc3   :  { %v7916_v57 = vpop.f32.mrf.mxu0 }
 0xbc4   :  { %1754 = vrot.lane.b32.xlu0 %v7916_v57, %s8861_s2 }
 0xbc5   :  { %v1659_v58 = vpop.f32.mrf.mxu0 }
 0xbc7   :  { %v7919_v59 = vpop.f32.mrf.mxu0 }
 0xbc8   :  { %1760 = vrot.lane.b32.xlu1 %v7919_v59, %s8861_s2 }
 0xbc9   :  { %v1672_v60 = vpop.f32.mrf.mxu0 }
 0xbcb   :  { %v7920_v61 = vpop.f32.mrf.mxu0 }
 0xbcc   :  { %1756 = vrot.lane.b32.xlu1 %v1672_v60, %s8861_s2  ;;  %1762 = vrot.lane.b32.xlu0 %v7920_v61, %s8861_s2 }
 0xbcd   :  { %v1675_v62 = vpop.f32.mrf.mxu0 }
 0xbd0   :  { %1748 = vrot.lane.b32.xlu1 %v1656_v56, %s8861_s2  ;;  %1758 = vrot.lane.b32.xlu0 %v1675_v62, %s8861_s2 }
 0xbd4   :  { %1820 = vperm.xlu1 %8420, %v1810_v63   ;;  %1750 = vrot.lane.b32.xlu0 %v1659_v58, %s8861_s2 }
 0xbd8   :  { %2250 = vperm.xlu1 %8420, %v2240_v0   ;;  %1825 = vperm.xlu0 %8421, %v1811_v2  }
 0xbdc   :  { %2260 = vperm.xlu1 %8420, %v2242_v4   ;;  %2255 = vperm.xlu0 %8421, %v2241_v5  }
 0xbe0   :  { %2270 = vperm.xlu1 %8420, %v2244_v6   ;;  %2265 = vperm.xlu0 %8421, %v2243_v7  }
 0xbe4   :  { %2275 = vperm.xlu0 %8421, %v2245_v14  }
 0xc12   :  { %v1700_v16 = vpop.permute.xlu1 %1699 }
 0xc13   :  { %v1721_v25 = vsel %vm119_vm3, 0.0, %v1700_v16 }
 0xc14   :  { %v1734_v45 = vmul.f32 %v9138_v28, %v1721_v25 }
 0xc16   :  { %v1702_v17 = vpop.permute.xlu0 %1701  ;;  %v1696_v18 = vpop.permute.xlu1 %1695  ;;  %v1796_v1 = vadd.f32 %v9107_v46, %v1734_v45 }
 0xc17   :  { %v1722_v34 = vsel %vm119_vm3, 0.0, %v1702_v17 }
 0xc18   :  { %v1735_v43 = vmul.f32 %v9138_v28, %v1722_v34 }
 0xc1a   :  { %v1698_v19 = vpop.permute.xlu0 %1697  ;;  %v1708_v20 = vpop.permute.xlu1 %1707  ;;  %v1797_v4 = vadd.f32 %v9112_v48, %v1735_v43  ;;  %v1719_v48 = vsel %vm119_vm3, 0.0, %v1696_v18 }
 0xc1b   :  { %v1725_v24 = vsel %vm119_vm3, 0.0, %v1708_v20 }
 0xc1c   :  { %v1738_v29 = vmul.f32 %v9138_v28, %v1725_v24 }
 0xc1e   :  { %v1710_v21 = vpop.permute.xlu0 %1709  ;;  %v1704_v22 = vpop.permute.xlu1 %1703  ;;  %v1800_v39 = vadd.f32 %v9116_v50, %v1738_v29 }
 0xc1f   :  { %v1723_v31 = vsel %vm119_vm3, 0.0, %v1704_v22  ;;  %v1726_v32 = vsel %vm119_vm3, 0.0, %v1710_v21 }
 0xc20   :  { %v1736_v36 = vmul.f32 %v9138_v28, %v1723_v31  ;;  %v1739_v40 = vmul.f32 %v9138_v28, %v1726_v32  ;;  %v1732_v32 = vmul.f32 %v9138_v28, %v1719_v48 }
 0xc22   :  { %v1706_v26 = vpop.permute.xlu0 %1705  ;;  %v1798_v59 = vadd.f32 %v1736_v36, %v9118_v51  ;;  %v1801_v62 = vadd.f32 %v9120_v52, %v1739_v40 }
 0xc23   :  { %v1724_v44 = vsel %vm119_vm3, 0.0, %v1706_v26 }
 0xc24   :  { %v1737_v63 = vmul.f32 %v9138_v28, %v1724_v44 }
 0xc26   :  { %v1799_v52 = vadd.f32 %v1737_v63, %v9122_v53  ;;  %v1720_v53 = vsel %vm119_vm3, 0.0, %v1698_v19  ;;  %v8483_v63 = vld [vmem:[#allocation2 + $0x140] sm:$0xff]  }
 0xc32   :  { %v1753_v27 = vpop.permute.xlu1 %1752 }
 0xc33   :  { %v1775_v55 = vsel %vm1772_vm15, %v1753_v27, 0.0 }
 0xc34   :  { %v1788_v5 = vmul.f32 %v9146_v37, %v1775_v55 }
 0xc36   :  { %v1755_v33 = vpop.permute.xlu0 %1754  ;;  %v1804_v22 = vadd.f32 %v1796_v1, %v1788_v5  ;;  %v8487_v5 = vld [vmem:[#allocation2 + $0x160] sm:$0xff]  }
 0xc37   :  { %v1776_v41 = vsel %vm1772_vm15, %v1755_v33, 0.0  ;;  %v1794_v33 = vadd.f32 %v1732_v32, %v9110_v47 }
 0xc38   :  { %v1789_v50 = vmul.f32 %v9146_v37, %v1776_v41 }
 0xc3a   :  { %v1761_v23 = vpop.permute.xlu1 %1760  ;;  %v1805_v16 = vadd.f32 %v1797_v4, %v1789_v50  ;;  %v8479_v50 = vld [vmem:[#allocation2 + $0x120] sm:$0xff]   ;;  %v8486_v4 = vld [vmem:[#allocation2 + $0x158] sm:$0xff]  }
 0xc3b   :  { %v1779_v38 = vsel %vm1772_vm15, %v1761_v23, 0.0 }
 0xc3c   :  { %v1792_v42 = vmul.f32 %v9146_v37, %v1779_v38  ;;  %v1861_v27 = vadd.f32 %v1836_v15, %v1805_v16  ;;  %v1733_v15 = vmul.f32 %v9138_v28, %v1720_v53 }
 0xc3e   :  { %v1808_v56 = vadd.f32 %v1800_v39, %v1792_v42  ;;  %v1757_v57 = vpop.permute.xlu1 %1756  ;;  %v1763_v58 = vpop.permute.xlu0 %1762  ;;  %v1795_v19 = vadd.f32 %v1733_v15, %v9114_v49  ;;  %v8488_v15 = vld [vmem:[#allocation2 + $0x57c] sm:$0x1f]  }
 0xc3f   :  { %v1777_v60 = vsel %vm1772_vm15, %v1757_v57, 0.0  ;;  %v1780_v61 = vsel %vm1772_vm15, %v1763_v58, 0.0  ;;  %v8477_v58 = vld [vmem:[#allocation2 + $0x110] sm:$0xff]   ;;  %8401 = vmatprep.subr.msk.bf16.mxu0 %vm2328_vm7, %v8488_v15 }
 0xc40   :  { %v1790_v0 = vmul.f32 %v9146_v37, %v1777_v60  ;;  %v1793_v2 = vmul.f32 %v9146_v37, %v1780_v61  ;;  %v1864_v6 = vadd.f32 %v1851_v8, %v1808_v56  ;;  %v8480_v60 = vld [vmem:[#allocation2 + $0x128] sm:$0xff]   ;;  %v8481_v61 = vld [vmem:[#allocation2 + $0x130] sm:$0xff]  }
 0xc42   :  { %v1806_v51 = vadd.f32 %v1798_v59, %v1790_v0  ;;  %v1809_v7 = vadd.f32 %v1801_v62, %v1793_v2  ;;  %v1759_v14 = vpop.permute.xlu0 %1758  ;;  %v1749_v26 = vpop.permute.xlu1 %1748  ;;  %8643 = vtanh.f32 %v1864_v6  ;;  %v8478_v59 = vld [vmem:[#allocation2 + $0x118] sm:$0xff]   ;;  %v8484_v0 = vld [vmem:[#allocation2 + $0x148] sm:$0xff]   ;;  %v8485_v2 = vld [vmem:[#allocation2 + $0x150] sm:$0xff]  }
 0xc43   :  { %v1778_v17 = vsel %vm1772_vm15, %v1759_v14, 0.0  ;;  %v1773_v29 = vsel %vm1772_vm15, %v1749_v26, 0.0  ;;  %v8482_v62 = vld [vmem:[#allocation2 + $0x138] sm:$0xff]  }
 0xc44   :  { %v1865_v20 = vadd.f32 %v1856_v10, %v1809_v7  ;;  %v1791_v21 = vmul.f32 %v9146_v37, %v1778_v17  ;;  %v1862_v24 = vadd.f32 %v1841_v11, %v1806_v51  ;;  %v1860_v10 = vadd.f32 %v9135_v13, %v1804_v22 }
 0xc45   :  { %v1786_v11 = vmul.f32 %v9146_v37, %v1773_v29 }
 0xc46   :  { %v1807_v8 = vadd.f32 %v1799_v52, %v1791_v21  ;;  %8645 = vtanh.f32 %v1865_v20  ;;  %v1751_v31 = vpop.permute.xlu0 %1750 }
 0xc47   :  { %8647 = vtanh.f32 %v1862_v24  ;;  %v1774_v18 = vsel %vm1772_vm15, %v1751_v31, 0.0  ;;  %v1802_v34 = vadd.f32 %v1794_v33, %v1786_v11  ;;  %v8489_v33 = vld [vmem:[#allocation2 + $0x584] sm:$0x1f]  }
 0xc48   :  { %v1863_v46 = vadd.f32 %v9133_v12, %v1807_v8  ;;  %v1787_v12 = vmul.f32 %v9146_v37, %v1774_v18  ;;  %v2246_v18 = vld [vmem:[#allocation4 + $0xe0] sm:$0xff] }
 0xc4a   :  { %8649 = vtanh.f32 %v1863_v46  ;;  %v1803_v13 = vadd.f32 %v1795_v19, %v1787_v12  ;;  %v3198_v19 = vld [vmem:[#allocation4 + $0x160] sm:$0xff] }
 0xc4b   :  { %8651 = vtanh.f32 %v1861_v27 }
 0xc4c   :  { %8653 = vtanh.f32 %v1860_v10 }
 0xc4f   :  { %v1821_v23 = vpop.permute.xlu1 %1820  ;;  %v8644_v36 = vpop.eup %8643 }
 0xc50   :  { %v1858_v25 = vadd.f32 %v1821_v23, %v1802_v34  ;;  %v2330_v34 = vsel %vm2328_vm7, %v8488_v15, 0  ;;  %v2405_v23 = vsel %vm2328_vm7, %v8489_v33, 0 }
 0xc51   :  { %7954 = vmatpush3.bf16.msra.mxu0 %v2330_v34 }
 0xc52   :  { %8655 = vtanh.f32 %v1858_v25  ;;  %v2247_v25 = vld [vmem:[#allocation4 + $0xe8] sm:$0xff] }
 0xc53   :  { %v1826_v38 = vpop.permute.xlu0 %1825  ;;  %v8646_v39 = vpop.eup %8645 }
 0xc54   :  { %v1859_v40 = vadd.f32 %v1826_v38, %v1803_v13  ;;  %v1901_v41 = vpack.c.bf16 %v8646_v39, %v8644_v36  ;;  %v8648_v42 = vpop.eup %8647  ;;  %v3196_v13 = vld [vmem:[#allocation4 + $0x150] sm:$0xff]  ;;  %v3199_v36 = vld [vmem:[#allocation4 + $0x168] sm:$0xff]  ;;  %v3194_v38 = vld [vmem:[#allocation4 + $0x140] sm:$0xff] }
 0xc55   :  { %v3197_v39 = vld [vmem:[#allocation4 + $0x158] sm:$0xff] }
 0xc56   :  { %8657 = vtanh.f32 %v1859_v40  ;;  %7921 = vmatprep.subr.bf16.mxu1 %v1901_v41  ;;  %v3192_v40 = vld [vmem:[#allocation4 + $0x130] sm:$0xff] }
 0xc57   :  { %v8650_v43 = vpop.eup %8649  ;;  %7922 = vmatpush3.bf16.msra.mxu1 %v1901_v41  ;;  %v3195_v41 = vld [vmem:[#allocation4 + $0x148] sm:$0xff] }
 0xc58   :  { %v8652_v47 = vpop.eup %8651  ;;  %v1900_v44 = vpack.c.bf16 %v8650_v43, %v8648_v42  ;;  %v3190_v42 = vld [vmem:[#allocation4 + $0x120] sm:$0xff]  ;;  %v3193_v43 = vld [vmem:[#allocation4 + $0x138] sm:$0xff] }
 0xc59   :  { %v8654_v45 = vpop.eup %8653 }
 0xc5a   :  { %7923 = vmatprep.subr.bf16.mxu1 %v1900_v44  ;;  %v1899_v55 = vpack.c.bf16 %v8652_v47, %v8654_v45  ;;  %v3188_v47 = vld [vmem:[#allocation4 + $0x110] sm:$0xff]  ;;  %v3189_v45 = vld [vmem:[#allocation4 + $0x118] sm:$0xff] }
 0xc5b   :  { %7924 = vmatpush3.bf16.msra.mxu1 %v1900_v44  ;;  %v3191_v44 = vld [vmem:[#allocation4 + $0x128] sm:$0xff] }
 0xc5c   :  { %7925 = vmatprep.subr.bf16.mxu1 %v1899_v55 }
 0xc5f   :  { %7926 = vmatpush3.bf16.msra.mxu1 %v1899_v55  ;;  %v8656_v49 = vpop.eup %8655  ;;  %v2251_v55 = vpop.permute.xlu1 %2250 }
 0xc63   :  { %v8658_v56 = vpop.eup %8657 }
 0xc64   :  { %v1898_v57 = vpack.c.bf16 %v8658_v56, %v8656_v49  ;;  %v2256_v49 = vpop.permute.xlu0 %2255  ;;  %v2261_v56 = vpop.permute.xlu1 %2260 }
 0xc66   :  { %7927 = vmatprep.subr.bf16.mxu1 %v1898_v57 }
 0xc67   :  { %7928 = vmatpush3.bf16.msra.mxu1 %v1898_v57 }
 0xc68   :  { %8402 = vmatprep.subr.msk.bf16.mxu1 %vm2328_vm7, %v8489_v33  ;;  %v2266_v57 = vpop.permute.xlu0 %2265 }
 0xc6a   :  { %7930 = vmatmul.mubr.msk.bf16.vlgmr.msra.gmra.mxu1 %vm1962_vm14, %v8477_v58  ;;  %v9230_v58 = vpop.permute.xlu1 %2270 }
 0xc6b   :  { %7933 = vmatprep.mubr.msk.bf16.mxu1 %vm1962_vm14, %v8478_v59  ;;  %7964 = vmatpush3.bf16.msra.mxu1 %v2405_v23 }
 0xc6c   :  { %v9232_v59 = vpop.permute.xlu0 %2275 }
 0xc72   :  { %7934 = vmatmul.mubr.msk.bf16.gmra.mxu1 %vm1962_vm14, %v8479_v50 }
 0xc73   :  { %7937 = vmatprep.mubr.msk.bf16.mxu1 %vm1962_vm14, %v8480_v60 }
 0xc7a   :  { %7938 = vmatmul.mubr.msk.bf16.gmra.mxu1 %vm1962_vm14, %v8481_v61 }
 0xc7b   :  { %7941 = vmatprep.mubr.msk.bf16.mxu1 %vm1962_vm14, %v8482_v62 }
 0xc82   :  { %7942 = vmatmul.mubr.msk.bf16.gmra.mxu1 %vm1962_vm14, %v8483_v63 }
 0xc83   :  { %7945 = vmatprep.mubr.msk.bf16.mxu1 %vm1962_vm14, %v8484_v0 }
 0xc8a   :  { %7946 = vmatmul.mubr.msk.bf16.gmra.mxu1 %vm1962_vm14, %v8485_v2 }
 0xc8b   :  { %7949 = vmatprep.mubr.msk.bf16.mxu1 %vm1962_vm14, %v8486_v4 }
 0xc92   :  { %7950 = vmatmul.mubr.msk.bf16.gmra.mxu1 %vm1962_vm14, %v8487_v5 }
 0xd2a   :  { %v7931_v6 = vpop.f32.mrf.mxu1 }
 0xd2b   :  { %2140 = vrot.lane.b32.xlu1 %v7931_v6, %s8860_s0 }
 0xd2c   :  { %v2033_v51 = vpop.f32.mrf.mxu1 }
 0xd2e   :  { %v7932_v7 = vpop.f32.mrf.mxu1 }
 0xd2f   :  { %2136 = vrot.lane.b32.xlu1 %v2033_v51, %s8860_s0  ;;  %2142 = vrot.lane.b32.xlu0 %v7932_v7, %s8860_s0 }
 0xd30   :  { %v2036_v14 = vpop.f32.mrf.mxu1 }
 0xd32   :  { %v7935_v1 = vpop.f32.mrf.mxu1 }
 0xd33   :  { %2138 = vrot.lane.b32.xlu0 %v2036_v14, %s8860_s0  ;;  %2148 = vrot.lane.b32.xlu1 %v7935_v1, %s8860_s0 }
 0xd34   :  { %v2049_v16 = vpop.f32.mrf.mxu1 }
 0xd36   :  { %v7936_v17 = vpop.f32.mrf.mxu1 }
 0xd37   :  { %2144 = vrot.lane.b32.xlu1 %v2049_v16, %s8860_s0  ;;  %2150 = vrot.lane.b32.xlu0 %v7936_v17, %s8860_s0 }
 0xd38   :  { %v2052_v52 = vpop.f32.mrf.mxu1 }
 0xd3a   :  { %v9201_v20 = vpop.f32.mrf.mxu1 }
 0xd3b   :  { %2146 = vrot.lane.b32.xlu0 %v2052_v52, %s8860_s0 }
 0xd3c   :  { %v9204_v21 = vpop.f32.mrf.mxu1 }
 0xd3e   :  { %v9206_v22 = vpop.f32.mrf.mxu1 }
 0xd40   :  { %v9208_v24 = vpop.f32.mrf.mxu1 }
 0xd42   :  { %v9210_v26 = vpop.f32.mrf.mxu1 }
 0xd44   :  { %v9212_v48 = vpop.f32.mrf.mxu1 }
 0xd46   :  { %v9214_v8 = vpop.f32.mrf.mxu1 }
 0xd48   :  { %v9216_v27 = vpop.f32.mrf.mxu1 }
 0xd4a   :  { %v7947_v29 = vpop.f32.mrf.mxu1 }
 0xd4b   :  { %2188 = vrot.lane.b32.xlu1 %v7947_v29, %s8861_s2 }
 0xd4c   :  { %v2097_v46 = vpop.f32.mrf.mxu1 }
 0xd4e   :  { %v7948_v31 = vpop.f32.mrf.mxu1 }
 0xd4f   :  { %2184 = vrot.lane.b32.xlu1 %v2097_v46, %s8861_s2  ;;  %2190 = vrot.lane.b32.xlu0 %v7948_v31, %s8861_s2 }
 0xd50   :  { %v2100_v32 = vpop.f32.mrf.mxu1 }
 0xd52   :  { %v7951_v53 = vpop.f32.mrf.mxu1 }
 0xd53   :  { %2186 = vrot.lane.b32.xlu0 %v2100_v32, %s8861_s2  ;;  %2196 = vrot.lane.b32.xlu1 %v7951_v53, %s8861_s2 }
 0xd54   :  { %v2113_v10 = vpop.f32.mrf.mxu1 }
 0xd56   :  { %v7952_v11 = vpop.f32.mrf.mxu1 }
 0xd57   :  { %2192 = vrot.lane.b32.xlu1 %v2113_v10, %s8861_s2  ;;  %2198 = vrot.lane.b32.xlu0 %v7952_v11, %s8861_s2 }
 0xd58   :  { %v2116_v12 = vpop.f32.mrf.mxu1 }
 0xd5b   :  { %2280 = vperm.xlu1 %8420, %v2246_v18   ;;  %2194 = vrot.lane.b32.xlu0 %v2116_v12, %s8861_s2 }
 0xd5f   :  { %3272 = vperm.xlu1 %8420, %v3198_v19   ;;  %2285 = vperm.xlu0 %8421, %v2247_v25  }
 0xd63   :  { %3262 = vperm.xlu1 %8420, %v3196_v13   ;;  %3277 = vperm.xlu0 %8421, %v3199_v36  }
 0xd67   :  { %3252 = vperm.xlu1 %8420, %v3194_v38   ;;  %3267 = vperm.xlu0 %8421, %v3197_v39  }
 0xd6b   :  { %3242 = vperm.xlu1 %8420, %v3192_v40   ;;  %3257 = vperm.xlu0 %8421, %v3195_v41  }
 0xd6f   :  { %3232 = vperm.xlu1 %8420, %v3190_v42   ;;  %3247 = vperm.xlu0 %8421, %v3193_v43  }
 0xd73   :  { %3222 = vperm.xlu1 %8420, %v3188_v47   ;;  %3237 = vperm.xlu0 %8421, %v3191_v44  }
 0xd77   :  { %3227 = vperm.xlu0 %8421, %v3189_v45  }
 0xd9d   :  { %v2141_v50 = vpop.permute.xlu1 %2140 }
 0xd9e   :  { %v2162_v6 = vsel %vm119_vm3, 0.0, %v2141_v50 }
 0xd9f   :  { %v2170_v17 = vmul.f32 %v9138_v28, %v2162_v6 }
 0xda1   :  { %v2143_v60 = vpop.permute.xlu0 %2142  ;;  %v2137_v61 = vpop.permute.xlu1 %2136 }
 0xda2   :  { %v2160_v4 = vsel %vm119_vm3, 0.0, %v2137_v61  ;;  %v2163_v5 = vsel %vm119_vm3, 0.0, %v2143_v60 }
 0xda3   :  { %v2168_v51 = vmul.f32 %v9138_v28, %v2160_v4  ;;  %v2171_v1 = vmul.f32 %v9138_v28, %v2163_v5 }
 0xda5   :  { %v2139_v62 = vpop.permute.xlu0 %2138  ;;  %v2149_v63 = vpop.permute.xlu1 %2148  ;;  %v2224_v29 = vadd.f32 %v2168_v51, %v9204_v21  ;;  %v2227_v32 = vadd.f32 %v9206_v22, %v2171_v1  ;;  %v2226_v21 = vadd.f32 %v9201_v20, %v2170_v17 }
 0xda6   :  { %v2161_v52 = vsel %vm119_vm3, 0.0, %v2139_v62 }
 0xda7   :  { %v2169_v18 = vmul.f32 %v9138_v28, %v2161_v52 }
 0xda9   :  { %v2151_v0 = vpop.permute.xlu0 %2150  ;;  %v2145_v2 = vpop.permute.xlu1 %2144  ;;  %v2225_v38 = vadd.f32 %v2169_v18, %v9208_v24 }
 0xdaa   :  { %v2164_v15 = vsel %vm119_vm3, 0.0, %v2145_v2 }
 0xdab   :  { %v2172_v25 = vmul.f32 %v9138_v28, %v2164_v15 }
 0xdad   :  { %v2147_v7 = vpop.permute.xlu0 %2146  ;;  %v2228_v44 = vadd.f32 %v2172_v25, %v9212_v48 }
 0xdae   :  { %v2165_v41 = vsel %vm119_vm3, 0.0, %v2147_v7 }
 0xdaf   :  { %v2173_v60 = vmul.f32 %v9138_v28, %v2165_v41 }
 0xdb1   :  { %v2229_v48 = vadd.f32 %v2173_v60, %v9216_v27 }
 0xdbd   :  { %v2189_v14 = vpop.permute.xlu1 %2188 }
 0xdbe   :  { %v2210_v16 = vsel %vm1772_vm15, %v2189_v14, 0.0 }
 0xdbf   :  { %v2218_v53 = vmul.f32 %v9146_v37, %v2210_v16 }
 0xdc1   :  { %v2185_v46 = vpop.permute.xlu1 %2184  ;;  %v2191_v31 = vpop.permute.xlu0 %2190  ;;  %v2234_v13 = vadd.f32 %v2226_v21, %v2218_v53 }
 0xdc2   :  { %v2208_v10 = vsel %vm1772_vm15, %v2185_v46, 0.0  ;;  %v2211_v11 = vsel %vm1772_vm15, %v2191_v31, 0.0 }
 0xdc3   :  { %v2216_v33 = vmul.f32 %v9146_v37, %v2208_v10  ;;  %v2219_v12 = vmul.f32 %v9146_v37, %v2211_v11  ;;  %v2290_v45 = vadd.f32 %v2261_v56, %v2234_v13 }
 0xdc5   :  { %v2232_v34 = vadd.f32 %v2224_v29, %v2216_v33  ;;  %v2235_v23 = vadd.f32 %v2227_v32, %v2219_v12  ;;  %v2197_v19 = vpop.permute.xlu1 %2196  ;;  %v2187_v22 = vpop.permute.xlu0 %2186  ;;  %v8490_v12 = vld [vmem:[#allocation2 + $0x168] sm:$0xff]  }
 0xdc6   :  { %v2209_v36 = vsel %vm1772_vm15, %v2187_v22, 0.0  ;;  %v2214_v56 = vsel %vm1772_vm15, %v2197_v19, 0.0 }
 0xdc7   :  { %v2288_v39 = vadd.f32 %v2251_v55, %v2232_v34  ;;  %v2217_v40 = vmul.f32 %v9146_v37, %v2209_v36  ;;  %v2291_v42 = vadd.f32 %v2266_v57, %v2235_v23  ;;  %v2166_v55 = vsel %vm119_vm3, 0.0, %v2149_v63 }
 0xdc8   :  { %v2174_v5 = vmul.f32 %v9138_v28, %v2166_v55  ;;  %v2222_v63 = vmul.f32 %v9146_v37, %v2214_v56 }
 0xdc9   :  { %v2233_v43 = vadd.f32 %v2225_v38, %v2217_v40  ;;  %v2193_v47 = vpop.permute.xlu1 %2192  ;;  %v2199_v20 = vpop.permute.xlu0 %2198  ;;  %8659 = vtanh.f32 %v2288_v39 }
 0xdca   :  { %v2212_v50 = vsel %vm1772_vm15, %v2193_v47, 0.0  ;;  %8661 = vtanh.f32 %v2291_v42  ;;  %v2215_v7 = vsel %vm1772_vm15, %v2199_v20, 0.0  ;;  %v2230_v27 = vadd.f32 %v9210_v26, %v2174_v5  ;;  %v8492_v5 = vld [vmem:[#allocation2 + $0x178] sm:$0xff]  }
 0xdcb   :  { %v2289_v61 = vadd.f32 %v2256_v49, %v2233_v43  ;;  %v2220_v24 = vmul.f32 %v9146_v37, %v2212_v50  ;;  %v2167_v49 = vsel %vm119_vm3, 0.0, %v2151_v0  ;;  %v2223_v16 = vmul.f32 %v9146_v37, %v2215_v7  ;;  %v8497_v7 = vld [vmem:[#allocation2 + $0x1a0] sm:$0xff]  }
 0xdcc   :  { %v2175_v14 = vmul.f32 %v9138_v28, %v2167_v49  ;;  %v2238_v17 = vadd.f32 %v2230_v27, %v2222_v63  ;;  %v8493_v49 = vld [vmem:[#allocation2 + $0x180] sm:$0xff]   ;;  %v8496_v63 = vld [vmem:[#allocation2 + $0x198] sm:$0xff]  }
 0xdcd   :  { %8663 = vtanh.f32 %v2289_v61  ;;  %v2236_v62 = vadd.f32 %v2228_v44, %v2220_v24  ;;  %v2195_v57 = vpop.permute.xlu0 %2194  ;;  %v8500_v27 = vld [vmem:[#allocation2 + $0x1b8] sm:$0xff]  }
 0xdce   :  { %8665 = vtanh.f32 %v2290_v45  ;;  %v2213_v2 = vsel %vm1772_vm15, %v2195_v57, 0.0  ;;  %v2231_v0 = vadd.f32 %v9214_v8, %v2175_v14  ;;  %v8498_v14 = vld [vmem:[#allocation2 + $0x1a8] sm:$0xff]  }
 0xdcf   :  { %v2221_v4 = vmul.f32 %v9146_v37, %v2213_v2  ;;  %v2292_v6 = vadd.f32 %v9230_v58, %v2236_v62 }
 0xdd0   :  { %v2239_v31 = vadd.f32 %v2231_v0, %v2223_v16  ;;  %v8501_v16 = vld [vmem:[#allocation2 + $0x1c0] sm:$0xff]   ;;  %v8504_v0 = vld [vmem:[#allocation2 + $0x1d8] sm:$0xff]  }
 0xdd1   :  { %v2237_v51 = vadd.f32 %v2229_v48, %v2221_v4  ;;  %8667 = vtanh.f32 %v2292_v6  ;;  %v8491_v4 = vld [vmem:[#allocation2 + $0x170] sm:$0xff]   ;;  %v8494_v6 = vld [vmem:[#allocation2 + $0x188] sm:$0xff]  }
 0xdd3   :  { %v2293_v1 = vadd.f32 %v9232_v59, %v2237_v51  ;;  %v8495_v51 = vld [vmem:[#allocation2 + $0x190] sm:$0xff]  }
 0xdd5   :  { %8669 = vtanh.f32 %v2293_v1  ;;  %v8499_v1 = vld [vmem:[#allocation2 + $0x1b0] sm:$0xff]  }
 0xdd6   :  { %v2281_v52 = vpop.permute.xlu1 %2280  ;;  %v8660_v58 = vpop.eup %8659 }
 0xdd7   :  { %v2294_v29 = vadd.f32 %v2281_v52, %v2238_v17  ;;  %v8662_v46 = vpop.eup %8661  ;;  %v8502_v17 = vld [vmem:[#allocation2 + $0x1c8] sm:$0xff]   ;;  %v8503_v52 = vld [vmem:[#allocation2 + $0x1d0] sm:$0xff]  }
 0xdd9   :  { %8671 = vtanh.f32 %v2294_v29  ;;  %v8506_v29 = vld [vmem:[#allocation2 + $0x1e8] sm:$0xff]  }
 0xdda   :  { %v8664_v32 = vpop.eup %8663  ;;  %v2286_v53 = vpop.permute.xlu0 %2285 }
 0xddb   :  { %v8666_v28 = vpop.eup %8665  ;;  %v2295_v10 = vadd.f32 %v2286_v53, %v2239_v31  ;;  %v9276_v59 = vpack.c.bf16 %v8664_v32, %v8660_v58  ;;  %v8505_v58 = vld [vmem:[#allocation2 + $0x1e0] sm:$0xff]   ;;  %v8508_v31 = vld [vmem:[#allocation2 + $0x1f8] sm:$0xff]   ;;  %v8510_v53 = vld [vmem:[#allocation2 + $0x208] sm:$0xff]  }
 0xddc   :  { %v9278_v26 = vpack.c.bf16 %v8662_v46, %v8666_v28  ;;  %v8507_v46 = vld [vmem:[#allocation2 + $0x1f0] sm:$0xff]   ;;  %v8509_v32 = vld [vmem:[#allocation2 + $0x200] sm:$0xff]  }
 0xddd   :  { %10137 = vst [vmem:[#allocation12_spill] sm:$0xff] %v9276_v59  ;;  %8673 = vtanh.f32 %v2295_v10  ;;  %7955 = vmatprep.mubr.msk.bf16.mxu0 %vm2315_vm4, %v9276_v59  ;;  %7965 = vmatprep.mubr.msk.bf16.mxu1 %vm2315_vm4, %v9276_v59  ;;  %v8511_v28 = vld [vmem:[#allocation2 + $0x210] sm:$0xff]   ;;  %v8512_v10 = vld [vmem:[#allocation2 + $0x218] sm:$0xff]  }
 0xdde   :  { %10138 = vst [vmem:[#allocation13_spill] sm:$0xff] %v9278_v26  ;;  %7956 = vmatmul.mubr.msk.bf16.vlgmr.msra.gmra.mxu0 %vm2315_vm4, %v9278_v26  ;;  %7966 = vmatmul.mubr.msk.bf16.vlgmr.msra.gmra.mxu1 %vm2315_vm4, %v9278_v26  ;;  %v8668_v37 = vpop.eup %8667 }
 0xde2   :  { %v8670_v8 = vpop.eup %8669 }
 0xde3   :  { %v9288_v11 = vpack.c.bf16 %v8670_v8, %v8668_v37  ;;  %v8513_v37 = vld [vmem:[#allocation2 + $0x220] sm:$0xff]  }
 0xde5   :  { %7959 = vmatprep.mubr.msk.bf16.mxu0 %vm2315_vm4, %v9288_v11  ;;  %7969 = vmatprep.mubr.msk.bf16.mxu1 %vm2315_vm4, %v9288_v11 }
 0xde6   :  { %v8672_v18 = vpop.eup %8671 }
 0xdea   :  { %v8674_v15 = vpop.eup %8673 }
 0xdeb   :  { %v9294_v33 = vpack.c.bf16 %v8674_v15, %v8672_v18 }
 0xded   :  { %7960 = vmatmul.mubr.msk.bf16.gmra.mxu0 %vm2315_vm4, %v9294_v33  ;;  %7970 = vmatmul.mubr.msk.bf16.gmra.mxu1 %vm2315_vm4, %v9294_v33 }
 0xdee   :  { %7981 = vmatprep.mubr.msk.bf16.mxu0 %vm1962_vm14, %v8490_v12 }
 0xe9e   :  { %v7957_v21 = vpop.f32.mrf.mxu0  ;;  %v7967_v34 = vpop.f32.mrf.mxu1 }
 0xe9f   :  { %v2474_v62 = vmax.f32 %v7957_v21, %v7967_v34 }
 0xea0   :  { %v2366_v23 = vpop.f32.mrf.mxu0  ;;  %v2441_v19 = vpop.f32.mrf.mxu1 }
 0xea1   :  { %v2472_v48 = vmax.f32 %v2366_v23, %v2441_v19 }
 0xea2   :  { %v7958_v22 = vpop.f32.mrf.mxu0  ;;  %v7968_v25 = vpop.f32.mrf.mxu1 }
 0xea3   :  { %v2475_v24 = vmax.f32 %v7958_v22, %v7968_v25 }
 0xea4   :  { %v2369_v13 = vpop.f32.mrf.mxu0  ;;  %v2444_v36 = vpop.f32.mrf.mxu1 }
 0xea5   :  { %v2529_v57 = vpack.c.bf16 %v2475_v24, %v2474_v62  ;;  %v2473_v2 = vmax.f32 %v2369_v13, %v2444_v36 }
 0xea7   :  { %v2528_v56 = vpack.c.bf16 %v2473_v2, %v2472_v48 }
 0xead   :  { %v7961_v38 = vpop.f32.mrf.mxu0  ;;  %v7971_v39 = vpop.f32.mrf.mxu1 }
 0xeae   :  { %v2478_v47 = vmax.f32 %v7961_v38, %v7971_v39 }
 0xeaf   :  { %v2382_v40 = vpop.f32.mrf.mxu0  ;;  %v2457_v41 = vpop.f32.mrf.mxu1 }
 0xeb0   :  { %v2476_v50 = vmax.f32 %v2382_v40, %v2457_v41 }
 0xeb1   :  { %v7962_v42 = vpop.f32.mrf.mxu0  ;;  %v7972_v43 = vpop.f32.mrf.mxu1 }
 0xeb2   :  { %v2479_v20 = vmax.f32 %v7962_v42, %v7972_v43 }
 0xeb3   :  { %v2385_v44 = vpop.f32.mrf.mxu0  ;;  %v2460_v45 = vpop.f32.mrf.mxu1 }
 0xeb4   :  { %v2531_v60 = vpack.c.bf16 %v2479_v20, %v2478_v47  ;;  %v2477_v61 = vmax.f32 %v2385_v44, %v2460_v45 }
 0xeb6   :  { %v2530_v55 = vpack.c.bf16 %v2477_v61, %v2476_v50  ;;  %7973 = vmatprep.subr.bf16.mxu0 %v2531_v60 }
 0xeb7   :  { %7974 = vmatpush3.bf16.msra.mxu0 %v2531_v60 }
 0xeb8   :  { %7975 = vmatprep.subr.bf16.mxu0 %v2530_v55 }
 0xebb   :  { %7976 = vmatpush3.bf16.msra.mxu0 %v2530_v55 }
 0xebc   :  { %7977 = vmatprep.subr.bf16.mxu0 %v2529_v57 }
 0xebf   :  { %7978 = vmatpush3.bf16.msra.mxu0 %v2529_v57 }
 0xec0   :  { %7979 = vmatprep.subr.bf16.mxu0 %v2528_v56 }
 0xec3   :  { %7980 = vmatpush3.bf16.msra.mxu0 %v2528_v56 }
 0xec6   :  { %7982 = vmatmul.mubr.msk.bf16.vlgmr.msra.gmra.mxu0 %vm1962_vm14, %v8491_v4 }
 0xec7   :  { %7985 = vmatprep.mubr.msk.bf16.mxu0 %vm1962_vm14, %v8492_v5 }
 0xece   :  { %7986 = vmatmul.mubr.msk.bf16.gmra.mxu0 %vm1962_vm14, %v8493_v49 }
 0xecf   :  { %7989 = vmatprep.mubr.msk.bf16.mxu0 %vm1962_vm14, %v8494_v6 }
 0xed6   :  { %7990 = vmatmul.mubr.msk.bf16.gmra.mxu0 %vm1962_vm14, %v8495_v51 }
 0xed7   :  { %7993 = vmatprep.mubr.msk.bf16.mxu0 %vm1962_vm14, %v8496_v63 }
 0xede   :  { %7994 = vmatmul.mubr.msk.bf16.gmra.mxu0 %vm1962_vm14, %v8497_v7 }
 0xedf   :  { %7997 = vmatprep.mubr.msk.bf16.mxu0 %vm1962_vm14, %v8498_v14 }
 0xee6   :  { %7998 = vmatmul.mubr.msk.bf16.gmra.mxu0 %vm1962_vm14, %v8499_v1 }
 0xee7   :  { %8001 = vmatprep.mubr.msk.bf16.mxu0 %vm1962_vm14, %v8500_v27 }
 0xeee   :  { %8002 = vmatmul.mubr.msk.bf16.gmra.mxu0 %vm1962_vm14, %v8501_v16 }
 0xeef   :  { %8005 = vmatprep.mubr.msk.bf16.mxu0 %vm1962_vm14, %v8502_v17 }
 0xef6   :  { %8006 = vmatmul.mubr.msk.bf16.gmra.mxu0 %vm1962_vm14, %v8503_v52 }
 0xef7   :  { %8009 = vmatprep.mubr.msk.bf16.mxu0 %vm1962_vm14, %v8504_v0 }
 0xefe   :  { %8010 = vmatmul.mubr.msk.bf16.gmra.mxu0 %vm1962_vm14, %v8505_v58 }
 0xeff   :  { %8013 = vmatprep.mubr.msk.bf16.mxu0 %vm1962_vm14, %v8506_v29 }
 0xf06   :  { %8014 = vmatmul.mubr.msk.bf16.gmra.mxu0 %vm1962_vm14, %v8507_v46  ;;  %v3186_v46 = vld [vmem:[#allocation4 + $0x100] sm:$0xff] }
 0xf07   :  { %8017 = vmatprep.mubr.msk.bf16.mxu0 %vm1962_vm14, %v8508_v31  ;;  %v3187_v31 = vld [vmem:[#allocation4 + $0x108] sm:$0xff] }
 0xf0e   :  { %8018 = vmatmul.mubr.msk.bf16.gmra.mxu0 %vm1962_vm14, %v8509_v32  ;;  %v3184_v32 = vld [vmem:[#allocation4 + $0xf0] sm:$0xff] }
 0xf0f   :  { %8021 = vmatprep.mubr.msk.bf16.mxu0 %vm1962_vm14, %v8510_v53  ;;  %v3975_v53 = vld [vmem:[#allocation4 + $0x1e0] sm:$0xff] }
 0xf16   :  { %8022 = vmatmul.mubr.msk.bf16.gmra.mxu0 %vm1962_vm14, %v8511_v28  ;;  %v3185_v28 = vld [vmem:[#allocation4 + $0xf8] sm:$0xff] }
 0xf17   :  { %8025 = vmatprep.mubr.msk.bf16.mxu0 %vm1962_vm14, %v8512_v10  ;;  %v9400_v10 = vpop.permute.xlu1 %3272 }
 0xf1e   :  { %8026 = vmatmul.mubr.msk.bf16.gmra.mxu0 %vm1962_vm14, %v8513_v37  ;;  %v3973_v37 = vld [vmem:[#allocation4 + $0x1d0] sm:$0xff] }
 0xf86   :  { %v9324_v8 = vpop.f32.mrf.mxu0 }
 0xf88   :  { %v9326_v18 = vpop.f32.mrf.mxu0 }
 0xf8a   :  { %v9328_v15 = vpop.f32.mrf.mxu0 }
 0xf8c   :  { %v9330_v12 = vpop.f32.mrf.mxu0 }
 0xf8e   :  { %v7987_v21 = vpop.f32.mrf.mxu0 }
 0xf8f   :  { %2977 = vrot.lane.b32.xlu1 %v7987_v21, %s8860_s0  ;;  %v3971_v21 = vld [vmem:[#allocation4 + $0x1c0] sm:$0xff] }
 0xf90   :  { %v2774_v34 = vpop.f32.mrf.mxu0 }
 0xf92   :  { %v7988_v23 = vpop.f32.mrf.mxu0 }
 0xf93   :  { %2973 = vrot.lane.b32.xlu1 %v2774_v34, %s8860_s0  ;;  %2979 = vrot.lane.b32.xlu0 %v7988_v23, %s8860_s0  ;;  %v3969_v23 = vld [vmem:[#allocation4 + $0x1b0] sm:$0xff] }
 0xf94   :  { %v2777_v19 = vpop.f32.mrf.mxu0 }
 0xf96   :  { %v7991_v22 = vpop.f32.mrf.mxu0 }
 0xf97   :  { %2975 = vrot.lane.b32.xlu0 %v2777_v19, %s8860_s0  ;;  %2985 = vrot.lane.b32.xlu1 %v7991_v22, %s8860_s0  ;;  %v3972_v19 = vld [vmem:[#allocation4 + $0x1c8] sm:$0xff] }
 0xf98   :  { %v2790_v25 = vpop.f32.mrf.mxu0 }
 0xf9a   :  { %v7992_v13 = vpop.f32.mrf.mxu0 }
 0xf9b   :  { %2981 = vrot.lane.b32.xlu1 %v2790_v25, %s8860_s0  ;;  %2987 = vrot.lane.b32.xlu0 %v7992_v13, %s8860_s0  ;;  %v3967_v25 = vld [vmem:[#allocation4 + $0x1a0] sm:$0xff]  ;;  %v3970_v13 = vld [vmem:[#allocation4 + $0x1b8] sm:$0xff] }
 0xf9c   :  { %v2793_v36 = vpop.f32.mrf.mxu0 }
 0xf9e   :  { %v7995_v38 = vpop.f32.mrf.mxu0 }
 0xf9f   :  { %2983 = vrot.lane.b32.xlu0 %v2793_v36, %s8860_s0  ;;  %2993 = vrot.lane.b32.xlu1 %v7995_v38, %s8860_s0 }
 0xfa0   :  { %v2806_v39 = vpop.f32.mrf.mxu0 }
 0xfa2   :  { %v7996_v40 = vpop.f32.mrf.mxu0 }
 0xfa3   :  { %2989 = vrot.lane.b32.xlu1 %v2806_v39, %s8860_s0  ;;  %2995 = vrot.lane.b32.xlu0 %v7996_v40, %s8860_s0  ;;  %v8514_v39 = vld [vmem:[#allocation2 + $0x228] sm:$0xff]   ;;  %v3965_v40 = vld [vmem:[#allocation4 + $0x190] sm:$0xff] }
 0xfa4   :  { %v2809_v41 = vpop.f32.mrf.mxu0  ;;  %8045 = vmatprep.mubr.bf16.mxu1 %v8514_v39 }
 0xfa6   :  { %v9343_v42 = vpop.f32.mrf.mxu0 }
 0xfa7   :  { %2991 = vrot.lane.b32.xlu0 %v2809_v41, %s8860_s0  ;;  %v3968_v41 = vld [vmem:[#allocation4 + $0x1a8] sm:$0xff] }
 0xfa8   :  { %v9346_v43 = vpop.f32.mrf.mxu0 }
 0xfaa   :  { %v9348_v47 = vpop.f32.mrf.mxu0 }
 0xfac   :  { %v9350_v20 = vpop.f32.mrf.mxu0 }
 0xfae   :  { %v9352_v44 = vpop.f32.mrf.mxu0 }
 0xfb0   :  { %v9354_v45 = vpop.f32.mrf.mxu0 }
 0xfb2   :  { %v9356_v50 = vpop.f32.mrf.mxu0 }
 0xfb4   :  { %v9358_v60 = vpop.f32.mrf.mxu0 }
 0xfb6   :  { %v9360_v61 = vpop.f32.mrf.mxu0 }
 0xfb8   :  { %v9362_v24 = vpop.f32.mrf.mxu0 }
 0xfba   :  { %v9364_v55 = vpop.f32.mrf.mxu0 }
 0xfbc   :  { %v9366_v62 = vpop.f32.mrf.mxu0 }
 0xfbe   :  { %v9368_v57 = vpop.f32.mrf.mxu0 }
 0xfc0   :  { %v9370_v2 = vpop.f32.mrf.mxu0 }
 0xfc2   :  { %v9372_v48 = vpop.f32.mrf.mxu0 }
 0xfc4   :  { %v9374_v56 = vpop.f32.mrf.mxu0 }
 0xfc6   :  { %v8015_v4 = vpop.f32.mrf.mxu0 }
 0xfc8   :  { %v2886_v5 = vpop.f32.mrf.mxu0 }
 0xfca   :  { %v8016_v49 = vpop.f32.mrf.mxu0 }
 0xfcc   :  { %v2889_v6 = vpop.f32.mrf.mxu0 }
 0xfce   :  { %v8019_v51 = vpop.f32.mrf.mxu0 }
 0xfcf   :  { %3078 = vrot.lane.b32.xlu1 %v8019_v51, %s8861_s2 }
 0xfd0   :  { %v2902_v63 = vpop.f32.mrf.mxu0 }
 0xfd2   :  { %v8020_v7 = vpop.f32.mrf.mxu0 }
 0xfd3   :  { %3074 = vrot.lane.b32.xlu1 %v2902_v63, %s8861_s2  ;;  %3080 = vrot.lane.b32.xlu0 %v8020_v7, %s8861_s2 }
 0xfd4   :  { %v2905_v14 = vpop.f32.mrf.mxu0 }
 0xfd6   :  { %v8023_v1 = vpop.f32.mrf.mxu0 }
 0xfd7   :  { %3076 = vrot.lane.b32.xlu0 %v2905_v14, %s8861_s2  ;;  %3086 = vrot.lane.b32.xlu1 %v8023_v1, %s8861_s2 }
 0xfd8   :  { %v2918_v27 = vpop.f32.mrf.mxu0 }
 0xfda   :  { %v8024_v16 = vpop.f32.mrf.mxu0 }
 0xfdb   :  { %3082 = vrot.lane.b32.xlu1 %v2918_v27, %s8861_s2  ;;  %3088 = vrot.lane.b32.xlu0 %v8024_v16, %s8861_s2 }
 0xfdc   :  { %v2921_v17 = vpop.f32.mrf.mxu0 }
 0xfde   :  { %v8027_v52 = vpop.f32.mrf.mxu0 }
 0xfdf   :  { %3084 = vrot.lane.b32.xlu0 %v2921_v17, %s8861_s2  ;;  %3094 = vrot.lane.b32.xlu1 %v8027_v52, %s8861_s2 }
 0xfe0   :  { %v2934_v0 = vpop.f32.mrf.mxu0 }
 0xfe2   :  { %v8028_v58 = vpop.f32.mrf.mxu0 }
 0xfe3   :  { %3090 = vrot.lane.b32.xlu1 %v2934_v0, %s8861_s2  ;;  %3096 = vrot.lane.b32.xlu0 %v8028_v58, %s8861_s2 }
 0xfe4   :  { %v2937_v29 = vpop.f32.mrf.mxu0 }
 0xfe7   :  { %2969 = vrot.lane.b32.xlu1 %v9324_v8, %s8860_s0  ;;  %3092 = vrot.lane.b32.xlu0 %v2937_v29, %s8861_s2  ;;  %v3976_v8 = vld [vmem:[#allocation4 + $0x1e8] sm:$0xff] }
 0xfeb   :  { %3070 = vrot.lane.b32.xlu1 %v8015_v4, %s8861_s2  ;;  %2971 = vrot.lane.b32.xlu0 %v9328_v15, %s8860_s0  ;;  %v9402_v15 = vpop.permute.xlu0 %3277 }
 0xfef   :  { %3212 = vperm.xlu1 %8420, %v3186_v46   ;;  %3072 = vrot.lane.b32.xlu0 %v8016_v49, %s8861_s2  ;;  %v9406_v34 = vpop.permute.xlu0 %3267 }
 0xff3   :  { %2965 = vrot.lane.b32.xlu1 %v9326_v18, %s8860_s0  ;;  %3217 = vperm.xlu0 %8421, %v3187_v31   ;;  %v9404_v18 = vpop.permute.xlu1 %3262  ;;  %v9410_v36 = vpop.permute.xlu0 %3257 }
 0xff7   :  { %3066 = vrot.lane.b32.xlu1 %v2886_v5, %s8861_s2  ;;  %2967 = vrot.lane.b32.xlu0 %v9330_v12, %s8860_s0  ;;  %v3974_v12 = vld [vmem:[#allocation4 + $0x1d8] sm:$0xff]  ;;  %v9408_v22 = vpop.permute.xlu1 %3252  ;;  %v9414_v4 = vpop.permute.xlu0 %3247 }
 0xff8   :  { %v3966_v5 = vld [vmem:[#allocation4 + $0x198] sm:$0xff] }
 0xffb   :  { %3202 = vperm.xlu1 %8420, %v3184_v32   ;;  %3068 = vrot.lane.b32.xlu0 %v2889_v6, %s8861_s2  ;;  %v9412_v38 = vpop.permute.xlu1 %3242  ;;  %v9418_v6 = vpop.permute.xlu0 %3237 }
 0xfff   :  { %4049 = vperm.xlu1 %8420, %v3975_v53   ;;  %3207 = vperm.xlu0 %8421, %v3185_v28   ;;  %v9416_v49 = vpop.permute.xlu1 %3232  ;;  %v9422_v63 = vpop.permute.xlu0 %3227 }
0x1003   :  { %4039 = vperm.xlu1 %8420, %v3973_v37   ;;  %4054 = vperm.xlu0 %8421, %v3976_v8   ;;  %v9420_v51 = vpop.permute.xlu1 %3222 }
0x1005   :  { %v2980_v14 = vpop.permute.xlu0 %2979 }
0x1006   :  { %v3020_v39 = vsel %vm119_vm3, 0.0, %v2980_v14 }
0x1007   :  { %4029 = vperm.xlu1 %8420, %v3971_v21   ;;  %4044 = vperm.xlu0 %8421, %v3974_v12   ;;  %v2978_v7 = vpop.permute.xlu1 %2977 }
0x1009   :  { %v2976_v27 = vpop.permute.xlu0 %2975 }
0x100b   :  { %4019 = vperm.xlu1 %8420, %v3969_v23   ;;  %4034 = vperm.xlu0 %8421, %v3972_v19   ;;  %v9424_v1 = vpop.permute.xlu1 %2973  ;;  %v9433_v19 = vld [vmem:[#allocation4 + $0x3a0] ss:$0 sm:$0xff] }
0x100d   :  { %v2988_v17 = vpop.permute.xlu0 %2987 }
0x100e   :  { %v3024_v30 = vsel %vm119_vm3, 0.0, %v2988_v17 }
0x100f   :  { %4009 = vperm.xlu1 %8420, %v3967_v25   ;;  %4024 = vperm.xlu0 %8421, %v3970_v13   ;;  %v2986_v16 = vpop.permute.xlu1 %2985  ;;  %v3019_v25 = vsel %vm119_vm3, 0.0, %v2978_v7 }
0x1011   :  { %v2984_v0 = vpop.permute.xlu0 %2983 }
0x1012   :  { %v3022_v14 = vsel %vm119_vm3, 0.0, %v2984_v0  ;;  %v3045_v0 = vmul.f32 %v9433_v19, %v3024_v30 }
0x1013   :  { %3999 = vperm.xlu1 %8420, %v3965_v40   ;;  %4014 = vperm.xlu0 %8421, %v3968_v41   ;;  %v2982_v52 = vpop.permute.xlu1 %2981  ;;  %v3043_v59 = vmul.f32 %v9433_v19, %v3022_v14 }
0x1015   :  { %v2996_v29 = vpop.permute.xlu0 %2995 }
0x1016   :  { %v3028_v41 = vsel %vm119_vm3, 0.0, %v2996_v29 }
0x1017   :  { %4004 = vperm.xlu0 %8421, %v3966_v5   ;;  %v2994_v58 = vpop.permute.xlu1 %2993  ;;  %v9441_v5 = vmul.f32 %v9433_v19, %v3019_v25  ;;  %v3018_v25 = vsel %vm119_vm3, 0.0, %v2976_v27 }
0x1018   :  { %v3027_v21 = vsel %vm119_vm3, 0.0, %v2994_v58  ;;  %v3023_v58 = vsel %vm119_vm3, 0.0, %v2986_v16 }
0x1019   :  { %v2992_v31 = vpop.permute.xlu0 %2991  ;;  %v3048_v40 = vmul.f32 %v9433_v19, %v3027_v21  ;;  %v3049_v21 = vmul.f32 %v9433_v19, %v3028_v41  ;;  %v3044_v3 = vmul.f32 %v9433_v19, %v3023_v58 }
0x101a   :  { %v3026_v41 = vsel %vm119_vm3, 0.0, %v2992_v31 }
0x101b   :  { %v2990_v46 = vpop.permute.xlu1 %2989  ;;  %v3166_v16 = vadd.f32 %v9368_v57, %v3048_v40  ;;  %v3047_v30 = vmul.f32 %v9433_v19, %v3026_v41 }
0x101c   :  { %v3025_v13 = vsel %vm119_vm3, 0.0, %v2990_v46  ;;  %v3041_v46 = vmul.f32 %v9433_v19, %v3020_v39  ;;  %v3021_v39 = vsel %vm119_vm3, 0.0, %v2982_v52 }
0x101d   :  { %v3046_v54 = vmul.f32 %v9433_v19, %v3025_v13 }
0x1041   :  { %v9426_v32 = vpop.permute.xlu1 %3078 }
0x1045   :  { %v9428_v53 = vpop.permute.xlu1 %3074  ;;  %v3081_v28 = vpop.permute.xlu0 %3080 }
0x1049   :  { %v3087_v37 = vpop.permute.xlu1 %3086  ;;  %v9430_v8 = vpop.permute.xlu0 %3076 }
0x104a   :  { %v3125_v27 = vsel %vm3114_vm2, %v3087_v37, 0.0  ;;  %v3042_v37 = vmul.f32 %v9433_v19, %v3021_v39 }
0x104d   :  { %v3083_v12 = vpop.permute.xlu1 %3082  ;;  %v3089_v23 = vpop.permute.xlu0 %3088 }
0x104e   :  { %v3126_v17 = vsel %vm3114_vm2, %v3089_v23, 0.0  ;;  %v3167_v23 = vadd.f32 %v9372_v48, %v3049_v21  ;;  %v3163_v48 = vadd.f32 %v9364_v55, %v3045_v0  ;;  %v3146_v21 = vmul.f32 %v9449_v9, %v3125_v27 }
0x104f   :  { %v3122_v55 = vsel %vm3114_vm2, %v3081_v28, 0.0 }
0x1051   :  { %v3095_v35 = vpop.permute.xlu1 %3094  ;;  %v3085_v7 = vpop.permute.xlu0 %3084 }
0x1052   :  { %v3129_v29 = vsel %vm3114_vm2, %v3095_v35, 0.0  ;;  %v3164_v35 = vadd.f32 %v3046_v54, %v9370_v2  ;;  %v3124_v31 = vsel %vm3114_vm2, %v3085_v7, 0.0  ;;  %v3162_v2 = vadd.f32 %v9360_v61, %v3044_v3 }
0x1053   :  { %v3150_v13 = vmul.f32 %v9449_v9, %v3129_v29  ;;  %v3147_v29 = vmul.f32 %v9449_v9, %v3126_v17  ;;  %v3161_v7 = vadd.f32 %v3043_v59, %v9366_v62  ;;  %v3165_v61 = vadd.f32 %v3047_v30, %v9374_v56 }
0x1054   :  { %v3017_v62 = vsel %vm119_vm3, 0.0, %v9424_v1 }
0x1055   :  { %v3182_v26 = vadd.f32 %v3166_v16, %v3150_v13  ;;  %v3091_v57 = vpop.permute.xlu1 %3090  ;;  %v3097_v40 = vpop.permute.xlu0 %3096  ;;  %v3123_v16 = vsel %vm3114_vm2, %v3083_v12, 0.0 }
0x1056   :  { %v3127_v58 = vsel %vm3114_vm2, %v3091_v57, 0.0  ;;  %v3130_v52 = vsel %vm3114_vm2, %v3097_v40, 0.0  ;;  %v3179_v40 = vadd.f32 %v3163_v48, %v3147_v29  ;;  %v3144_v0 = vmul.f32 %v9449_v9, %v3123_v16 }
0x1057   :  { %v3148_v14 = vmul.f32 %v9449_v9, %v3127_v58  ;;  %v3151_v54 = vmul.f32 %v9449_v9, %v3130_v52  ;;  %v3294_v17 = vadd.f32 %v9400_v10, %v3182_v26  ;;  %v3145_v58 = vmul.f32 %v9449_v9, %v3124_v31 }
0x1058   :  { %v3121_v26 = vsel %vm3114_vm2, %v9426_v32, 0.0  ;;  %v3178_v10 = vadd.f32 %v3162_v2, %v3146_v21  ;;  %v3291_v27 = vadd.f32 %v9410_v36, %v3179_v40  ;;  %v3039_v29 = vmul.f32 %v9433_v19, %v3018_v25 }
0x1059   :  { %v3180_v13 = vadd.f32 %v3164_v35, %v3148_v14  ;;  %v3183_v41 = vadd.f32 %v3167_v23, %v3151_v54  ;;  %v3093_v57 = vpop.permute.xlu0 %3092  ;;  %v3160_v35 = vadd.f32 %v3042_v37, %v9362_v24  ;;  %8675 = vtanh.f32 %v3294_v17  ;;  %v2970_v32 = vpop.permute.xlu1 %2969 }
0x105a   :  { %v3128_v3 = vsel %vm3114_vm2, %v3093_v57, 0.0  ;;  %v3177_v23 = vadd.f32 %v3161_v7, %v3145_v58  ;;  %v3142_v52 = vmul.f32 %v9449_v9, %v3121_v26  ;;  %v3159_v24 = vadd.f32 %v9356_v50, %v3041_v46 }
0x105b   :  { %v3295_v39 = vadd.f32 %v9402_v15, %v3183_v41  ;;  %v3149_v12 = vmul.f32 %v9449_v9, %v3128_v3  ;;  %v3292_v59 = vadd.f32 %v9404_v18, %v3180_v13  ;;  %v3143_v15 = vmul.f32 %v9449_v9, %v3122_v55 }
0x105c   :  { %v3120_v18 = vsel %vm3114_vm2, %v9430_v8, 0.0  ;;  %v3290_v30 = vadd.f32 %v9408_v22, %v3178_v10  ;;  %v3176_v31 = vadd.f32 %v3160_v35, %v3144_v0  ;;  %v3158_v36 = vadd.f32 %v9352_v44, %v9441_v5 }
0x105d   :  { %v3181_v56 = vadd.f32 %v3165_v61, %v3149_v12  ;;  %v2972_v28 = vpop.permute.xlu0 %2971  ;;  %8677 = vtanh.f32 %v3295_v39  ;;  %v3038_v14 = vmul.f32 %v9433_v19, %v3017_v62  ;;  %v3119_v25 = vsel %vm3114_vm2, %v9428_v53, 0.0  ;;  %v3071_v5 = vpop.permute.xlu1 %3070 }
0x105e   :  { %8679 = vtanh.f32 %v3292_v59  ;;  %v3175_v54 = vadd.f32 %v3159_v24, %v3143_v15  ;;  %v3141_v8 = vmul.f32 %v9449_v9, %v3120_v18  ;;  %v3157_v50 = vadd.f32 %v3039_v29, %v9358_v60 }
0x105f   :  { %v3293_v1 = vadd.f32 %v9406_v34, %v3181_v56  ;;  %v3289_v34 = vadd.f32 %v9414_v4, %v3177_v23  ;;  %v3174_v22 = vadd.f32 %v3158_v36, %v3142_v52  ;;  %v3140_v2 = vmul.f32 %v9449_v9, %v3119_v25 }
0x1060   :  { %v3288_v44 = vadd.f32 %v9412_v38, %v3176_v31  ;;  %v3016_v37 = vsel %vm119_vm3, 0.0, %v2972_v28  ;;  %v3156_v53 = vadd.f32 %v3038_v14, %v9354_v45  ;;  %v3015_v48 = vsel %vm119_vm3, 0.0, %v2970_v32 }
0x1061   :  { %8681 = vtanh.f32 %v3293_v1  ;;  %v3073_v46 = vpop.permute.xlu0 %3072  ;;  %v3287_v21 = vadd.f32 %v9418_v6, %v3175_v54  ;;  %v3173_v16 = vadd.f32 %v3157_v50, %v3141_v8  ;;  %v3117_v4 = vsel %vm3114_vm2, %v3071_v5, 0.0 }
0x1062   :  { %8683 = vtanh.f32 %v3291_v27  ;;  %v3118_v60 = vsel %vm3114_vm2, %v3073_v46, 0.0  ;;  %v3037_v17 = vmul.f32 %v9433_v19, %v3016_v37  ;;  %v3286_v13 = vadd.f32 %v9416_v49, %v3174_v22 }
0x1063   :  { %8685 = vtanh.f32 %v3290_v30  ;;  %v3172_v38 = vadd.f32 %v3156_v53, %v3140_v2  ;;  %v3036_v41 = vmul.f32 %v9433_v19, %v3015_v48  ;;  %v3139_v45 = vmul.f32 %v9449_v9, %v3118_v60 }
0x1064   :  { %8687 = vtanh.f32 %v3289_v34  ;;  %v3285_v6 = vadd.f32 %v9422_v63, %v3173_v16  ;;  %v3138_v7 = vmul.f32 %v9449_v9, %v3117_v4  ;;  %v3155_v3 = vadd.f32 %v9348_v47, %v3037_v17  ;;  %v8515_v17 = vld [vmem:[#allocation2 + $0x230] sm:$0xff]  }
0x1065   :  { %8689 = vtanh.f32 %v3288_v44  ;;  %v3284_v61 = vadd.f32 %v9420_v51, %v3172_v38  ;;  %v3154_v49 = vadd.f32 %v9343_v42, %v3036_v41  ;;  %v8517_v38 = vld [vmem:[#allocation2 + $0x240] sm:$0xff]   ;;  %v8518_v41 = vld [vmem:[#allocation2 + $0x248] sm:$0xff]  }
0x1066   :  { %v8676_v57 = vpop.eup %8675  ;;  %8691 = vtanh.f32 %v3287_v21  ;;  %v3171_v12 = vadd.f32 %v3155_v3, %v3139_v45  ;;  %v8519_v45 = vld [vmem:[#allocation2 + $0x250] sm:$0xff]   ;;  %v8525_v3 = vld [vmem:[#allocation2 + $0x280] sm:$0xff]  }
0x1067   :  { %8693 = vtanh.f32 %v3286_v13  ;;  %v3170_v10 = vadd.f32 %v3154_v49, %v3138_v7  ;;  %v8516_v13 = vld [vmem:[#allocation2 + $0x238] sm:$0xff]   ;;  %v8522_v7 = vld [vmem:[#allocation2 + $0x268] sm:$0xff]   ;;  %v8527_v49 = vld [vmem:[#allocation2 + $0x290] sm:$0xff]  }
0x1068   :  { %8695 = vtanh.f32 %v3285_v6  ;;  %v8521_v6 = vld [vmem:[#allocation2 + $0x260] sm:$0xff]  }
0x1069   :  { %8697 = vtanh.f32 %v3284_v61  ;;  %v8526_v61 = vld [vmem:[#allocation2 + $0x288] sm:$0xff]  }
0x106a   :  { %v3213_v40 = vpop.permute.xlu1 %3212  ;;  %v8678_v58 = vpop.eup %8677 }
0x106b   :  { %v3367_v55 = vpack.c.bf16 %v8678_v58, %v8676_v57  ;;  %v8680_v39 = vpop.eup %8679  ;;  %v3282_v56 = vadd.f32 %v3213_v40, %v3170_v10  ;;  %v8520_v57 = vld [vmem:[#allocation2 + $0x258] sm:$0xff]   ;;  %v8523_v40 = vld [vmem:[#allocation2 + $0x270] sm:$0xff]  }
0x106c   :  { %v8524_v58 = vld [vmem:[#allocation2 + $0x278] sm:$0xff]  }
0x106d   :  { %8029 = vmatprep.subr.bf16.mxu1 %v3367_v55  ;;  %v8532_v10 = vld [vmem:[#allocation2 + $0x2b8] sm:$0xff]  }
0x106e   :  { %v8682_v26 = vpop.eup %8681  ;;  %v2966_v0 = vpop.permute.xlu1 %2965  ;;  %8030 = vmatpush3.bf16.msra.mxu1 %v3367_v55  ;;  %v8528_v55 = vld [vmem:[#allocation2 + $0x298] sm:$0xff]  }
0x106f   :  { %v3218_v63 = vpop.permute.xlu0 %3217  ;;  %v8684_v59 = vpop.eup %8683  ;;  %v3013_v62 = vsel %vm119_vm3, 0.0, %v2966_v0  ;;  %v3366_v47 = vpack.c.bf16 %v8682_v26, %v8680_v39  ;;  %v8529_v39 = vld [vmem:[#allocation2 + $0x2a0] sm:$0xff]   ;;  %v8531_v26 = vld [vmem:[#allocation2 + $0x2b0] sm:$0xff]  }
0x1070   :  { %v3283_v35 = vadd.f32 %v3218_v63, %v3171_v12  ;;  %v3034_v51 = vmul.f32 %v9433_v19, %v3013_v62  ;;  %v8686_v42 = vpop.eup %8685  ;;  %v8530_v12 = vld [vmem:[#allocation2 + $0x2a8] sm:$0xff]   ;;  %v8533_v0 = vld [vmem:[#allocation2 + $0x2c0] sm:$0xff]   ;;  %v8536_v62 = vld [vmem:[#allocation2 + $0x2d8] sm:$0xff]  }
0x1071   :  { %8031 = vmatprep.subr.bf16.mxu1 %v3366_v47  ;;  %v3365_v27 = vpack.c.bf16 %v8684_v59, %v8686_v42  ;;  %v8688_v23 = vpop.eup %8687  ;;  %v8534_v63 = vld [vmem:[#allocation2 + $0x2c8] sm:$0xff]   ;;  %v8535_v59 = vld [vmem:[#allocation2 + $0x2d0] sm:$0xff]  }
0x1072   :  { %8699 = vtanh.f32 %v3283_v35  ;;  %v3067_v28 = vpop.permute.xlu1 %3066  ;;  %8032 = vmatpush3.bf16.msra.mxu1 %v3366_v47  ;;  %v3152_v52 = vadd.f32 %v3034_v51, %v9346_v43  ;;  %v8690_v24 = vpop.eup %8689  ;;  %v8537_v35 = vld [vmem:[#allocation2 + $0x2e0] sm:$0xff]  }
0x1073   :  { %v2968_v15 = vpop.permute.xlu0 %2967  ;;  %v3115_v32 = vsel %vm3114_vm2, %v3067_v28, 0.0  ;;  %8701 = vtanh.f32 %v3282_v56  ;;  %8033 = vmatprep.subr.bf16.mxu1 %v3365_v27  ;;  %v3364_v14 = vpack.c.bf16 %v8688_v23, %v8690_v24  ;;  %v8692_v25 = vpop.eup %8691 }
0x1074   :  { %v3014_v29 = vsel %vm119_vm3, 0.0, %v2968_v15  ;;  %v3136_v18 = vmul.f32 %v9449_v9, %v3115_v32  ;;  %v8694_v43 = vpop.eup %8693 }
0x1075   :  { %v3035_v1 = vmul.f32 %v9433_v19, %v3014_v29  ;;  %v3363_v2 = vpack.c.bf16 %v8692_v25, %v8694_v43  ;;  %v8696_v44 = vpop.eup %8695 }
0x1076   :  { %v3168_v30 = vadd.f32 %v3152_v52, %v3136_v18  ;;  %v3203_v31 = vpop.permute.xlu1 %3202  ;;  %8034 = vmatpush3.bf16.msra.mxu1 %v3365_v27  ;;  %v8698_v37 = vpop.eup %8697 }
0x1077   :  { %v3069_v36 = vpop.permute.xlu0 %3068  ;;  %v3153_v8 = vadd.f32 %v3035_v1, %v9350_v20  ;;  %8035 = vmatprep.subr.bf16.mxu1 %v3364_v14  ;;  %v3362_v53 = vpack.c.bf16 %v8696_v44, %v8698_v37 }
0x1078   :  { %v3116_v54 = vsel %vm3114_vm2, %v3069_v36, 0.0  ;;  %v3280_v50 = vadd.f32 %v3203_v31, %v3168_v30 }
0x1079   :  { %v3137_v34 = vmul.f32 %v9449_v9, %v3116_v54 }
0x107a   :  { %8036 = vmatpush3.bf16.msra.mxu1 %v3364_v14  ;;  %8703 = vtanh.f32 %v3280_v50 }
0x107b   :  { %v3169_v22 = vadd.f32 %v3153_v8, %v3137_v34  ;;  %v3208_v46 = vpop.permute.xlu0 %3207  ;;  %8037 = vmatprep.subr.bf16.mxu1 %v3363_v2 }
0x107d   :  { %v3281_v5 = vadd.f32 %v3208_v46, %v3169_v22 }
0x107e   :  { %8038 = vmatpush3.bf16.msra.mxu1 %v3363_v2 }
0x107f   :  { %8705 = vtanh.f32 %v3281_v5  ;;  %v8700_v48 = vpop.eup %8699  ;;  %8039 = vmatprep.subr.bf16.mxu1 %v3362_v53 }
0x1080   :  { %v8702_v20 = vpop.eup %8701 }
0x1081   :  { %v3361_v21 = vpack.c.bf16 %v8700_v48, %v8702_v20 }
0x1082   :  { %8040 = vmatpush3.bf16.msra.mxu1 %v3362_v53 }
0x1083   :  { %8041 = vmatprep.subr.bf16.mxu1 %v3361_v21 }
0x1086   :  { %8042 = vmatpush3.bf16.msra.mxu1 %v3361_v21 }
0x1087   :  { %v8704_v16 = vpop.eup %8703 }
0x108c   :  { %v8706_v60 = vpop.eup %8705 }
0x108d   :  { %v3360_v4 = vpack.c.bf16 %v8706_v60, %v8704_v16 }
0x108f   :  { %8043 = vmatprep.subr.bf16.mxu1 %v3360_v4 }
0x1090   :  { %8044 = vmatpush3.bf16.msra.mxu1 %v3360_v4 }
0x1093   :  { %8046 = vmatmul.mubr.bf16.vlgmr.msra.gmra.mxu1 %v8515_v17 }
0x1094   :  { %8049 = vmatprep.mubr.bf16.mxu1 %v8516_v13 }
0x109b   :  { %8050 = vmatmul.mubr.bf16.gmra.mxu1 %v8517_v38 }
0x109c   :  { %8053 = vmatprep.mubr.bf16.mxu1 %v8518_v41 }
0x10a3   :  { %8054 = vmatmul.mubr.bf16.gmra.mxu1 %v8519_v45 }
0x10a4   :  { %8057 = vmatprep.mubr.bf16.mxu1 %v8520_v57 }
0x10ab   :  { %8058 = vmatmul.mubr.bf16.gmra.mxu1 %v8521_v6 }
0x10ac   :  { %8061 = vmatprep.mubr.bf16.mxu1 %v8522_v7 }
0x10b3   :  { %8062 = vmatmul.mubr.bf16.gmra.mxu1 %v8523_v40 }
0x10b4   :  { %8065 = vmatprep.mubr.bf16.mxu1 %v8524_v58 }
0x10bb   :  { %8066 = vmatmul.mubr.bf16.gmra.mxu1 %v8525_v3 }
0x10bc   :  { %8069 = vmatprep.mubr.bf16.mxu1 %v8526_v61  ;;  %v3963_v61 = vld [vmem:[#allocation4 + $0x180] sm:$0xff] }
0x10c3   :  { %8070 = vmatmul.mubr.bf16.gmra.mxu1 %v8527_v49  ;;  %v3964_v49 = vld [vmem:[#allocation4 + $0x188] sm:$0xff] }
0x10c4   :  { %8073 = vmatprep.mubr.bf16.mxu1 %v8528_v55  ;;  %v3961_v55 = vld [vmem:[#allocation4 + $0x170] sm:$0xff] }
0x10cb   :  { %8074 = vmatmul.mubr.bf16.gmra.mxu1 %v8529_v39  ;;  %v4591_v39 = vld [vmem:[#allocation4 + $0x310] sm:$0xff] }
0x10cc   :  { %8077 = vmatprep.mubr.bf16.mxu1 %v8530_v12  ;;  %v3962_v12 = vld [vmem:[#allocation4 + $0x178] sm:$0xff] }
0x10d3   :  { %8078 = vmatmul.mubr.bf16.gmra.mxu1 %v8531_v26  ;;  %v9611_v26 = vpop.permute.xlu1 %4049 }
0x10d4   :  { %8081 = vmatprep.mubr.bf16.mxu1 %v8532_v10  ;;  %v4589_v10 = vld [vmem:[#allocation4 + $0x300] sm:$0xff] }
0x10db   :  { %8082 = vmatmul.mubr.bf16.gmra.mxu1 %v8533_v0  ;;  %v4592_v0 = vld [vmem:[#allocation4 + $0x318] sm:$0xff] }
0x10dc   :  { %8085 = vmatprep.mubr.bf16.mxu1 %v8534_v63  ;;  %v9613_v63 = vpop.permute.xlu0 %4054 }
0x10e3   :  { %8086 = vmatmul.mubr.bf16.gmra.mxu1 %v8535_v59  ;;  %v9615_v59 = vpop.permute.xlu1 %4039 }
0x10e4   :  { %8089 = vmatprep.mubr.bf16.mxu1 %v8536_v62  ;;  %v4587_v62 = vld [vmem:[#allocation4 + $0x2f0] sm:$0xff] }
0x10eb   :  { %8090 = vmatmul.mubr.bf16.gmra.mxu1 %v8537_v35  ;;  %v4590_v35 = vld [vmem:[#allocation4 + $0x308] sm:$0xff] }
0x1153   :  { %v9535_v47 = vpop.f32.mrf.mxu1 }
0x1155   :  { %v9537_v56 = vpop.f32.mrf.mxu1 }
0x1157   :  { %v9539_v51 = vpop.f32.mrf.mxu1 }
0x1159   :  { %v9541_v42 = vpop.f32.mrf.mxu1 }
0x115b   :  { %v8051_v28 = vpop.f32.mrf.mxu1 }
0x115c   :  { %3765 = vrot.lane.b32.xlu1 %v8051_v28, %s8860_s0  ;;  %v4988_v28 = vld [vmem:[#allocation4 + $0x220] sm:$0xff] }
0x115d   :  { %v3562_v15 = vpop.f32.mrf.mxu1 }
0x115f   :  { %v8052_v27 = vpop.f32.mrf.mxu1 }
0x1160   :  { %3761 = vrot.lane.b32.xlu1 %v3562_v15, %s8860_s0  ;;  %3767 = vrot.lane.b32.xlu0 %v8052_v27, %s8860_s0  ;;  %v4586_v15 = vld [vmem:[#allocation4 + $0x2e8] sm:$0xff] }
0x1161   :  { %v3565_v23 = vpop.f32.mrf.mxu1 }
0x1163   :  { %v8055_v32 = vpop.f32.mrf.mxu1 }
0x1164   :  { %3763 = vrot.lane.b32.xlu0 %v3565_v23, %s8860_s0  ;;  %3773 = vrot.lane.b32.xlu1 %v8055_v32, %s8860_s0  ;;  %v8538_v32 = vld [vmem:[#allocation2 + $0x450] sm:$0xff]  }
0x1165   :  { %v3578_v29 = vpop.f32.mrf.mxu1  ;;  %8109 = vmatprep.mubr.bf16.mxu0 %v8538_v32 }
0x1167   :  { %v8056_v52 = vpop.f32.mrf.mxu1 }
0x1168   :  { %3769 = vrot.lane.b32.xlu1 %v3578_v29, %s8860_s0  ;;  %3775 = vrot.lane.b32.xlu0 %v8056_v52, %s8860_s0  ;;  %v4986_v29 = vld [vmem:[#allocation4 + $0x210] sm:$0xff]  ;;  %v4989_v52 = vld [vmem:[#allocation4 + $0x228] sm:$0xff] }
0x1169   :  { %v3581_v18 = vpop.f32.mrf.mxu1 }
0x116b   :  { %v8059_v1 = vpop.f32.mrf.mxu1 }
0x116c   :  { %3771 = vrot.lane.b32.xlu0 %v3581_v18, %s8860_s0  ;;  %3781 = vrot.lane.b32.xlu1 %v8059_v1, %s8860_s0  ;;  %v4984_v1 = vld [vmem:[#allocation4 + $0x200] sm:$0xff] }
0x116d   :  { %v3594_v24 = vpop.f32.mrf.mxu1 }
0x116f   :  { %v8060_v30 = vpop.f32.mrf.mxu1 }
0x1170   :  { %3777 = vrot.lane.b32.xlu1 %v3594_v24, %s8860_s0  ;;  %3783 = vrot.lane.b32.xlu0 %v8060_v30, %s8860_s0  ;;  %v4987_v24 = vld [vmem:[#allocation4 + $0x218] sm:$0xff] }
0x1171   :  { %v3597_v31 = vpop.f32.mrf.mxu1 }
0x1173   :  { %v9554_v36 = vpop.f32.mrf.mxu1 }
0x1174   :  { %3779 = vrot.lane.b32.xlu0 %v3597_v31, %s8860_s0  ;;  %v4985_v31 = vld [vmem:[#allocation4 + $0x208] sm:$0xff] }
0x1175   :  { %v9557_v14 = vpop.f32.mrf.mxu1 }
0x1177   :  { %v9559_v25 = vpop.f32.mrf.mxu1 }
0x1179   :  { %v9561_v54 = vpop.f32.mrf.mxu1 }
0x117b   :  { %v9563_v8 = vpop.f32.mrf.mxu1 }
0x117d   :  { %v9565_v34 = vpop.f32.mrf.mxu1 }
0x117f   :  { %v9567_v43 = vpop.f32.mrf.mxu1 }
0x1181   :  { %v9569_v50 = vpop.f32.mrf.mxu1 }
0x1183   :  { %v9571_v22 = vpop.f32.mrf.mxu1 }
0x1185   :  { %v9573_v46 = vpop.f32.mrf.mxu1 }
0x1187   :  { %v9575_v2 = vpop.f32.mrf.mxu1 }
0x1189   :  { %v9577_v44 = vpop.f32.mrf.mxu1 }
0x118b   :  { %v9579_v5 = vpop.f32.mrf.mxu1 }
0x118d   :  { %v9581_v37 = vpop.f32.mrf.mxu1 }
0x118f   :  { %v9583_v53 = vpop.f32.mrf.mxu1 }
0x1191   :  { %v9585_v48 = vpop.f32.mrf.mxu1 }
0x1193   :  { %v8079_v20 = vpop.f32.mrf.mxu1 }
0x1195   :  { %v3674_v21 = vpop.f32.mrf.mxu1 }
0x1197   :  { %v8080_v16 = vpop.f32.mrf.mxu1 }
0x1199   :  { %v3677_v60 = vpop.f32.mrf.mxu1 }
0x119b   :  { %v8083_v4 = vpop.f32.mrf.mxu1 }
0x119c   :  { %3861 = vrot.lane.b32.xlu1 %v8083_v4, %s8861_s2 }
0x119d   :  { %v3690_v17 = vpop.f32.mrf.mxu1 }
0x119f   :  { %v8084_v13 = vpop.f32.mrf.mxu1 }
0x11a0   :  { %3857 = vrot.lane.b32.xlu1 %v3690_v17, %s8861_s2  ;;  %3863 = vrot.lane.b32.xlu0 %v8084_v13, %s8861_s2 }
0x11a1   :  { %v3693_v38 = vpop.f32.mrf.mxu1 }
0x11a3   :  { %v8087_v41 = vpop.f32.mrf.mxu1 }
0x11a4   :  { %3859 = vrot.lane.b32.xlu0 %v3693_v38, %s8861_s2  ;;  %3869 = vrot.lane.b32.xlu1 %v8087_v41, %s8861_s2 }
0x11a5   :  { %v3706_v45 = vpop.f32.mrf.mxu1 }
0x11a7   :  { %v8088_v57 = vpop.f32.mrf.mxu1 }
0x11a8   :  { %3865 = vrot.lane.b32.xlu1 %v3706_v45, %s8861_s2  ;;  %3871 = vrot.lane.b32.xlu0 %v8088_v57, %s8861_s2 }
0x11a9   :  { %v3709_v6 = vpop.f32.mrf.mxu1 }
0x11ab   :  { %v8091_v7 = vpop.f32.mrf.mxu1 }
0x11ac   :  { %3867 = vrot.lane.b32.xlu0 %v3709_v6, %s8861_s2  ;;  %3877 = vrot.lane.b32.xlu1 %v8091_v7, %s8861_s2  ;;  %v4327_v7 = vld [vmem:[#allocation2 + $0x590] sm:$0x3] }
0x11ad   :  { %v3722_v40 = vpop.f32.mrf.mxu1  ;;  %8403 = vmatprep.subr.msk.bf16.mxu1 %vm63_vm0, %v4327_v7 }
0x11af   :  { %v8092_v58 = vpop.f32.mrf.mxu1 }
0x11b0   :  { %3873 = vrot.lane.b32.xlu1 %v3722_v40, %s8861_s2  ;;  %3879 = vrot.lane.b32.xlu0 %v8092_v58, %s8861_s2  ;;  %v4345_v58 = vsel %vm63_vm0, %v4327_v7, 0 }
0x11b1   :  { %v3725_v3 = vpop.f32.mrf.mxu1  ;;  %8134 = vmatpush3.bf16.msra.mxu1 %v4345_v58 }
0x11b4   :  { %3757 = vrot.lane.b32.xlu1 %v9535_v47, %s8860_s0  ;;  %3875 = vrot.lane.b32.xlu0 %v3725_v3, %s8861_s2  ;;  %v9617_v47 = vpop.permute.xlu0 %4044 }
0x11b8   :  { %3853 = vrot.lane.b32.xlu1 %v8079_v20, %s8861_s2  ;;  %3759 = vrot.lane.b32.xlu0 %v9539_v51, %s8860_s0  ;;  %v4588_v51 = vld [vmem:[#allocation4 + $0x2f8] sm:$0xff]  ;;  %v9621_v27 = vpop.permute.xlu0 %4034 }
0x11bc   :  { %3989 = vperm.xlu1 %8420, %v3963_v61   ;;  %3855 = vrot.lane.b32.xlu0 %v8080_v16, %s8861_s2  ;;  %v9625_v18 = vpop.permute.xlu0 %4024 }
0x11c0   :  { %3753 = vrot.lane.b32.xlu1 %v9537_v56, %s8860_s0  ;;  %3994 = vperm.xlu0 %8421, %v3964_v49   ;;  %v4585_v56 = vld [vmem:[#allocation4 + $0x2e0] sm:$0xff]  ;;  %v9629_v20 = vpop.permute.xlu0 %4014 }
0x11c4   :  { %3849 = vrot.lane.b32.xlu1 %v3674_v21, %s8861_s2  ;;  %3755 = vrot.lane.b32.xlu0 %v9541_v42, %s8860_s0  ;;  %v9619_v42 = vpop.permute.xlu1 %4029  ;;  %v9633_v16 = vpop.permute.xlu0 %4004 }
0x11c8   :  { %3979 = vperm.xlu1 %8420, %v3961_v55   ;;  %3851 = vrot.lane.b32.xlu0 %v3677_v60, %s8861_s2  ;;  %v9623_v23 = vpop.permute.xlu1 %4019 }
0x11cc   :  { %4625 = vperm.xlu1 %8420, %v4591_v39   ;;  %3984 = vperm.xlu0 %8421, %v3962_v12   ;;  %v9627_v30 = vpop.permute.xlu1 %4009 }
0x11d0   :  { %4615 = vperm.xlu1 %8420, %v4589_v10   ;;  %4630 = vperm.xlu0 %8421, %v4592_v0   ;;  %v9631_v21 = vpop.permute.xlu1 %3999 }
0x11d2   :  { %v3768_v4 = vpop.permute.xlu0 %3767 }
0x11d4   :  { %4605 = vperm.xlu1 %8420, %v4587_v62   ;;  %4620 = vperm.xlu0 %8421, %v4590_v35   ;;  %v3766_v60 = vpop.permute.xlu1 %3765 }
0x11d6   :  { %v3764_v13 = vpop.permute.xlu0 %3763 }
0x11d8   :  { %4595 = vperm.xlu1 %8420, %v4585_v56   ;;  %4610 = vperm.xlu0 %8421, %v4588_v51   ;;  %v9635_v17 = vpop.permute.xlu1 %3761  ;;  %v3807_v56 = vsel %vm119_vm3, 0.0, %v3766_v60 }
0x11da   :  { %v3776_v41 = vpop.permute.xlu0 %3775 }
0x11dc   :  { %5022 = vperm.xlu1 %8420, %v4988_v28   ;;  %4600 = vperm.xlu0 %8421, %v4586_v15   ;;  %v3774_v38 = vpop.permute.xlu1 %3773  ;;  %v3808_v28 = vsel %vm119_vm3, 0.0, %v3768_v4 }
0x11dd   :  { %v3824_v60 = vmul.f32 %v9433_v19, %v3808_v28 }
0x11de   :  { %v3772_v57 = vpop.permute.xlu0 %3771 }
0x11df   :  { %v3810_v7 = vsel %vm119_vm3, 0.0, %v3772_v57 }
0x11e0   :  { %5012 = vperm.xlu1 %8420, %v4986_v29   ;;  %5027 = vperm.xlu0 %8421, %v4989_v52   ;;  %v3770_v45 = vpop.permute.xlu1 %3769  ;;  %v9650_v29 = vmul.f32 %v9433_v19, %v3807_v56  ;;  %v3811_v52 = vsel %vm119_vm3, 0.0, %v3774_v38  ;;  %v3826_v28 = vmul.f32 %v9433_v19, %v3810_v7 }
0x11e1   :  { %v3809_v56 = vsel %vm119_vm3, 0.0, %v3770_v45 }
0x11e2   :  { %v3784_v40 = vpop.permute.xlu0 %3783 }
0x11e3   :  { %v3816_v32 = vsel %vm119_vm3, 0.0, %v3784_v40  ;;  %v3806_v40 = vsel %vm119_vm3, 0.0, %v3764_v13 }
0x11e4   :  { %5002 = vperm.xlu1 %8420, %v4984_v1   ;;  %5017 = vperm.xlu0 %8421, %v4987_v24   ;;  %v3782_v6 = vpop.permute.xlu1 %3781  ;;  %v3812_v1 = vsel %vm119_vm3, 0.0, %v3776_v41  ;;  %v3832_v4 = vmul.f32 %v9433_v19, %v3816_v32 }
0x11e5   :  { %v3815_v0 = vsel %vm119_vm3, 0.0, %v3782_v6 }
0x11e6   :  { %v3780_v61 = vpop.permute.xlu0 %3779  ;;  %v3831_v15 = vmul.f32 %v9433_v19, %v3815_v0  ;;  %v3827_v0 = vmul.f32 %v9433_v19, %v3811_v52 }
0x11e7   :  { %v3814_v57 = vsel %vm119_vm3, 0.0, %v3780_v61 }
0x11e8   :  { %5007 = vperm.xlu0 %8421, %v4985_v31   ;;  %v3778_v3 = vpop.permute.xlu1 %3777 }
0x11e9   :  { %v3813_v51 = vsel %vm119_vm3, 0.0, %v3778_v3  ;;  %v3943_v3 = vadd.f32 %v9579_v5, %v3831_v15 }
0x11ea   :  { %v3829_v24 = vmul.f32 %v9433_v19, %v3813_v51  ;;  %v3828_v51 = vmul.f32 %v9433_v19, %v3812_v1  ;;  %v3830_v1 = vmul.f32 %v9433_v19, %v3814_v57 }
0x11ec   :  { %v3941_v32 = vadd.f32 %v3829_v24, %v9581_v37  ;;  %v3825_v24 = vmul.f32 %v9433_v19, %v3809_v56 }
0x120e   :  { %v3862_v49 = vpop.permute.xlu1 %3861 }
0x1212   :  { %v9639_v55 = vpop.permute.xlu1 %3857  ;;  %v3864_v39 = vpop.permute.xlu0 %3863 }
0x1216   :  { %v3870_v12 = vpop.permute.xlu1 %3869  ;;  %v9641_v10 = vpop.permute.xlu0 %3859 }
0x1217   :  { %v3907_v13 = vsel %vm3114_vm2, %v3870_v12, 0.0  ;;  %v3939_v12 = vadd.f32 %v9571_v22, %v3827_v0  ;;  %v3942_v0 = vadd.f32 %v3830_v1, %v9585_v48 }
0x121a   :  { %v3866_v62 = vpop.permute.xlu1 %3865  ;;  %v3872_v35 = vpop.permute.xlu0 %3871 }
0x121b   :  { %v3908_v38 = vsel %vm3114_vm2, %v3872_v35, 0.0  ;;  %v3944_v35 = vadd.f32 %v9583_v53, %v3832_v4  ;;  %v3940_v53 = vadd.f32 %v9575_v2, %v3828_v51  ;;  %v3923_v4 = vmul.f32 %v9449_v9, %v3907_v13 }
0x121c   :  { %v3904_v2 = vsel %vm3114_vm2, %v3864_v39, 0.0  ;;  %v3937_v13 = vadd.f32 %v3825_v24, %v9573_v46  ;;  %v3936_v46 = vadd.f32 %v9567_v43, %v3824_v60 }
0x121d   :  { %v3955_v51 = vadd.f32 %v3939_v12, %v3923_v4  ;;  %v3920_v39 = vmul.f32 %v9449_v9, %v3904_v2 }
0x121e   :  { %v3878_v31 = vpop.permute.xlu1 %3877  ;;  %v3868_v6 = vpop.permute.xlu0 %3867 }
0x121f   :  { %v3911_v58 = vsel %vm3114_vm2, %v3878_v31, 0.0  ;;  %v3906_v61 = vsel %vm3114_vm2, %v3868_v6, 0.0  ;;  %v3938_v6 = vadd.f32 %v3826_v28, %v9577_v44  ;;  %v3805_v28 = vsel %vm119_vm3, 0.0, %v9635_v17 }
0x1220   :  { %v3927_v41 = vmul.f32 %v9449_v9, %v3911_v58  ;;  %v3924_v58 = vmul.f32 %v9449_v9, %v3908_v38  ;;  %v4067_v1 = vadd.f32 %v9619_v42, %v3955_v51 }
0x1222   :  { %v3959_v31 = vadd.f32 %v3943_v3, %v3927_v41  ;;  %v3874_v5 = vpop.permute.xlu1 %3873  ;;  %v3880_v15 = vpop.permute.xlu0 %3879  ;;  %v3905_v3 = vsel %vm3114_vm2, %v3866_v62, 0.0 }
0x1223   :  { %v3909_v52 = vsel %vm3114_vm2, %v3874_v5, 0.0  ;;  %v3912_v45 = vsel %vm3114_vm2, %v3880_v15, 0.0  ;;  %v3956_v15 = vadd.f32 %v3940_v53, %v3924_v58  ;;  %v3822_v58 = vmul.f32 %v9433_v19, %v3806_v40 }
0x1224   :  { %v3925_v7 = vmul.f32 %v9449_v9, %v3909_v52  ;;  %v3928_v37 = vmul.f32 %v9449_v9, %v3912_v45  ;;  %v4071_v38 = vadd.f32 %v9611_v26, %v3959_v31  ;;  %v3922_v52 = vmul.f32 %v9449_v9, %v3906_v61 }
0x1225   :  { %v3903_v26 = vsel %vm3114_vm2, %v3862_v49, 0.0  ;;  %v3901_v40 = vsel %vm3114_vm2, %v9639_v55, 0.0  ;;  %v3934_v43 = vadd.f32 %v3822_v58, %v9569_v50 }
0x1226   :  { %v3957_v41 = vadd.f32 %v3941_v32, %v3925_v7  ;;  %v3960_v57 = vadd.f32 %v3944_v35, %v3928_v37  ;;  %v3876_v5 = vpop.permute.xlu0 %3875  ;;  %v3921_v32 = vmul.f32 %v9449_v9, %v3905_v3  ;;  %8707 = vtanh.f32 %v4071_v38  ;;  %v3758_v49 = vpop.permute.xlu1 %3757 }
0x1227   :  { %v3910_v22 = vsel %vm3114_vm2, %v3876_v5, 0.0  ;;  %v3954_v35 = vadd.f32 %v3938_v6, %v3922_v52  ;;  %v3919_v45 = vmul.f32 %v9449_v9, %v3903_v26  ;;  %v3821_v7 = vmul.f32 %v9433_v19, %v3805_v28 }
0x1228   :  { %v4072_v56 = vadd.f32 %v9613_v63, %v3960_v57  ;;  %v3926_v62 = vmul.f32 %v9449_v9, %v3910_v22  ;;  %v4069_v44 = vadd.f32 %v9615_v59, %v3957_v41  ;;  %v4068_v63 = vadd.f32 %v9621_v27, %v3956_v15 }
0x1229   :  { %v3902_v59 = vsel %vm3114_vm2, %v9641_v10, 0.0  ;;  %v3953_v61 = vadd.f32 %v3937_v13, %v3921_v32  ;;  %v3935_v27 = vadd.f32 %v9563_v8, %v9650_v29  ;;  %v3952_v37 = vadd.f32 %v3936_v46, %v3920_v39 }
0x122a   :  { %v3958_v48 = vadd.f32 %v3942_v0, %v3926_v62  ;;  %v3760_v31 = vpop.permute.xlu0 %3759  ;;  %8709 = vtanh.f32 %v4072_v56  ;;  %v3918_v10 = vmul.f32 %v9449_v9, %v3902_v59  ;;  %v3917_v12 = vmul.f32 %v9449_v9, %v3901_v40  ;;  %v3854_v29 = vpop.permute.xlu1 %3853 }
0x122b   :  { %8711 = vtanh.f32 %v4069_v44  ;;  %v3951_v42 = vadd.f32 %v3935_v27, %v3919_v45  ;;  %v4065_v8 = vadd.f32 %v9623_v23, %v3953_v61  ;;  %v3804_v24 = vsel %vm119_vm3, 0.0, %v3760_v31  ;;  %v8800_v45 = vld [vmem:[#allocation4 + $0x3a8] ss:$0 sm:$0xff] }
0x122c   :  { %v4070_v17 = vadd.f32 %v9617_v47, %v3958_v48  ;;  %v4066_v47 = vadd.f32 %v9625_v18, %v3954_v35  ;;  %v3933_v55 = vadd.f32 %v3821_v7, %v9565_v34  ;;  %v3803_v53 = vsel %vm119_vm3, 0.0, %v3758_v49 }
0x122d   :  { %v4064_v4 = vadd.f32 %v9629_v20, %v3952_v37  ;;  %v3950_v3 = vadd.f32 %v3934_v43, %v3918_v10  ;;  %v3899_v18 = vsel %vm3114_vm2, %v3854_v29, 0.0  ;;  %v3820_v38 = vmul.f32 %v9433_v19, %v3804_v24 }
0x122e   :  { %8713 = vtanh.f32 %v4070_v17  ;;  %v3856_v60 = vpop.permute.xlu0 %3855  ;;  %v4063_v41 = vadd.f32 %v9627_v30, %v3951_v42  ;;  %v3949_v23 = vadd.f32 %v3933_v55, %v3917_v12  ;;  %v3819_v57 = vmul.f32 %v9433_v19, %v3803_v53 }
0x122f   :  { %8715 = vtanh.f32 %v4068_v63  ;;  %v3900_v50 = vsel %vm3114_vm2, %v3856_v60, 0.0  ;;  %v4062_v20 = vadd.f32 %v9633_v16, %v3950_v3  ;;  %v3915_v6 = vmul.f32 %v9449_v9, %v3899_v18 }
0x1230   :  { %8717 = vtanh.f32 %v4067_v1  ;;  %v3916_v34 = vmul.f32 %v9449_v9, %v3900_v50  ;;  %v3932_v22 = vadd.f32 %v9559_v25, %v3820_v38  ;;  %v4061_v0 = vadd.f32 %v9631_v21, %v3949_v23  ;;  %v8799_v21 = vld [vmem:[#allocation4 + $0x3a0] ss:$0 sm:$0xff]  ;;  %v8539_v38 = vld [vmem:[#allocation2 + $0x458] sm:$0xff]  }
0x1231   :  { %8719 = vtanh.f32 %v4066_v47  ;;  %v3931_v30 = vadd.f32 %v9554_v36, %v3819_v57  ;;  %v8541_v23 = vld [vmem:[#allocation2 + $0x468] sm:$0xff]   ;;  %v8542_v57 = vld [vmem:[#allocation2 + $0x470] sm:$0xff]  }
0x1232   :  { %8721 = vtanh.f32 %v4065_v8  ;;  %v3948_v19 = vadd.f32 %v3932_v22, %v3916_v34  ;;  %v8543_v34 = vld [vmem:[#allocation2 + $0x478] sm:$0xff]   ;;  %v8549_v22 = vld [vmem:[#allocation2 + $0x4a8] sm:$0xff]  }
0x1233   :  { %v8708_v5 = vpop.eup %8707  ;;  %8723 = vtanh.f32 %v4064_v4  ;;  %v3947_v26 = vadd.f32 %v3931_v30, %v3915_v6  ;;  %v8546_v6 = vld [vmem:[#allocation2 + $0x490] sm:$0xff]  }
0x1234   :  { %8725 = vtanh.f32 %v4063_v41  ;;  %v8540_v41 = vld [vmem:[#allocation2 + $0x460] sm:$0xff]   ;;  %v4492_v30 = vld [vmem:[#allocation2 + $0x594] sm:$0x3] }
0x1235   :  { %8727 = vtanh.f32 %v4062_v20  ;;  %v8545_v20 = vld [vmem:[#allocation2 + $0x488] sm:$0xff]  }
0x1236   :  { %8729 = vtanh.f32 %v4061_v0  ;;  %v4322_v0 = vld [vmem:[#allocation2 + $0x58c] sm:$0x3] }
0x1237   :  { %v3990_v15 = vpop.permute.xlu1 %3989  ;;  %v8710_v52 = vpop.eup %8709  ;;  %8404 = vmatprep.subr.msk.bf16.mxu1 %vm63_vm0, %v4322_v0 }
0x1238   :  { %v4120_v2 = vpack.c.bf16 %v8710_v52, %v8708_v5  ;;  %v8712_v56 = vpop.eup %8711  ;;  %v4059_v28 = vadd.f32 %v3990_v15, %v3947_v26  ;;  %v8544_v5 = vld [vmem:[#allocation2 + $0x480] sm:$0xff]   ;;  %v8547_v15 = vld [vmem:[#allocation2 + $0x498] sm:$0xff]  }
0x1239   :  { %v8548_v52 = vld [vmem:[#allocation2 + $0x4a0] sm:$0xff]  }
0x123a   :  { %8093 = vmatprep.subr.bf16.mxu0 %v4120_v2 }
0x123b   :  { %v8714_v62 = vpop.eup %8713  ;;  %v3754_v51 = vpop.permute.xlu1 %3753  ;;  %8094 = vmatpush3.bf16.msra.mxu0 %v4120_v2  ;;  %v4510_v2 = vsel %vm63_vm0, %v4492_v30, 0 }
0x123c   :  { %v3995_v16 = vpop.permute.xlu0 %3994  ;;  %v8716_v32 = vpop.eup %8715  ;;  %v3801_v9 = vsel %vm119_vm3, 0.0, %v3754_v51  ;;  %v4119_v25 = vpack.c.bf16 %v8714_v62, %v8712_v56 }
0x123d   :  { %v4060_v44 = vadd.f32 %v3995_v16, %v3948_v19  ;;  %v3817_v13 = vmul.f32 %v8799_v21, %v3801_v9  ;;  %v8718_v36 = vpop.eup %8717 }
0x123e   :  { %8095 = vmatprep.subr.bf16.mxu0 %v4119_v25  ;;  %v4118_v39 = vpack.c.bf16 %v8716_v32, %v8718_v36  ;;  %v8720_v63 = vpop.eup %8719 }
0x123f   :  { %8731 = vtanh.f32 %v4060_v44  ;;  %v3850_v48 = vpop.permute.xlu1 %3849  ;;  %8096 = vmatpush3.bf16.msra.mxu0 %v4119_v25  ;;  %v3929_v58 = vadd.f32 %v3817_v13, %v9557_v14  ;;  %v8722_v46 = vpop.eup %8721 }
0x1240   :  { %v3756_v31 = vpop.permute.xlu0 %3755  ;;  %v3897_v35 = vsel %vm3114_vm2, %v3850_v48, 0.0  ;;  %8733 = vtanh.f32 %v4059_v28  ;;  %8097 = vmatprep.subr.bf16.mxu0 %v4118_v39  ;;  %v4117_v7 = vpack.c.bf16 %v8720_v63, %v8722_v46  ;;  %v8724_v40 = vpop.eup %8723 }
0x1241   :  { %v3802_v49 = vsel %vm119_vm3, 0.0, %v3756_v31  ;;  %v3913_v59 = vmul.f32 %v8800_v45, %v3897_v35  ;;  %v8726_v43 = vpop.eup %8725  ;;  %v4425_v31 = vsel %vm63_vm0, %v4322_v0, 0 }
0x1242   :  { %v3818_v17 = vmul.f32 %v8799_v21, %v3802_v49  ;;  %v4116_v12 = vpack.c.bf16 %v8724_v40, %v8726_v43  ;;  %v8728_v8 = vpop.eup %8727 }
0x1243   :  { %v3945_v1 = vadd.f32 %v3929_v58, %v3913_v59  ;;  %v3980_v61 = vpop.permute.xlu1 %3979  ;;  %8098 = vmatpush3.bf16.msra.mxu0 %v4118_v39  ;;  %v8730_v24 = vpop.eup %8729 }
0x1244   :  { %v3852_v27 = vpop.permute.xlu0 %3851  ;;  %v3930_v10 = vadd.f32 %v3818_v17, %v9561_v54  ;;  %8099 = vmatprep.subr.bf16.mxu0 %v4117_v7  ;;  %v4115_v55 = vpack.c.bf16 %v8728_v8, %v8730_v24  ;;  %v8550_v8 = vld [vmem:[#allocation2 + $0x2e8] sm:$0xff]  }
0x1245   :  { %v3898_v37 = vsel %vm3114_vm2, %v3852_v27, 0.0  ;;  %v4057_v42 = vadd.f32 %v3980_v61, %v3945_v1 }
0x1246   :  { %v3914_v47 = vmul.f32 %v8800_v45, %v3898_v37 }
0x1247   :  { %8100 = vmatpush3.bf16.msra.mxu0 %v4117_v7  ;;  %8735 = vtanh.f32 %v4057_v42 }
0x1248   :  { %v3946_v14 = vadd.f32 %v3930_v10, %v3914_v47  ;;  %v3985_v60 = vpop.permute.xlu0 %3984  ;;  %8101 = vmatprep.subr.bf16.mxu0 %v4116_v12 }
0x124a   :  { %v4058_v29 = vadd.f32 %v3985_v60, %v3946_v14 }
0x124b   :  { %8102 = vmatpush3.bf16.msra.mxu0 %v4116_v12  ;;  %v10139_v12 = vld [vmem:[#allocation13_spill] sm:$0xff] }
0x124c   :  { %8737 = vtanh.f32 %v4058_v29  ;;  %v8732_v53 = vpop.eup %8731  ;;  %8103 = vmatprep.subr.bf16.mxu0 %v4115_v55 }
0x124d   :  { %v8734_v4 = vpop.eup %8733 }
0x124e   :  { %v4114_v54 = vpack.c.bf16 %v8732_v53, %v8734_v4 }
0x124f   :  { %8104 = vmatpush3.bf16.msra.mxu0 %v4115_v55 }
0x1250   :  { %8105 = vmatprep.subr.bf16.mxu0 %v4114_v54 }
0x1253   :  { %8106 = vmatpush3.bf16.msra.mxu0 %v4114_v54 }
0x1254   :  { %v8736_v3 = vpop.eup %8735 }
0x1259   :  { %v8738_v50 = vpop.eup %8737 }
0x125a   :  { %v4113_v18 = vpack.c.bf16 %v8738_v50, %v8736_v3 }
0x125c   :  { %8107 = vmatprep.subr.bf16.mxu0 %v4113_v18 }
0x125d   :  { %8108 = vmatpush3.bf16.msra.mxu0 %v4113_v18 }
0x125e   :  { %8405 = vmatprep.subr.msk.bf16.mxu0 %vm63_vm0, %v4492_v30 }
0x1260   :  { %8110 = vmatmul.mubr.bf16.vlgmr.msra.gmra.mxu0 %v8539_v38 }
0x1261   :  { %8113 = vmatprep.mubr.bf16.mxu0 %v8540_v41  ;;  %8154 = vmatpush3.bf16.msra.mxu0 %v4510_v2 }
0x1268   :  { %8114 = vmatmul.mubr.bf16.gmra.mxu0 %v8541_v23 }
0x1269   :  { %8117 = vmatprep.mubr.bf16.mxu0 %v8542_v57 }
0x1270   :  { %8118 = vmatmul.mubr.bf16.gmra.mxu0 %v8543_v34  ;;  %v4631_v34 = vpop.permute.xlu0 %4630 }
0x1271   :  { %8121 = vmatprep.mubr.bf16.mxu0 %v8544_v5 }
0x1274   :  { %v4621_v2 = vpop.permute.xlu0 %4620 }
0x1278   :  { %8122 = vmatmul.mubr.bf16.gmra.mxu0 %v8545_v20 }
0x1279   :  { %8125 = vmatprep.mubr.bf16.mxu0 %v8546_v6  ;;  %v4626_v6 = vpop.permute.xlu1 %4625 }
0x1280   :  { %8126 = vmatmul.mubr.bf16.gmra.mxu0 %v8547_v15 }
0x1281   :  { %8129 = vmatprep.mubr.bf16.mxu0 %v8548_v52 }
0x1288   :  { %8130 = vmatmul.mubr.bf16.gmra.mxu0 %v8549_v22 }
0x1320   :  { %v8111_v56 = vpop.f32.mrf.mxu0 }
0x1322   :  { %v4227_v19 = vpop.f32.mrf.mxu0 }
0x1324   :  { %v8112_v62 = vpop.f32.mrf.mxu0 }
0x1325   :  { %v4324_v27 = vpack.c.bf16 %v8112_v62, %v8111_v56 }
0x1326   :  { %v4230_v26 = vpop.f32.mrf.mxu0 }
0x1327   :  { %v4323_v59 = vpack.c.bf16 %v4230_v26, %v4227_v19 }
0x1328   :  { %v8115_v51 = vpop.f32.mrf.mxu0 }
0x132a   :  { %v4243_v16 = vpop.f32.mrf.mxu0 }
0x132c   :  { %v8116_v32 = vpop.f32.mrf.mxu0 }
0x132d   :  { %v4326_v14 = vpack.c.bf16 %v8116_v32, %v8115_v51  ;;  %v4616_v32 = vpop.permute.xlu1 %4615 }
0x132e   :  { %v4246_v9 = vpop.f32.mrf.mxu0 }
0x132f   :  { %v4325_v37 = vpack.c.bf16 %v4246_v9, %v4243_v16 }
0x1330   :  { %v8119_v44 = vpop.f32.mrf.mxu0 }
0x1332   :  { %v4259_v25 = vpop.f32.mrf.mxu0 }
0x1334   :  { %v8120_v28 = vpop.f32.mrf.mxu0 }
0x1335   :  { %v4329_v36 = vpack.c.bf16 %v8120_v28, %v8119_v44 }
0x1336   :  { %v4262_v21 = vpop.f32.mrf.mxu0 }
0x1337   :  { %v4328_v13 = vpack.c.bf16 %v4262_v21, %v4259_v25 }
0x1338   :  { %v8123_v48 = vpop.f32.mrf.mxu0 }
0x1339   :  { %8135 = vmatprep.mubr.msk.bf16.mxu1 %vm56_vm1, %v4328_v13 }
0x133a   :  { %v4275_v39 = vpop.f32.mrf.mxu0  ;;  %8136 = vmatmul.mubr.msk.bf16.vlgmr.msra.gmra.mxu1 %vm56_vm1, %v4329_v36 }
0x133b   :  { %8144 = vmatpush3.bf16.msra.mxu1 %v4425_v31 }
0x133c   :  { %8163 = vmatprep.subr.bf16.mxu1 %v9294_v33  ;;  %v8124_v63 = vpop.f32.mrf.mxu0 }
0x133d   :  { %v4331_v58 = vpack.c.bf16 %v8124_v63, %v8123_v48 }
0x133e   :  { %v4278_v35 = vpop.f32.mrf.mxu0 }
0x133f   :  { %v4330_v49 = vpack.c.bf16 %v4278_v35, %v4275_v39  ;;  %v4611_v35 = vpop.permute.xlu0 %4610 }
0x1340   :  { %v8127_v45 = vpop.f32.mrf.mxu0 }
0x1341   :  { %8139 = vmatprep.mubr.msk.bf16.mxu1 %vm56_vm1, %v4330_v49 }
0x1342   :  { %8140 = vmatmul.mubr.msk.bf16.gmra.mxu1 %vm56_vm1, %v4331_v58  ;;  %v4291_v17 = vpop.f32.mrf.mxu0 }
0x1343   :  { %8145 = vmatprep.mubr.msk.bf16.mxu1 %vm56_vm1, %v4323_v59 }
0x1344   :  { %v8128_v46 = vpop.f32.mrf.mxu0 }
0x1345   :  { %v4494_v7 = vpack.c.bf16 %v8128_v46, %v8127_v45  ;;  %v4606_v46 = vpop.permute.xlu1 %4605 }
0x1346   :  { %v4294_v1 = vpop.f32.mrf.mxu0 }
0x1347   :  { %v4493_v61 = vpack.c.bf16 %v4294_v1, %v4291_v17 }
0x1348   :  { %v8131_v40 = vpop.f32.mrf.mxu0 }
0x1349   :  { %8155 = vmatprep.mubr.msk.bf16.mxu0 %vm56_vm1, %v4493_v61 }
0x134a   :  { %8146 = vmatmul.mubr.msk.bf16.vlgmr.msra.gmra.mxu1 %vm56_vm1, %v4324_v27  ;;  %v4307_v10 = vpop.f32.mrf.mxu0  ;;  %8156 = vmatmul.mubr.msk.bf16.vlgmr.msra.gmra.mxu0 %vm56_vm1, %v4494_v7 }
0x134b   :  { %8164 = vmatpush3.bf16.msra.mxu1 %v9294_v33  ;;  %8149 = vmatprep.mubr.msk.bf16.mxu1 %vm56_vm1, %v4325_v37  ;;  %v10140_v33 = vld [vmem:[#allocation12_spill] sm:$0xff]  ;;  %v4601_v37 = vpop.permute.xlu0 %4600 }
0x134c   :  { %8165 = vmatprep.subr.bf16.mxu1 %v9288_v11  ;;  %v8132_v47 = vpop.f32.mrf.mxu0 }
0x134d   :  { %v4496_v60 = vpack.c.bf16 %v8132_v47, %v8131_v40 }
0x134e   :  { %v4310_v43 = vpop.f32.mrf.mxu0 }
0x134f   :  { %8166 = vmatpush3.bf16.msra.mxu1 %v9288_v11  ;;  %v4495_v42 = vpack.c.bf16 %v4310_v43, %v4307_v10  ;;  %v4596_v43 = vpop.permute.xlu1 %4595 }
0x1350   :  { %8167 = vmatprep.subr.bf16.mxu1 %v10139_v12 }
0x1351   :  { %8159 = vmatprep.mubr.msk.bf16.mxu0 %vm56_vm1, %v4495_v42 }
0x1352   :  { %8150 = vmatmul.mubr.msk.bf16.gmra.mxu1 %vm56_vm1, %v4326_v14  ;;  %8160 = vmatmul.mubr.msk.bf16.gmra.mxu0 %vm56_vm1, %v4496_v60  ;;  %v8552_v60 = vld [vmem:[#allocation2 + $0x5a0] sm:$0x1f]   ;;  %vm10147_vm1 = vcmask 646144  }
0x1353   :  { %8168 = vmatpush3.bf16.msra.mxu1 %v10139_v12  ;;  %8179 = vmatprep.mubr.bf16.mxu1 %v8550_v8  ;;  %v8551_v12 = vld [vmem:[#allocation2 + $0x2f0] sm:$0xff]   ;;  %v5604_v8 = vsel %vm2328_vm7, %v8552_v60, 0 }
0x1354   :  { %8169 = vmatprep.subr.bf16.mxu1 %v10140_v33 }
0x1357   :  { %8170 = vmatpush3.bf16.msra.mxu1 %v10140_v33  ;;  %v8553_v33 = vld [vmem:[#allocation2 + $0x2f8] sm:$0xff]  }
0x13fa   :  { %v8137_v11 = vpop.f32.mrf.mxu1 }
0x13fc   :  { %v4381_v29 = vpop.f32.mrf.mxu1 }
0x13fe   :  { %v8138_v24 = vpop.f32.mrf.mxu1 }
0x1400   :  { %v4384_v55 = vpop.f32.mrf.mxu1 }
0x1402   :  { %v8141_v53 = vpop.f32.mrf.mxu1 }
0x1404   :  { %v4397_v4 = vpop.f32.mrf.mxu1 }
0x1406   :  { %v8142_v54 = vpop.f32.mrf.mxu1 }
0x1408   :  { %v4400_v3 = vpop.f32.mrf.mxu1 }
0x140a   :  { %v8147_v50 = vpop.f32.mrf.mxu1  ;;  %v8157_v18 = vpop.f32.mrf.mxu0 }
0x140b   :  { %v4470_v44 = vadd.f32 %v8147_v50, %v8137_v11  ;;  %v10141_v11 = vld [vmem:[#allocation11_spill] sm:$0xff]  ;;  %v8561_v50 = vld [vmem:[#allocation2 + $0x338] sm:$0xff]  }
0x140c   :  { %v4461_v38 = vpop.f32.mrf.mxu1  ;;  %v4546_v41 = vpop.f32.mrf.mxu0 }
0x140d   :  { %v4462_v49 = vadd.f32 %v4461_v38, %v4381_v29  ;;  %v4579_v58 = vadd.f32 %v8157_v18, %v4470_v44  ;;  %v8554_v29 = vld [vmem:[#allocation2 + $0x300] sm:$0xff]  }
0x140e   :  { %v8148_v23 = vpop.f32.mrf.mxu1  ;;  %v8158_v57 = vpop.f32.mrf.mxu0  ;;  %v8562_v18 = vld [vmem:[#allocation2 + $0x340] sm:$0xff]  }
0x140f   :  { %v4473_v26 = vadd.f32 %v8148_v23, %v8138_v24  ;;  %v4635_v7 = vadd.f32 %v4606_v46, %v4579_v58  ;;  %v4577_v40 = vadd.f32 %v4546_v41, %v4462_v49  ;;  %v8555_v24 = vld [vmem:[#allocation2 + $0x308] sm:$0xff]   ;;  %v5023_v49 = vpop.permute.xlu1 %5022  ;;  %v5028_v58 = vpop.permute.xlu0 %5027 }
0x1410   :  { %v4464_v5 = vpop.f32.mrf.mxu1  ;;  %v4549_v20 = vpop.f32.mrf.mxu0 }
0x1411   :  { %v4465_v13 = vadd.f32 %v4464_v5, %v4384_v55  ;;  %v4580_v48 = vadd.f32 %v8158_v57, %v4473_v26  ;;  %v4633_v42 = vadd.f32 %v4596_v43, %v4577_v40  ;;  %v8556_v55 = vld [vmem:[#allocation2 + $0x310] sm:$0xff]  }
0x1412   :  { %v8151_v15 = vpop.f32.mrf.mxu1  ;;  %v8161_v52 = vpop.f32.mrf.mxu0 }
0x1413   :  { %v4486_v22 = vadd.f32 %v8151_v15, %v8141_v53  ;;  %v4636_v1 = vadd.f32 %v4611_v35, %v4580_v48  ;;  %v4578_v61 = vadd.f32 %v4549_v20, %v4465_v13  ;;  %v8557_v53 = vld [vmem:[#allocation2 + $0x318] sm:$0xff]   ;;  %v4983_v13 = vld [vmem:[#allocation4 + $0x1f8] sm:$0xff]  ;;  %v5418_v48 = vld [vmem:[#allocation4 + $0x268] sm:$0xff] }
0x1414   :  { %v4477_v0 = vpop.f32.mrf.mxu1  ;;  %v4562_v30 = vpop.f32.mrf.mxu0  ;;  %v8563_v35 = vld [vmem:[#allocation2 + $0x348] sm:$0xff]  }
0x1415   :  { %v4478_v56 = vadd.f32 %v4477_v0, %v4397_v4  ;;  %v4583_v51 = vadd.f32 %v8161_v52, %v4486_v22  ;;  %v4634_v10 = vadd.f32 %v4601_v37, %v4578_v61  ;;  %v4666_v47 = vpack.c.bf16 %v4636_v1, %v4635_v7  ;;  %v8558_v4 = vld [vmem:[#allocation2 + $0x320] sm:$0xff]   ;;  %8211 = vmatprep.mubr.msk.bf16.mxu0 %vm1962_vm14, %v8563_v35 }
0x1416   :  { %v8152_v19 = vpop.f32.mrf.mxu1  ;;  %v8162_v62 = vpop.f32.mrf.mxu0 }
0x1417   :  { %v4489_v16 = vadd.f32 %v8152_v19, %v8142_v54  ;;  %v4581_v25 = vadd.f32 %v4562_v30, %v4478_v56  ;;  %v4639_v31 = vadd.f32 %v4626_v6, %v4583_v51  ;;  %v4665_v14 = vpack.c.bf16 %v4634_v10, %v4633_v42  ;;  %v8559_v54 = vld [vmem:[#allocation2 + $0x328] sm:$0xff]  }
0x1418   :  { %v4480_v9 = vpop.f32.mrf.mxu1  ;;  %v4565_v36 = vpop.f32.mrf.mxu0 }
0x1419   :  { %v4481_v28 = vadd.f32 %v4480_v9, %v4400_v3  ;;  %v4584_v21 = vadd.f32 %v8162_v62, %v4489_v16  ;;  %v4637_v45 = vadd.f32 %v4616_v32, %v4581_v25  ;;  %v8560_v3 = vld [vmem:[#allocation2 + $0x330] sm:$0xff]  }
0x141b   :  { %v4640_v39 = vadd.f32 %v4631_v34, %v4584_v21  ;;  %v4582_v63 = vadd.f32 %v4565_v36, %v4481_v28  ;;  %v4982_v28 = vld [vmem:[#allocation4 + $0x1f0] sm:$0xff]  ;;  %v5417_v21 = vld [vmem:[#allocation4 + $0x260] sm:$0xff] }
0x141c   :  { %v5415_v36 = vld [vmem:[#allocation4 + $0x250] sm:$0xff] }
0x141d   :  { %v4638_v59 = vadd.f32 %v4621_v2, %v4582_v63  ;;  %v4668_v17 = vpack.c.bf16 %v4640_v39, %v4639_v31  ;;  %v5413_v31 = vld [vmem:[#allocation4 + $0x240] sm:$0xff]  ;;  %v5416_v39 = vld [vmem:[#allocation4 + $0x258] sm:$0xff]  ;;  %v5414_v63 = vld [vmem:[#allocation4 + $0x248] sm:$0xff] }
0x141f   :  { %8171 = vmatprep.subr.bf16.mxu1 %v4668_v17  ;;  %v4667_v27 = vpack.c.bf16 %v4638_v59, %v4637_v45  ;;  %v5013_v45 = vpop.permute.xlu1 %5012  ;;  %v9797_v59 = vpop.permute.xlu0 %5017 }
0x1420   :  { %8172 = vmatpush3.bf16.msra.mxu1 %v4668_v17 }
0x1421   :  { %8173 = vmatprep.subr.bf16.mxu1 %v4667_v27 }
0x1423   :  { %v9799_v17 = vpop.permute.xlu1 %5002  ;;  %v5008_v46 = vpop.permute.xlu0 %5007 }
0x1424   :  { %8174 = vmatpush3.bf16.msra.mxu1 %v4667_v27 }
0x1425   :  { %8175 = vmatprep.subr.bf16.mxu1 %v4666_v47 }
0x1428   :  { %8176 = vmatpush3.bf16.msra.mxu1 %v4666_v47 }
0x1429   :  { %8177 = vmatprep.subr.bf16.mxu1 %v4665_v14 }
0x142c   :  { %8178 = vmatpush3.bf16.msra.mxu1 %v4665_v14  ;;  %v9802_v14 = vld [vmem:[#allocation4 + $0x390] ss:$0 sm:$0xff] }
0x142d   :  { %8406 = vmatprep.subr.msk.bf16.mxu1 %vm2328_vm7, %v8552_v60 }
0x142f   :  { %8180 = vmatmul.mubr.bf16.vlgmr.msra.gmra.mxu1 %v8551_v12 }
0x1430   :  { %8252 = vmatpush3.bf16.msra.mxu1 %v5604_v8  ;;  %8183 = vmatprep.mubr.bf16.mxu1 %v8553_v33 }
0x1431   :  { %8263 = vmatprep.subr.bf16.mxu1 %v10141_v11 }
0x1437   :  { %8184 = vmatmul.mubr.bf16.gmra.mxu1 %v8554_v29 }
0x1438   :  { %8187 = vmatprep.mubr.bf16.mxu1 %v8555_v24 }
0x143f   :  { %8188 = vmatmul.mubr.bf16.gmra.mxu1 %v8556_v55 }
0x1440   :  { %8191 = vmatprep.mubr.bf16.mxu1 %v8557_v53 }
0x1447   :  { %8192 = vmatmul.mubr.bf16.gmra.mxu1 %v8558_v4 }
0x1448   :  { %8195 = vmatprep.mubr.bf16.mxu1 %v8559_v54 }
0x144f   :  { %8196 = vmatmul.mubr.bf16.gmra.mxu1 %v8560_v3 }
0x1450   :  { %8199 = vmatprep.mubr.bf16.mxu1 %v8561_v50 }
0x1457   :  { %8200 = vmatmul.mubr.bf16.gmra.mxu1 %v8562_v18  ;;  %v9814_v18 = vld [vmem:[#allocation4 + $0x398] ss:$0 sm:$0xff] }
0x14ef   :  { %v8181_v38 = vpop.f32.mrf.mxu1 }
0x14f0   :  { %4882 = vrot.lane.b32.xlu1 %v8181_v38, %s8860_s0 }
0x14f1   :  { %v4775_v41 = vpop.f32.mrf.mxu1 }
0x14f3   :  { %v8182_v23 = vpop.f32.mrf.mxu1 }
0x14f4   :  { %4878 = vrot.lane.b32.xlu1 %v4775_v41, %s8860_s0  ;;  %4884 = vrot.lane.b32.xlu0 %v8182_v23, %s8860_s0 }
0x14f5   :  { %v4778_v57 = vpop.f32.mrf.mxu1 }
0x14f7   :  { %v8185_v34 = vpop.f32.mrf.mxu1 }
0x14f8   :  { %4880 = vrot.lane.b32.xlu0 %v4778_v57, %s8860_s0  ;;  %4890 = vrot.lane.b32.xlu1 %v8185_v34, %s8860_s0 }
0x14f9   :  { %v4791_v5 = vpop.f32.mrf.mxu1 }
0x14fb   :  { %v8186_v20 = vpop.f32.mrf.mxu1 }
0x14fc   :  { %4886 = vrot.lane.b32.xlu1 %v4791_v5, %s8860_s0  ;;  %4892 = vrot.lane.b32.xlu0 %v8186_v20, %s8860_s0 }
0x14fd   :  { %v4794_v6 = vpop.f32.mrf.mxu1 }
0x14ff   :  { %v9771_v15 = vpop.f32.mrf.mxu1 }
0x1500   :  { %4888 = vrot.lane.b32.xlu0 %v4794_v6, %s8860_s0 }
0x1501   :  { %v9774_v52 = vpop.f32.mrf.mxu1 }
0x1503   :  { %v9776_v22 = vpop.f32.mrf.mxu1 }
0x1505   :  { %v9778_v0 = vpop.f32.mrf.mxu1 }
0x1507   :  { %v9780_v30 = vpop.f32.mrf.mxu1 }
0x1509   :  { %v9782_v2 = vpop.f32.mrf.mxu1 }
0x150b   :  { %v9784_v56 = vpop.f32.mrf.mxu1 }
0x150d   :  { %v9786_v19 = vpop.f32.mrf.mxu1 }
0x150f   :  { %v8197_v62 = vpop.f32.mrf.mxu1 }
0x1510   :  { %4930 = vrot.lane.b32.xlu1 %v8197_v62, %s8861_s2 }
0x1511   :  { %v4839_v26 = vpop.f32.mrf.mxu1 }
0x1513   :  { %v8198_v51 = vpop.f32.mrf.mxu1 }
0x1514   :  { %4932 = vrot.lane.b32.xlu0 %v8198_v51, %s8861_s2 }
0x1515   :  { %v4842_v16 = vpop.f32.mrf.mxu1 }
0x1517   :  { %v8201_v32 = vpop.f32.mrf.mxu1 }
0x1518   :  { %4938 = vrot.lane.b32.xlu1 %v8201_v32, %s8861_s2 }
0x1519   :  { %v4855_v9 = vpop.f32.mrf.mxu1 }
0x151b   :  { %v8202_v44 = vpop.f32.mrf.mxu1 }
0x151c   :  { %4934 = vrot.lane.b32.xlu1 %v4855_v9, %s8861_s2  ;;  %4940 = vrot.lane.b32.xlu0 %v8202_v44, %s8861_s2 }
0x151d   :  { %v4858_v25 = vpop.f32.mrf.mxu1 }
0x1520   :  { %4926 = vrot.lane.b32.xlu1 %v4839_v26, %s8861_s2  ;;  %4936 = vrot.lane.b32.xlu0 %v4858_v25, %s8861_s2 }
0x1524   :  { %4992 = vperm.xlu1 %8420, %v4982_v28   ;;  %4928 = vrot.lane.b32.xlu0 %v4842_v16, %s8861_s2 }
0x1528   :  { %5451 = vperm.xlu1 %8420, %v5417_v21   ;;  %4997 = vperm.xlu0 %8421, %v4983_v13  }
0x152c   :  { %5441 = vperm.xlu1 %8420, %v5415_v36   ;;  %5456 = vperm.xlu0 %8421, %v5418_v48  }
0x1530   :  { %5431 = vperm.xlu1 %8420, %v5413_v31   ;;  %5446 = vperm.xlu0 %8421, %v5416_v39  }
0x1534   :  { %5436 = vperm.xlu0 %8421, %v5414_v63  }
0x1562   :  { %v4883_v1 = vpop.permute.xlu1 %4882 }
0x1563   :  { %v4904_v55 = vsel %vm119_vm3, 0.0, %v4883_v1 }
0x1564   :  { %v4912_v57 = vmul.f32 %v9802_v14, %v4904_v55 }
0x1566   :  { %v4885_v61 = vpop.permute.xlu0 %4884  ;;  %v4879_v27 = vpop.permute.xlu1 %4878  ;;  %v4968_v48 = vadd.f32 %v9771_v15, %v4912_v57  ;;  %v8564_v57 = vld [vmem:[#allocation2 + $0x350] sm:$0xff]  }
0x1567   :  { %v4905_v29 = vsel %vm119_vm3, 0.0, %v4885_v61 }
0x1568   :  { %v4913_v41 = vmul.f32 %v9802_v14, %v4905_v29 }
0x156a   :  { %v4881_v7 = vpop.permute.xlu0 %4880  ;;  %v4891_v40 = vpop.permute.xlu1 %4890  ;;  %v4969_v25 = vadd.f32 %v9776_v22, %v4913_v41  ;;  %v4902_v22 = vsel %vm119_vm3, 0.0, %v4879_v27 }
0x156b   :  { %v4908_v47 = vsel %vm119_vm3, 0.0, %v4891_v40 }
0x156c   :  { %v4916_v60 = vmul.f32 %v9802_v14, %v4908_v47 }
0x156e   :  { %v4893_v37 = vpop.permute.xlu0 %4892  ;;  %v4887_v10 = vpop.permute.xlu1 %4886  ;;  %v4972_v54 = vadd.f32 %v9780_v30, %v4916_v60 }
0x156f   :  { %v4906_v12 = vsel %vm119_vm3, 0.0, %v4887_v10  ;;  %v4909_v33 = vsel %vm119_vm3, 0.0, %v4893_v37 }
0x1570   :  { %v4914_v53 = vmul.f32 %v9802_v14, %v4906_v12  ;;  %v4917_v3 = vmul.f32 %v9802_v14, %v4909_v33 }
0x1572   :  { %v4889_v43 = vpop.permute.xlu0 %4888  ;;  %v4970_v30 = vadd.f32 %v4914_v53, %v9782_v2  ;;  %v4973_v16 = vadd.f32 %v9784_v56, %v4917_v3 }
0x1573   :  { %v4907_v23 = vsel %vm119_vm3, 0.0, %v4889_v43  ;;  %v4910_v43 = vmul.f32 %v9802_v14, %v4902_v22 }
0x1574   :  { %v4915_v32 = vmul.f32 %v9802_v14, %v4907_v23 }
0x1576   :  { %v4971_v56 = vadd.f32 %v4915_v32, %v9786_v19  ;;  %v4903_v19 = vsel %vm119_vm3, 0.0, %v4881_v7  ;;  %v8574_v32 = vld [vmem:[#allocation2 + $0x3a0] sm:$0xff]  }
0x1582   :  { %v4931_v42 = vpop.permute.xlu1 %4930 }
0x1583   :  { %v4952_v34 = vsel %vm1772_vm15, %v4931_v42, 0.0  ;;  %v4966_v42 = vadd.f32 %v4910_v43, %v9774_v52 }
0x1584   :  { %v4960_v28 = vmul.f32 %v9814_v18, %v4952_v34  ;;  %v8565_v34 = vld [vmem:[#allocation2 + $0x358] sm:$0xff]  }
0x1586   :  { %v4933_v8 = vpop.permute.xlu0 %4932  ;;  %v4976_v1 = vadd.f32 %v4968_v48, %v4960_v28 }
0x1587   :  { %v4953_v50 = vsel %vm1772_vm15, %v4933_v8, 0.0 }
0x1588   :  { %v4961_v62 = vmul.f32 %v9814_v18, %v4953_v50 }
0x158a   :  { %v4939_v24 = vpop.permute.xlu1 %4938  ;;  %v4977_v31 = vadd.f32 %v4969_v25, %v4961_v62  ;;  %v8570_v62 = vld [vmem:[#allocation2 + $0x380] sm:$0xff]  }
0x158b   :  { %v4956_v4 = vsel %vm1772_vm15, %v4939_v24, 0.0 }
0x158c   :  { %v4964_v38 = vmul.f32 %v9814_v18, %v4956_v4  ;;  %v5033_v37 = vadd.f32 %v5008_v46, %v4977_v31  ;;  %v4911_v46 = vmul.f32 %v9802_v14, %v4903_v19  ;;  %v5411_v19 = vld [vmem:[#allocation4 + $0x230] sm:$0xff] }
0x158e   :  { %v4980_v5 = vadd.f32 %v4972_v54, %v4964_v38  ;;  %v4935_v20 = vpop.permute.xlu1 %4934  ;;  %v4941_v6 = vpop.permute.xlu0 %4940  ;;  %v4967_v7 = vadd.f32 %v4911_v46, %v9778_v0  ;;  %v5721_v46 = vld [vmem:[#allocation4 + $0x338] sm:$0xff] }
0x158f   :  { %v4954_v26 = vsel %vm1772_vm15, %v4935_v20, 0.0  ;;  %v4957_v51 = vsel %vm1772_vm15, %v4941_v6, 0.0  ;;  %v8567_v20 = vld [vmem:[#allocation2 + $0x368] sm:$0xff]   ;;  %v8568_v6 = vld [vmem:[#allocation2 + $0x370] sm:$0xff]  }
0x1590   :  { %v4962_v9 = vmul.f32 %v9814_v18, %v4954_v26  ;;  %v4965_v44 = vmul.f32 %v9814_v18, %v4957_v51  ;;  %v5036_v21 = vadd.f32 %v5023_v49, %v4980_v5  ;;  %v8566_v5 = vld [vmem:[#allocation2 + $0x360] sm:$0xff]   ;;  %v8571_v26 = vld [vmem:[#allocation2 + $0x388] sm:$0xff]   ;;  %v8572_v51 = vld [vmem:[#allocation2 + $0x390] sm:$0xff]  }
0x1592   :  { %v4978_v2 = vadd.f32 %v4970_v30, %v4962_v9  ;;  %v4981_v13 = vadd.f32 %v4973_v16, %v4965_v44  ;;  %v4937_v36 = vpop.permute.xlu0 %4936  ;;  %v4927_v40 = vpop.permute.xlu1 %4926  ;;  %8739 = vtanh.f32 %v5036_v21  ;;  %v8569_v30 = vld [vmem:[#allocation2 + $0x378] sm:$0xff]  }
0x1593   :  { %v4955_v39 = vsel %vm1772_vm15, %v4937_v36, 0.0  ;;  %v4950_v10 = vsel %vm1772_vm15, %v4927_v40, 0.0  ;;  %v8573_v16 = vld [vmem:[#allocation2 + $0x398] sm:$0xff]  }
0x1594   :  { %v5037_v63 = vadd.f32 %v5028_v58, %v4981_v13  ;;  %v4963_v35 = vmul.f32 %v9814_v18, %v4955_v39  ;;  %v5034_v61 = vadd.f32 %v5013_v45, %v4978_v2  ;;  %v5032_v58 = vadd.f32 %v9799_v17, %v4976_v1 }
0x1595   :  { %v4958_v45 = vmul.f32 %v9814_v18, %v4950_v10 }
0x1596   :  { %v4979_v49 = vadd.f32 %v4971_v56, %v4963_v35  ;;  %8741 = vtanh.f32 %v5037_v63  ;;  %v4929_v47 = vpop.permute.xlu0 %4928 }
0x1597   :  { %8743 = vtanh.f32 %v5034_v61  ;;  %v4951_v27 = vsel %vm1772_vm15, %v4929_v47, 0.0  ;;  %v4974_v60 = vadd.f32 %v4966_v42, %v4958_v45  ;;  %v5412_v45 = vld [vmem:[#allocation4 + $0x238] sm:$0xff]  ;;  %v5947_v42 = vld [vmem:[#allocation4 + $0x280] sm:$0xff] }
0x1598   :  { %v5035_v15 = vadd.f32 %v9797_v59, %v4979_v49  ;;  %v4959_v59 = vmul.f32 %v9814_v18, %v4951_v27  ;;  %v5718_v27 = vld [vmem:[#allocation4 + $0x320] sm:$0xff] }
0x159a   :  { %8745 = vtanh.f32 %v5035_v15  ;;  %v4975_v17 = vadd.f32 %v4967_v7, %v4959_v59  ;;  %v5719_v59 = vld [vmem:[#allocation4 + $0x328] sm:$0xff] }
0x159b   :  { %8747 = vtanh.f32 %v5033_v37 }
0x159c   :  { %8749 = vtanh.f32 %v5032_v58  ;;  %v5720_v58 = vld [vmem:[#allocation4 + $0x330] sm:$0xff] }
0x159f   :  { %v4993_v12 = vpop.permute.xlu1 %4992  ;;  %v8740_v8 = vpop.eup %8739 }
0x15a0   :  { %v5030_v33 = vadd.f32 %v4993_v12, %v4974_v60  ;;  %v5948_v60 = vld [vmem:[#allocation4 + $0x288] sm:$0xff] }
0x15a1   :  { %v8575_v12 = vld [vmem:[#allocation2 + $0x4b0] sm:$0xff]  }
0x15a2   :  { %8751 = vtanh.f32 %v5030_v33 }
0x15a3   :  { %v4998_v29 = vpop.permute.xlu0 %4997  ;;  %v8742_v24 = vpop.eup %8741 }
0x15a4   :  { %v5031_v55 = vadd.f32 %v4998_v29, %v4975_v17  ;;  %v5073_v53 = vpack.c.bf16 %v8742_v24, %v8740_v8  ;;  %v8744_v4 = vpop.eup %8743  ;;  %v5452_v7 = vpop.permute.xlu1 %5451 }
0x15a6   :  { %8753 = vtanh.f32 %v5031_v55  ;;  %8203 = vmatprep.subr.bf16.mxu0 %v5073_v53 }
0x15a7   :  { %v8746_v54 = vpop.eup %8745  ;;  %8204 = vmatpush3.bf16.msra.mxu0 %v5073_v53  ;;  %v5457_v33 = vpop.permute.xlu0 %5456 }
0x15a8   :  { %v8748_v52 = vpop.eup %8747  ;;  %v5072_v3 = vpack.c.bf16 %v8746_v54, %v8744_v4  ;;  %v5442_v17 = vpop.permute.xlu1 %5441 }
0x15a9   :  { %v8750_v50 = vpop.eup %8749 }
0x15aa   :  { %8205 = vmatprep.subr.bf16.mxu0 %v5072_v3  ;;  %v5071_v38 = vpack.c.bf16 %v8748_v52, %v8750_v50 }
0x15ab   :  { %8206 = vmatpush3.bf16.msra.mxu0 %v5072_v3  ;;  %v5447_v8 = vpop.permute.xlu0 %5446 }
0x15ac   :  { %8207 = vmatprep.subr.bf16.mxu0 %v5071_v38  ;;  %v9891_v29 = vpop.permute.xlu1 %5431 }
0x15af   :  { %8208 = vmatpush3.bf16.msra.mxu0 %v5071_v38  ;;  %v8752_v0 = vpop.eup %8751  ;;  %v5437_v24 = vpop.permute.xlu0 %5436 }
0x15b3   :  { %v8754_v41 = vpop.eup %8753 }
0x15b4   :  { %v5070_v23 = vpack.c.bf16 %v8754_v41, %v8752_v0 }
0x15b6   :  { %8209 = vmatprep.subr.bf16.mxu0 %v5070_v23 }
0x15b7   :  { %8210 = vmatpush3.bf16.msra.mxu0 %v5070_v23 }
0x15ba   :  { %8212 = vmatmul.mubr.msk.bf16.vlgmr.msra.gmra.mxu0 %vm1962_vm14, %v8564_v57 }
0x15bb   :  { %8215 = vmatprep.mubr.msk.bf16.mxu0 %vm1962_vm14, %v8565_v34 }
0x15c2   :  { %8216 = vmatmul.mubr.msk.bf16.gmra.mxu0 %vm1962_vm14, %v8566_v5 }
0x15c3   :  { %8219 = vmatprep.mubr.msk.bf16.mxu0 %vm1962_vm14, %v8567_v20 }
0x15ca   :  { %8220 = vmatmul.mubr.msk.bf16.gmra.mxu0 %vm1962_vm14, %v8568_v6 }
0x15cb   :  { %8223 = vmatprep.mubr.msk.bf16.mxu0 %vm1962_vm14, %v8569_v30 }
0x15d2   :  { %8224 = vmatmul.mubr.msk.bf16.gmra.mxu0 %vm1962_vm14, %v8570_v62 }
0x15d3   :  { %8227 = vmatprep.mubr.msk.bf16.mxu0 %vm1962_vm14, %v8571_v26 }
0x15da   :  { %8228 = vmatmul.mubr.msk.bf16.gmra.mxu0 %vm1962_vm14, %v8572_v51 }
0x15db   :  { %8231 = vmatprep.mubr.msk.bf16.mxu0 %vm1962_vm14, %v8573_v16 }
0x15e2   :  { %8232 = vmatmul.mubr.msk.bf16.gmra.mxu0 %vm1962_vm14, %v8574_v32 }
0x15e3   :  { %8243 = vmatprep.mubr.msk.bf16.mxu0 %vm1962_vm14, %v8575_v12 }
0x167a   :  { %v8213_v9 = vpop.f32.mrf.mxu0 }
0x167b   :  { %5311 = vrot.lane.b32.xlu1 %v8213_v9, %s8860_s0 }
0x167c   :  { %v5204_v44 = vpop.f32.mrf.mxu0 }
0x167e   :  { %v8214_v25 = vpop.f32.mrf.mxu0 }
0x167f   :  { %5307 = vrot.lane.b32.xlu1 %v5204_v44, %s8860_s0  ;;  %5313 = vrot.lane.b32.xlu0 %v8214_v25, %s8860_s0 }
0x1680   :  { %v5207_v28 = vpop.f32.mrf.mxu0 }
0x1682   :  { %v8217_v21 = vpop.f32.mrf.mxu0 }
0x1683   :  { %5309 = vrot.lane.b32.xlu0 %v5207_v28, %s8860_s0  ;;  %5319 = vrot.lane.b32.xlu1 %v8217_v21, %s8860_s0 }
0x1684   :  { %v5220_v2 = vpop.f32.mrf.mxu0 }
0x1686   :  { %v8218_v13 = vpop.f32.mrf.mxu0 }
0x1687   :  { %5315 = vrot.lane.b32.xlu1 %v5220_v2, %s8860_s0  ;;  %5321 = vrot.lane.b32.xlu0 %v8218_v13, %s8860_s0 }
0x1688   :  { %v5223_v36 = vpop.f32.mrf.mxu0 }
0x168a   :  { %v9865_v48 = vpop.f32.mrf.mxu0 }
0x168b   :  { %5317 = vrot.lane.b32.xlu0 %v5223_v36, %s8860_s0 }
0x168c   :  { %v9868_v31 = vpop.f32.mrf.mxu0 }
0x168e   :  { %v9870_v39 = vpop.f32.mrf.mxu0 }
0x1690   :  { %v9872_v56 = vpop.f32.mrf.mxu0 }
0x1692   :  { %v9874_v63 = vpop.f32.mrf.mxu0 }
0x1694   :  { %v9876_v35 = vpop.f32.mrf.mxu0 }
0x1696   :  { %v9878_v1 = vpop.f32.mrf.mxu0 }
0x1698   :  { %v9880_v61 = vpop.f32.mrf.mxu0 }
0x169a   :  { %v8229_v40 = vpop.f32.mrf.mxu0 }
0x169b   :  { %5359 = vrot.lane.b32.xlu1 %v8229_v40, %s8861_s2 }
0x169c   :  { %v5268_v22 = vpop.f32.mrf.mxu0 }
0x169e   :  { %v8230_v49 = vpop.f32.mrf.mxu0 }
0x169f   :  { %5361 = vrot.lane.b32.xlu0 %v8230_v49, %s8861_s2 }
0x16a0   :  { %v5271_v37 = vpop.f32.mrf.mxu0 }
0x16a2   :  { %v8233_v10 = vpop.f32.mrf.mxu0 }
0x16a3   :  { %5367 = vrot.lane.b32.xlu1 %v8233_v10, %s8861_s2 }
0x16a4   :  { %v5284_v15 = vpop.f32.mrf.mxu0 }
0x16a6   :  { %v8234_v47 = vpop.f32.mrf.mxu0 }
0x16a7   :  { %5363 = vrot.lane.b32.xlu1 %v5284_v15, %s8861_s2  ;;  %5369 = vrot.lane.b32.xlu0 %v8234_v47, %s8861_s2 }
0x16a8   :  { %v5287_v43 = vpop.f32.mrf.mxu0 }
0x16ab   :  { %5355 = vrot.lane.b32.xlu1 %v5268_v22, %s8861_s2  ;;  %5365 = vrot.lane.b32.xlu0 %v5287_v43, %s8861_s2 }
0x16af   :  { %5421 = vperm.xlu1 %8420, %v5411_v19   ;;  %5357 = vrot.lane.b32.xlu0 %v5271_v37, %s8861_s2 }
0x16b3   :  { %5734 = vperm.xlu1 %8420, %v5720_v58   ;;  %5426 = vperm.xlu0 %8421, %v5412_v45  }
0x16b7   :  { %5724 = vperm.xlu1 %8420, %v5718_v27   ;;  %5739 = vperm.xlu0 %8421, %v5721_v46  }
0x16bb   :  { %5961 = vperm.xlu1 %8420, %v5947_v42   ;;  %5729 = vperm.xlu0 %8421, %v5719_v59  }
0x16bf   :  { %5966 = vperm.xlu0 %8421, %v5948_v60  }
0x16ed   :  { %v5312_v55 = vpop.permute.xlu1 %5311 }
0x16ee   :  { %v5333_v30 = vsel %vm119_vm3, 0.0, %v5312_v55 }
0x16ef   :  { %v5341_v28 = vmul.f32 %v9802_v14, %v5333_v30 }
0x16f1   :  { %v5314_v53 = vpop.permute.xlu0 %5313  ;;  %v5308_v4 = vpop.permute.xlu1 %5307  ;;  %v5397_v46 = vadd.f32 %v9865_v48, %v5341_v28  ;;  %v8578_v28 = vld [vmem:[#allocation2 + $0x4c8] sm:$0xff]  }
0x16f2   :  { %v5334_v20 = vsel %vm119_vm3, 0.0, %v5314_v53 }
0x16f3   :  { %v5342_v44 = vmul.f32 %v9802_v14, %v5334_v20 }
0x16f5   :  { %v5310_v54 = vpop.permute.xlu0 %5309  ;;  %v5320_v52 = vpop.permute.xlu1 %5319  ;;  %v5398_v43 = vadd.f32 %v9870_v39, %v5342_v44  ;;  %v5331_v39 = vsel %vm119_vm3, 0.0, %v5308_v4  ;;  %v8576_v44 = vld [vmem:[#allocation2 + $0x4b8] sm:$0xff]  }
0x16f6   :  { %v5337_v38 = vsel %vm119_vm3, 0.0, %v5320_v52 }
0x16f7   :  { %v5345_v23 = vmul.f32 %v9802_v14, %v5337_v38 }
0x16f9   :  { %v5322_v3 = vpop.permute.xlu0 %5321  ;;  %v5316_v50 = vpop.permute.xlu1 %5315  ;;  %v5401_v51 = vadd.f32 %v9874_v63, %v5345_v23 }
0x16fa   :  { %v5335_v57 = vsel %vm119_vm3, 0.0, %v5316_v50  ;;  %v5338_v34 = vsel %vm119_vm3, 0.0, %v5322_v3 }
0x16fb   :  { %v5343_v62 = vmul.f32 %v9802_v14, %v5335_v57  ;;  %v5346_v16 = vmul.f32 %v9802_v14, %v5338_v34 }
0x16fd   :  { %v5318_v0 = vpop.permute.xlu0 %5317  ;;  %v5399_v40 = vadd.f32 %v5343_v62, %v9876_v35  ;;  %v5402_v37 = vadd.f32 %v9878_v1, %v5346_v16 }
0x16fe   :  { %v5336_v25 = vsel %vm119_vm3, 0.0, %v5318_v0  ;;  %v5339_v0 = vmul.f32 %v9802_v14, %v5331_v39 }
0x16ff   :  { %v5344_v10 = vmul.f32 %v9802_v14, %v5336_v25  ;;  %v8577_v25 = vld [vmem:[#allocation2 + $0x4c0] sm:$0xff]  }
0x1701   :  { %v5400_v1 = vadd.f32 %v5344_v10, %v9880_v61  ;;  %v5332_v61 = vsel %vm119_vm3, 0.0, %v5310_v54 }
0x170d   :  { %v5360_v41 = vpop.permute.xlu1 %5359 }
0x170e   :  { %v5381_v21 = vsel %vm1772_vm15, %v5360_v41, 0.0  ;;  %v5395_v41 = vadd.f32 %v5339_v0, %v9868_v31 }
0x170f   :  { %v5389_v19 = vmul.f32 %v9814_v18, %v5381_v21  ;;  %v8579_v21 = vld [vmem:[#allocation2 + $0x598] sm:$0x1f]  }
0x1711   :  { %v5362_v5 = vpop.permute.xlu0 %5361  ;;  %v5405_v55 = vadd.f32 %v5397_v46, %v5389_v19 }
0x1712   :  { %v5382_v32 = vsel %vm1772_vm15, %v5362_v5, 0.0 }
0x1713   :  { %v5390_v63 = vmul.f32 %v9814_v18, %v5382_v32 }
0x1715   :  { %v5368_v6 = vpop.permute.xlu1 %5367  ;;  %v5406_v42 = vadd.f32 %v5398_v43, %v5390_v63 }
0x1716   :  { %v5385_v26 = vsel %vm1772_vm15, %v5368_v6, 0.0 }
0x1717   :  { %v5393_v9 = vmul.f32 %v9814_v18, %v5385_v26  ;;  %v5462_v3 = vadd.f32 %v5437_v24, %v5406_v42  ;;  %v5340_v24 = vmul.f32 %v9802_v14, %v5332_v61 }
0x1719   :  { %v5409_v2 = vadd.f32 %v5401_v51, %v5393_v9  ;;  %v5364_v13 = vpop.permute.xlu1 %5363  ;;  %v5370_v36 = vpop.permute.xlu0 %5369  ;;  %v5396_v54 = vadd.f32 %v5340_v24, %v9872_v56  ;;  %v8582_v24 = vld [vmem:[#allocation2 + $0x3b8] sm:$0xff]  }
0x171a   :  { %v5383_v22 = vsel %vm1772_vm15, %v5364_v13, 0.0  ;;  %v5386_v49 = vsel %vm1772_vm15, %v5370_v36, 0.0 }
0x171b   :  { %v5391_v15 = vmul.f32 %v9814_v18, %v5383_v22  ;;  %v5394_v47 = vmul.f32 %v9814_v18, %v5386_v49  ;;  %v5465_v58 = vadd.f32 %v5452_v7, %v5409_v2  ;;  %v5667_v2 = vsel %vm2328_vm7, %v8579_v21, 0 }
0x171d   :  { %v5407_v35 = vadd.f32 %v5399_v40, %v5391_v15  ;;  %v5410_v45 = vadd.f32 %v5402_v37, %v5394_v47  ;;  %v5366_v27 = vpop.permute.xlu0 %5365  ;;  %v5356_v52 = vpop.permute.xlu1 %5355  ;;  %8755 = vtanh.f32 %v5465_v58  ;;  %v10142_v58 = vld [vmem:[#allocation10_spill] sm:$0xff] }
0x171e   :  { %v5384_v59 = vsel %vm1772_vm15, %v5366_v27, 0.0  ;;  %v5379_v50 = vsel %vm1772_vm15, %v5356_v52, 0.0 }
0x171f   :  { %v5466_v60 = vadd.f32 %v5457_v33, %v5410_v45  ;;  %v5392_v12 = vmul.f32 %v9814_v18, %v5384_v59  ;;  %v5463_v53 = vadd.f32 %v5442_v17, %v5407_v35  ;;  %v5461_v33 = vadd.f32 %v9891_v29, %v5405_v55  ;;  %v8580_v35 = vld [vmem:[#allocation2 + $0x3a8] sm:$0xff]  }
0x1720   :  { %v5387_v17 = vmul.f32 %v9814_v18, %v5379_v50 }
0x1721   :  { %v5408_v7 = vadd.f32 %v5400_v1, %v5392_v12  ;;  %8757 = vtanh.f32 %v5466_v60  ;;  %v5358_v38 = vpop.permute.xlu0 %5357 }
0x1722   :  { %8759 = vtanh.f32 %v5463_v53  ;;  %v5380_v4 = vsel %vm1772_vm15, %v5358_v38, 0.0  ;;  %v5403_v23 = vadd.f32 %v5395_v41, %v5387_v17  ;;  %v10143_v41 = vmov 0.0  }
0x1723   :  { %v5464_v48 = vadd.f32 %v5447_v8, %v5408_v7  ;;  %v5388_v8 = vmul.f32 %v9814_v18, %v5380_v4  ;;  %v8581_v4 = vld [vmem:[#allocation2 + $0x3b0] sm:$0xff]  }
0x1725   :  { %8761 = vtanh.f32 %v5464_v48  ;;  %v5404_v29 = vadd.f32 %v5396_v54, %v5388_v8  ;;  %v8583_v8 = vld [vmem:[#allocation2 + $0x3c0] sm:$0xff]  }
0x1726   :  { %8763 = vtanh.f32 %v5462_v3 }
0x1727   :  { %8765 = vtanh.f32 %v5461_v33 }
0x172a   :  { %v5422_v57 = vpop.permute.xlu1 %5421  ;;  %v8756_v5 = vpop.eup %8755 }
0x172b   :  { %v5459_v34 = vadd.f32 %v5422_v57, %v5403_v23  ;;  %v8584_v23 = vld [vmem:[#allocation2 + $0x3c8] sm:$0xff]   ;;  %v8585_v57 = vld [vmem:[#allocation2 + $0x3d0] sm:$0xff]  }
0x172d   :  { %8767 = vtanh.f32 %v5459_v34 }
0x172e   :  { %v5427_v20 = vpop.permute.xlu0 %5426  ;;  %v8758_v6 = vpop.eup %8757 }
0x172f   :  { %v5460_v30 = vadd.f32 %v5427_v20, %v5404_v29  ;;  %v5486_v62 = vpack.c.bf16 %v8758_v6, %v8756_v5  ;;  %v8760_v26 = vpop.eup %8759  ;;  %v5735_v42 = vpop.permute.xlu1 %5734 }
0x1731   :  { %8769 = vtanh.f32 %v5460_v30  ;;  %8235 = vmatprep.subr.bf16.mxu0 %v5486_v62 }
0x1732   :  { %v8762_v14 = vpop.eup %8761  ;;  %8236 = vmatpush3.bf16.msra.mxu0 %v5486_v62  ;;  %v5740_v59 = vpop.permute.xlu0 %5739 }
0x1733   :  { %v8764_v31 = vpop.eup %8763  ;;  %v5485_v51 = vpack.c.bf16 %v8762_v14, %v8760_v26  ;;  %v5725_v48 = vpop.permute.xlu1 %5724 }
0x1734   :  { %v8766_v18 = vpop.eup %8765 }
0x1735   :  { %8237 = vmatprep.subr.bf16.mxu0 %v5485_v51  ;;  %v5484_v16 = vpack.c.bf16 %v8764_v31, %v8766_v18 }
0x1736   :  { %8238 = vmatpush3.bf16.msra.mxu0 %v5485_v51  ;;  %v5730_v38 = vpop.permute.xlu0 %5729  ;;  %v5945_v51 = vld [vmem:[#allocation4 + $0x270] sm:$0xff] }
0x1737   :  { %8239 = vmatprep.subr.bf16.mxu0 %v5484_v16 }
0x173a   :  { %8240 = vmatpush3.bf16.msra.mxu0 %v5484_v16  ;;  %v8768_v56 = vpop.eup %8767  ;;  %v6178_v16 = vld [vmem:[#allocation4 + $0x2a0] sm:$0xff] }
0x173e   :  { %v8770_v32 = vpop.eup %8769 }
0x173f   :  { %v5483_v9 = vpack.c.bf16 %v8770_v32, %v8768_v56  ;;  %v5946_v56 = vld [vmem:[#allocation4 + $0x278] sm:$0xff]  ;;  %v6179_v32 = vld [vmem:[#allocation4 + $0x2a8] sm:$0xff] }
0x1741   :  { %8241 = vmatprep.subr.bf16.mxu0 %v5483_v9 }
0x1742   :  { %8242 = vmatpush3.bf16.msra.mxu0 %v5483_v9  ;;  %v8586_v9 = vld [vmem:[#allocation2 + $0x3d8] sm:$0xff]  }
0x1743   :  { %8407 = vmatprep.subr.msk.bf16.mxu0 %vm2328_vm7, %v8579_v21 }
0x1745   :  { %8244 = vmatmul.mubr.msk.bf16.vlgmr.msra.gmra.mxu0 %vm1962_vm14, %v8576_v44  ;;  %v5962_v44 = vpop.permute.xlu1 %5961 }
0x1746   :  { %8247 = vmatprep.mubr.msk.bf16.mxu0 %vm1962_vm14, %v8577_v25  ;;  %8258 = vmatpush3.bf16.msra.mxu0 %v5667_v2  ;;  %v5967_v25 = vpop.permute.xlu0 %5966 }
0x174d   :  { %8248 = vmatmul.mubr.msk.bf16.gmra.mxu0 %vm1962_vm14, %v8578_v28 }
0x1805   :  { %v8245_v13 = vpop.f32.mrf.mxu0 }
0x1807   :  { %v5553_v36 = vpop.f32.mrf.mxu0 }
0x1809   :  { %v8246_v40 = vpop.f32.mrf.mxu0 }
0x180a   :  { %v5587_v49 = vpack.c.bf16 %v8246_v40, %v8245_v13 }
0x180b   :  { %v5556_v63 = vpop.f32.mrf.mxu0 }
0x180c   :  { %v5586_v22 = vpack.c.bf16 %v5556_v63, %v5553_v36  ;;  %v9965_v36 = vld [vmem:[#allocation4 + $0x380] ss:$0 sm:$0xff] }
0x180d   :  { %v8249_v37 = vpop.f32.mrf.mxu0 }
0x180e   :  { %8259 = vmatprep.mubr.msk.bf16.mxu0 %vm2315_vm4, %v5586_v22 }
0x180f   :  { %v5569_v10 = vpop.f32.mrf.mxu0  ;;  %8260 = vmatmul.mubr.msk.bf16.vlgmr.msra.gmra.mxu0 %vm2315_vm4, %v5587_v49 }
0x1810   :  { %8287 = vmatprep.mubr.msk.bf16.mxu0 %vm1107_vm11, %v8586_v9 }
0x1811   :  { %v8250_v15 = vpop.f32.mrf.mxu0 }
0x1812   :  { %v5591_v19 = vpack.c.bf16 %v8250_v15, %v8249_v37 }
0x1813   :  { %v5572_v47 = vpop.f32.mrf.mxu0 }
0x1814   :  { %v5590_v43 = vpack.c.bf16 %v5572_v47, %v5569_v10  ;;  %v9971_v47 = vld [vmem:[#allocation4 + $0x388] ss:$0 sm:$0xff] }
0x1816   :  { %8253 = vmatprep.mubr.msk.bf16.mxu1 %vm2315_vm4, %v5590_v43 }
0x1817   :  { %8254 = vmatmul.mubr.msk.bf16.vlgmr.msra.gmra.mxu1 %vm2315_vm4, %v5591_v19  ;;  %vm10149_vm4 = vmmov %vm10147_vm1 }
0x1818   :  { %8264 = vmatpush3.bf16.msra.mxu1 %v10141_v11  ;;  %8271 = vmatprep.mubr.msk.bf16.mxu1 %vm1962_vm14, %v8580_v35 }
0x1819   :  { %8265 = vmatprep.subr.bf16.mxu1 %v10142_v58 }
0x181c   :  { %8266 = vmatpush3.bf16.msra.mxu1 %v10142_v58 }
0x18cf   :  { %v8261_v45 = vpop.f32.mrf.mxu0 }
0x18d1   :  { %v5703_v27 = vpop.f32.mrf.mxu0 }
0x18d3   :  { %v8262_v60 = vpop.f32.mrf.mxu0 }
0x18d5   :  { %v5706_v11 = vpop.f32.mrf.mxu0 }
0x18d7   :  { %v8255_v46 = vpop.f32.mrf.mxu1 }
0x18d8   :  { %v5712_v12 = vadd.f32 %v8261_v45, %v8255_v46 }
0x18d9   :  { %v5640_v1 = vpop.f32.mrf.mxu1 }
0x18da   :  { %v5704_v53 = vadd.f32 %v5703_v27, %v5640_v1  ;;  %v5744_v7 = vadd.f32 %v5735_v42, %v5712_v12 }
0x18db   :  { %v8256_v55 = vpop.f32.mrf.mxu1 }
0x18dc   :  { %v5715_v52 = vadd.f32 %v8262_v60, %v8256_v55  ;;  %v5742_v0 = vadd.f32 %v5725_v48, %v5704_v53 }
0x18dd   :  { %v5643_v39 = vpop.f32.mrf.mxu1 }
0x18de   :  { %v5745_v3 = vadd.f32 %v5740_v59, %v5715_v52  ;;  %v5707_v50 = vadd.f32 %v5706_v11, %v5643_v39 }
0x18e0   :  { %v5743_v61 = vadd.f32 %v5730_v38, %v5707_v50  ;;  %v5759_v33 = vpack.c.bf16 %v5745_v3, %v5744_v7 }
0x18e2   :  { %8267 = vmatprep.subr.bf16.mxu1 %v5759_v33  ;;  %v5758_v17 = vpack.c.bf16 %v5743_v61, %v5742_v0 }
0x18e3   :  { %8268 = vmatpush3.bf16.msra.mxu1 %v5759_v33 }
0x18e4   :  { %8269 = vmatprep.subr.bf16.mxu1 %v5758_v17 }
0x18e7   :  { %8270 = vmatpush3.bf16.msra.mxu1 %v5758_v17 }
0x18e8   :  { %8307 = vmatprep.subr.bf16.mxu1 %v10143_v41 }
0x18ea   :  { %8272 = vmatmul.mubr.msk.bf16.vlgmr.msra.gmra.mxu1 %vm1962_vm14, %v8581_v4 }
0x18eb   :  { %8275 = vmatprep.mubr.msk.bf16.mxu1 %vm1962_vm14, %v8582_v24 }
0x18f2   :  { %8276 = vmatmul.mubr.msk.bf16.gmra.mxu1 %vm1962_vm14, %v8583_v8 }
0x18f3   :  { %8279 = vmatprep.mubr.msk.bf16.mxu1 %vm1962_vm14, %v8584_v23 }
0x18fa   :  { %8280 = vmatmul.mubr.msk.bf16.gmra.mxu1 %vm1962_vm14, %v8585_v57 }
0x18fb   :  { %8311 = vmatprep.mubr.msk.bf16.mxu1 %vm8863_vm6, %v10143_v41 }
0x19aa   :  { %v8273_v54 = vpop.f32.mrf.mxu1 }
0x19ab   :  { %5897 = vrot.lane.b32.xlu1 %v8273_v54, %s8860_s0 }
0x19ac   :  { %v5842_v34 = vpop.f32.mrf.mxu1 }
0x19ae   :  { %v8274_v29 = vpop.f32.mrf.mxu1 }
0x19af   :  { %5893 = vrot.lane.b32.xlu1 %v5842_v34, %s8860_s0  ;;  %5899 = vrot.lane.b32.xlu0 %v8274_v29, %s8860_s0  ;;  %v8587_v29 = vld [vmem:[#allocation2 + $0x3e0] sm:$0xff]  }
0x19b0   :  { %v5845_v5 = vpop.f32.mrf.mxu1 }
0x19b2   :  { %v8277_v20 = vpop.f32.mrf.mxu1 }
0x19b3   :  { %5895 = vrot.lane.b32.xlu0 %v5845_v5, %s8860_s0  ;;  %v8588_v5 = vld [vmem:[#allocation2 + $0x3e8] sm:$0xff]  }
0x19b4   :  { %v5858_v6 = vpop.f32.mrf.mxu1 }
0x19b6   :  { %v8278_v30 = vpop.f32.mrf.mxu1 }
0x19b8   :  { %v5861_v62 = vpop.f32.mrf.mxu1 }
0x19ba   :  { %v8281_v26 = vpop.f32.mrf.mxu1 }
0x19bb   :  { %5921 = vrot.lane.b32.xlu1 %v8281_v26, %s8861_s2 }
0x19bc   :  { %v5874_v14 = vpop.f32.mrf.mxu1 }
0x19be   :  { %v8282_v31 = vpop.f32.mrf.mxu1 }
0x19bf   :  { %5917 = vrot.lane.b32.xlu1 %v5874_v14, %s8861_s2  ;;  %5923 = vrot.lane.b32.xlu0 %v8282_v31, %s8861_s2 }
0x19c0   :  { %v5877_v18 = vpop.f32.mrf.mxu1 }
0x19c3   :  { %5951 = vperm.xlu1 %8420, %v5945_v51   ;;  %5919 = vrot.lane.b32.xlu0 %v5877_v18, %s8861_s2 }
0x19c7   :  { %6192 = vperm.xlu1 %8420, %v6178_v16   ;;  %5956 = vperm.xlu0 %8421, %v5946_v56  }
0x19cb   :  { %6197 = vperm.xlu0 %8421, %v6179_v32  }
0x1a1d   :  { %v5898_v28 = vpop.permute.xlu1 %5897 }
0x1a1e   :  { %v5907_v2 = vsel %vm119_vm3, 0.0, %v5898_v28 }
0x1a1f   :  { %v5911_v40 = vmul.f32 %v9965_v36, %v5907_v2  ;;  %v6177_v2 = vld [vmem:[#allocation4 + $0x298] sm:$0xff] }
0x1a21   :  { %v5900_v21 = vpop.permute.xlu0 %5899  ;;  %v5894_v13 = vpop.permute.xlu1 %5893  ;;  %v5939_v10 = vadd.f32 %v8277_v20, %v5911_v40  ;;  %v8589_v20 = vld [vmem:[#allocation2 + $0x3f0] sm:$0xff]  }
0x1a22   :  { %v5908_v63 = vsel %vm119_vm3, 0.0, %v5900_v21  ;;  %v5905_v59 = vsel %vm119_vm3, 0.0, %v5894_v13  ;;  %v6399_v21 = vld [vmem:[#allocation4 + $0x340] sm:$0xff]  ;;  %v6400_v13 = vld [vmem:[#allocation4 + $0x348] sm:$0xff] }
0x1a23   :  { %v5912_v15 = vmul.f32 %v9965_v36, %v5908_v63  ;;  %v5909_v53 = vmul.f32 %v9965_v36, %v5905_v59  ;;  %v8592_v40 = vld [vmem:[#allocation2 + $0x4d0] sm:$0xff]   ;;  %v8594_v63 = vld [vmem:[#allocation2 + $0x5bc] ss:$0 sps:$4 sm:$0x33]  }
0x1a25   :  { %v5896_v22 = vpop.permute.xlu0 %5895  ;;  %v5940_v45 = vadd.f32 %v8278_v30, %v5912_v15  ;;  %v5937_v3 = vadd.f32 %v5909_v53, %v5858_v6  ;;  %v8590_v6 = vld [vmem:[#allocation2 + $0x3f8] sm:$0xff]   ;;  %v8591_v30 = vld [vmem:[#allocation2 + $0x400] sm:$0xff]  }
0x1a26   :  { %v5906_v52 = vsel %vm119_vm3, 0.0, %v5896_v22  ;;  %v6300_v22 = vsel %vm63_vm0, %v8594_v63, 0 }
0x1a27   :  { %v5910_v7 = vmul.f32 %v9965_v36, %v5906_v52  ;;  %8308 = vmatpush3.bf16.msra.mxu1 %v6300_v22 }
0x1a28   :  { %8309 = vmatprep.subr.bf16.mxu1 %v10143_v41 }
0x1a29   :  { %v5938_v0 = vadd.f32 %v5910_v7, %v5861_v62 }
0x1a2d   :  { %v5922_v49 = vpop.permute.xlu1 %5921 }
0x1a2e   :  { %v5931_v37 = vsel %vm1009_vm12, %v5922_v49, 0.0 }
0x1a2f   :  { %v5935_v43 = vmul.f32 %v9971_v47, %v5931_v37 }
0x1a31   :  { %v5943_v19 = vadd.f32 %v5939_v10, %v5935_v43  ;;  %v5924_v58 = vpop.permute.xlu0 %5923  ;;  %v5918_v42 = vpop.permute.xlu1 %5917 }
0x1a32   :  { %v5932_v35 = vsel %vm1009_vm12, %v5924_v58, 0.0  ;;  %v5929_v60 = vsel %vm1009_vm12, %v5918_v42, 0.0 }
0x1a33   :  { %v5936_v27 = vmul.f32 %v9971_v47, %v5932_v35  ;;  %v5971_v46 = vadd.f32 %v5962_v44, %v5943_v19  ;;  %v5933_v39 = vmul.f32 %v9971_v47, %v5929_v60 }
0x1a35   :  { %v5944_v1 = vadd.f32 %v5940_v45, %v5936_v27  ;;  %v5920_v55 = vpop.permute.xlu0 %5919  ;;  %8771 = vtanh.f32 %v5971_v46  ;;  %v5941_v48 = vadd.f32 %v5937_v3, %v5933_v39 }
0x1a36   :  { %v5930_v11 = vsel %vm1009_vm12, %v5920_v55, 0.0 }
0x1a37   :  { %v5972_v12 = vadd.f32 %v5967_v25, %v5944_v1  ;;  %v5934_v50 = vmul.f32 %v9971_v47, %v5930_v11  ;;  %v6176_v25 = vld [vmem:[#allocation4 + $0x290] sm:$0xff] }
0x1a39   :  { %8773 = vtanh.f32 %v5972_v12  ;;  %v5942_v33 = vadd.f32 %v5938_v0, %v5934_v50 }
0x1a3e   :  { %v5952_v38 = vpop.permute.xlu1 %5951 }
0x1a3f   :  { %v5969_v61 = vadd.f32 %v5952_v38, %v5941_v48 }
0x1a41   :  { %8775 = vtanh.f32 %v5969_v61 }
0x1a42   :  { %v5957_v17 = vpop.permute.xlu0 %5956  ;;  %v8772_v24 = vpop.eup %8771 }
0x1a43   :  { %v5970_v4 = vadd.f32 %v5957_v17, %v5942_v33  ;;  %v6193_v49 = vpop.permute.xlu1 %6192 }
0x1a45   :  { %8777 = vtanh.f32 %v5970_v4 }
0x1a46   :  { %v8774_v8 = vpop.eup %8773  ;;  %v6198_v37 = vpop.permute.xlu0 %6197 }
0x1a47   :  { %v5990_v23 = vpack.c.bf16 %v8774_v8, %v8772_v24 }
0x1a49   :  { %8283 = vmatprep.subr.bf16.mxu0 %v5990_v23 }
0x1a4a   :  { %8284 = vmatpush3.bf16.msra.mxu0 %v5990_v23 }
0x1a4e   :  { %v8776_v57 = vpop.eup %8775 }
0x1a52   :  { %v8778_v54 = vpop.eup %8777 }
0x1a53   :  { %v5989_v34 = vpack.c.bf16 %v8778_v54, %v8776_v57 }
0x1a55   :  { %8285 = vmatprep.subr.bf16.mxu0 %v5989_v34 }
0x1a56   :  { %8286 = vmatpush3.bf16.msra.mxu0 %v5989_v34 }
0x1a59   :  { %8288 = vmatmul.mubr.msk.bf16.vlgmr.msra.gmra.mxu0 %vm1107_vm11, %v8587_v29 }
0x1a5a   :  { %8291 = vmatprep.mubr.msk.bf16.mxu0 %vm1107_vm11, %v8588_v5 }
0x1a61   :  { %8292 = vmatmul.mubr.msk.bf16.gmra.mxu0 %vm1107_vm11, %v8589_v20 }
0x1a62   :  { %8295 = vmatprep.mubr.msk.bf16.mxu0 %vm1107_vm11, %v8590_v6 }
0x1a69   :  { %8296 = vmatmul.mubr.msk.bf16.gmra.mxu0 %vm1107_vm11, %v8591_v30 }
0x1a6a   :  { %8303 = vmatprep.mubr.msk.bf16.mxu0 %vm1107_vm11, %v8592_v40 }
0x1b19   :  { %v8289_v62 = vpop.f32.mrf.mxu0 }
0x1b1a   :  { %6128 = vrot.lane.b32.xlu1 %v8289_v62, %s8860_s0 }
0x1b1b   :  { %v6073_v26 = vpop.f32.mrf.mxu0 }
0x1b1d   :  { %v8290_v14 = vpop.f32.mrf.mxu0 }
0x1b1e   :  { %6124 = vrot.lane.b32.xlu1 %v6073_v26, %s8860_s0  ;;  %6130 = vrot.lane.b32.xlu0 %v8290_v14, %s8860_s0 }
0x1b1f   :  { %v6076_v31 = vpop.f32.mrf.mxu0 }
0x1b21   :  { %v8293_v51 = vpop.f32.mrf.mxu0 }
0x1b22   :  { %6126 = vrot.lane.b32.xlu0 %v6076_v31, %s8860_s0  ;;  %v8593_v31 = vld [vmem:[#allocation2 + $0x4d8] sm:$0xff]  }
0x1b23   :  { %v6089_v18 = vpop.f32.mrf.mxu0 }
0x1b25   :  { %v8294_v16 = vpop.f32.mrf.mxu0 }
0x1b27   :  { %v6092_v56 = vpop.f32.mrf.mxu0 }
0x1b29   :  { %v8297_v32 = vpop.f32.mrf.mxu0 }
0x1b2a   :  { %6152 = vrot.lane.b32.xlu1 %v8297_v32, %s8861_s2 }
0x1b2b   :  { %v6105_v9 = vpop.f32.mrf.mxu0 }
0x1b2d   :  { %v8298_v44 = vpop.f32.mrf.mxu0 }
0x1b2e   :  { %6148 = vrot.lane.b32.xlu1 %v6105_v9, %s8861_s2  ;;  %6154 = vrot.lane.b32.xlu0 %v8298_v44, %s8861_s2 }
0x1b2f   :  { %v6108_v28 = vpop.f32.mrf.mxu0 }
0x1b32   :  { %6182 = vperm.xlu1 %8420, %v6176_v25   ;;  %6150 = vrot.lane.b32.xlu0 %v6108_v28, %s8861_s2 }
0x1b36   :  { %6403 = vperm.xlu1 %8420, %v6399_v21   ;;  %6187 = vperm.xlu0 %8421, %v6177_v2   ;;  %v10144_v21 = vld [vmem:[#allocation9_spill] sm:$0xff] }
0x1b3a   :  { %6408 = vperm.xlu0 %8421, %v6400_v13  }
0x1b8c   :  { %v6129_v10 = vpop.permute.xlu1 %6128 }
0x1b8d   :  { %v6138_v43 = vsel %vm119_vm3, 0.0, %v6129_v10 }
0x1b8e   :  { %v6142_v58 = vmul.f32 %v9965_v36, %v6138_v43 }
0x1b90   :  { %v6131_v15 = vpop.permute.xlu0 %6130  ;;  %v6125_v19 = vpop.permute.xlu1 %6124  ;;  %v6170_v42 = vadd.f32 %v8293_v51, %v6142_v58 }
0x1b91   :  { %v6139_v35 = vsel %vm119_vm3, 0.0, %v6131_v15  ;;  %v6136_v7 = vsel %vm119_vm3, 0.0, %v6125_v19 }
0x1b92   :  { %v6143_v59 = vmul.f32 %v9965_v36, %v6139_v35  ;;  %v6140_v0 = vmul.f32 %v9965_v36, %v6136_v7 }
0x1b94   :  { %v6127_v45 = vpop.permute.xlu0 %6126  ;;  %v6171_v53 = vadd.f32 %v8294_v16, %v6143_v59  ;;  %v6168_v24 = vadd.f32 %v6140_v0, %v6089_v18  ;;  %v8596_v18 = vld [vmem:[#allocation2 + $0x5b4] sm:$0xff]   ;;  %v8597_v16 = vld [vmem:[#allocation2 + $0x5a8] sm:$0xff]  }
0x1b95   :  { %v6137_v61 = vsel %vm119_vm3, 0.0, %v6127_v45  ;;  %8310 = vmatpush3.bf16.msra.mxu1 %v8596_v18  ;;  %v8600_v59 = vld [vmem:[#allocation2 + $0x418] sm:$0xff]  }
0x1b96   :  { %v6141_v4 = vmul.f32 %v9965_v36, %v6137_v61  ;;  %8323 = vmatprep.subr.bf16.mxu1 %v10143_v41 }
0x1b98   :  { %v6169_v54 = vadd.f32 %v6141_v4, %v6092_v56 }
0x1b9c   :  { %v6153_v27 = vpop.permute.xlu1 %6152 }
0x1b9d   :  { %v6162_v46 = vsel %vm1009_vm12, %v6153_v27, 0.0 }
0x1b9e   :  { %v6166_v1 = vmul.f32 %v9971_v47, %v6162_v46  ;;  %v8598_v46 = vld [vmem:[#allocation2 + $0x408] sm:$0xff]  }
0x1ba0   :  { %v6174_v60 = vadd.f32 %v6170_v42, %v6166_v1  ;;  %v6155_v12 = vpop.permute.xlu0 %6154  ;;  %v6149_v11 = vpop.permute.xlu1 %6148  ;;  %v8599_v42 = vld [vmem:[#allocation2 + $0x410] sm:$0xff]  }
0x1ba1   :  { %v6163_v55 = vsel %vm1009_vm12, %v6155_v12, 0.0  ;;  %v6160_v50 = vsel %vm1009_vm12, %v6149_v11, 0.0 }
0x1ba2   :  { %v6167_v52 = vmul.f32 %v9971_v47, %v6163_v55  ;;  %v6202_v39 = vadd.f32 %v6193_v49, %v6174_v60  ;;  %v6164_v33 = vmul.f32 %v9971_v47, %v6160_v50  ;;  %v6529_v50 = vld [vmem:[#allocation4 + $0x2b0] sm:$0xff] }
0x1ba4   :  { %v6175_v3 = vadd.f32 %v6171_v53, %v6167_v52  ;;  %v6151_v38 = vpop.permute.xlu0 %6150  ;;  %8779 = vtanh.f32 %v6202_v39  ;;  %v6172_v23 = vadd.f32 %v6168_v24, %v6164_v33 }
0x1ba5   :  { %v6161_v17 = vsel %vm1009_vm12, %v6151_v38, 0.0  ;;  %v6530_v38 = vld [vmem:[#allocation4 + $0x2b8] sm:$0xff] }
0x1ba6   :  { %v6203_v48 = vadd.f32 %v6198_v37, %v6175_v3  ;;  %v6165_v8 = vmul.f32 %v9971_v47, %v6161_v17  ;;  %v8595_v47 = vld [vmem:[#allocation2 + $0x5b0] ss:$0 sps:$4 sm:$0x33]  }
0x1ba7   :  { %v6356_v51 = vsel %vm63_vm0, %v8595_v47, 0  ;;  %vm10146_vm0 = vcmask 64512  }
0x1ba8   :  { %8781 = vtanh.f32 %v6203_v48  ;;  %v6173_v29 = vadd.f32 %v6169_v54, %v6165_v8  ;;  %vm10148_vm2 = vmmov %vm10146_vm0 }
0x1bad   :  { %v6183_v57 = vpop.permute.xlu1 %6182 }
0x1bae   :  { %v6200_v34 = vadd.f32 %v6183_v57, %v6172_v23  ;;  %v10048_v23 = vld [vmem:[#allocation4 + $0x370] ss:$0 sm:$0xff] }
0x1bb0   :  { %8783 = vtanh.f32 %v6200_v34  ;;  %v10052_v34 = vld [vmem:[#allocation4 + $0x378] ss:$0 sm:$0xff] }
0x1bb1   :  { %v6188_v5 = vpop.permute.xlu0 %6187  ;;  %v8780_v6 = vpop.eup %8779 }
0x1bb2   :  { %v6201_v20 = vadd.f32 %v6188_v5, %v6173_v29  ;;  %v6404_v15 = vpop.permute.xlu1 %6403 }
0x1bb4   :  { %8785 = vtanh.f32 %v6201_v20 }
0x1bb5   :  { %v8782_v30 = vpop.eup %8781  ;;  %v6409_v19 = vpop.permute.xlu0 %6408 }
0x1bb6   :  { %v6213_v62 = vpack.c.bf16 %v8782_v30, %v8780_v6 }
0x1bb8   :  { %8299 = vmatprep.subr.bf16.mxu0 %v6213_v62 }
0x1bb9   :  { %8300 = vmatpush3.bf16.msra.mxu0 %v6213_v62 }
0x1bbd   :  { %v8784_v26 = vpop.eup %8783 }
0x1bc1   :  { %v8786_v14 = vpop.eup %8785 }
0x1bc2   :  { %v6212_v36 = vpack.c.bf16 %v8786_v14, %v8784_v26 }
0x1bc4   :  { %8301 = vmatprep.subr.bf16.mxu0 %v6212_v36 }
0x1bc5   :  { %8302 = vmatpush3.bf16.msra.mxu0 %v6212_v36 }
0x1bc6   :  { %8315 = vmatprep.subr.bf16.mxu0 %v10143_v41 }
0x1bc8   :  { %8304 = vmatmul.mubr.msk.bf16.vlgmr.msra.gmra.mxu0 %vm1107_vm11, %v8593_v31 }
0x1bc9   :  { %8319 = vmatprep.mubr.msk.bf16.mxu0 %vm8863_vm6, %v10143_v41  ;;  %8316 = vmatpush3.bf16.msra.mxu0 %v6356_v51 }
0x1bca   :  { %8317 = vmatprep.subr.bf16.mxu0 %v10143_v41 }
0x1bcd   :  { %8318 = vmatpush3.bf16.msra.mxu0 %v8597_v16 }
0x1bce   :  { %8339 = vmatprep.subr.bf16.mxu0 %v10143_v41 }
0x1c88   :  { %v8305_v56 = vpop.f32.mrf.mxu0 }
0x1c8a   :  { %v6264_v32 = vpop.f32.mrf.mxu0 }
0x1c8c   :  { %v8306_v9 = vpop.f32.mrf.mxu0 }
0x1c8d   :  { %v6286_v44 = vpack.c.bf16 %v8306_v9, %v8305_v56  ;;  %v8602_v9 = vld [vmem:[#allocation2 + $0x428] sm:$0xff]  }
0x1c8e   :  { %v6267_v25 = vpop.f32.mrf.mxu0 }
0x1c8f   :  { %v6282_v28 = vpack.c.bf16 %v6267_v25, %v6264_v32  ;;  %8312 = vmatmul.mubr.msk.bf16.vlgmr.msra.gmra.mxu1 %vm1309_vm13, %v6286_v44  ;;  %v8601_v32 = vld [vmem:[#allocation2 + $0x420] sm:$0xff]   ;;  %v8603_v44 = vld [vmem:[#allocation2 + $0x430] sm:$0xff]  }
0x1c90   :  { %8324 = vmatpush3.bf16.msra.mxu1 %v10144_v21  ;;  %8327 = vmatprep.mubr.msk.bf16.mxu1 %vm8863_vm6, %v10143_v41 }
0x1c91   :  { %8320 = vmatmul.mubr.msk.bf16.vlgmr.msra.gmra.mxu0 %vm1309_vm13, %v6282_v28  ;;  %8325 = vmatprep.subr.bf16.mxu1 %v10143_v41 }
0x1c92   :  { %8341 = vmatprep.mubr.msk.bf16.mxu0 %vm8863_vm6, %v10143_v41 }
0x1d4f   :  { %v6336_v2 = vpop.f32.mrf.mxu1 }
0x1d51   :  { %v6392_v13 = vpop.f32.mrf.mxu0  ;;  %v8313_v40 = vpop.f32.mrf.mxu1 }
0x1d52   :  { %v6393_v49 = vadd.f32 %v6392_v13, %v6336_v2 }
0x1d53   :  { %v8321_v63 = vpop.f32.mrf.mxu0  ;;  %v6339_v22 = vpop.f32.mrf.mxu1 }
0x1d54   :  { %v6411_v35 = vadd.f32 %v6404_v15, %v6393_v49 }
0x1d55   :  { %v6395_v37 = vpop.f32.mrf.mxu0  ;;  %v8314_v10 = vpop.f32.mrf.mxu1 }
0x1d56   :  { %v6396_v43 = vadd.f32 %v6395_v37, %v6339_v22  ;;  %v6661_v10 = vld [vmem:[#allocation4 + $0x2c0] sm:$0xff] }
0x1d57   :  { %v8322_v58 = vpop.f32.mrf.mxu0 }
0x1d58   :  { %v6412_v45 = vadd.f32 %v6409_v19, %v6396_v43  ;;  %v6863_v43 = vld [vmem:[#allocation4 + $0x350] sm:$0xff]  ;;  %v6662_v19 = vld [vmem:[#allocation4 + $0x2c8] sm:$0xff] }
0x1d5a   :  { %v6419_v27 = vpack.c.bf16 %v6412_v45, %v6411_v35  ;;  %v8605_v35 = vld [vmem:[#allocation2 + $0x5e4] ss:$0 sps:$4 sm:$0xff]  }
0x1d5b   :  { %v6760_v45 = vsel %vm168_vm5, %v8605_v35, 0 }
0x1d5c   :  { %8326 = vmatpush3.bf16.msra.mxu1 %v6419_v27 }
0x1d5d   :  { %8353 = vmatprep.subr.bf16.mxu1 %v10143_v41 }
0x1d5f   :  { %8328 = vmatmul.mubr.msk.bf16.vlgmr.msra.gmra.mxu1 %vm1107_vm11, %v8598_v46 }
0x1d60   :  { %8331 = vmatprep.mubr.msk.bf16.mxu1 %vm8863_vm6, %v10143_v41 }
0x1d67   :  { %8332 = vmatmul.mubr.msk.bf16.gmra.mxu1 %vm1107_vm11, %v8599_v42 }
0x1d68   :  { %8335 = vmatprep.mubr.msk.bf16.mxu1 %vm8863_vm6, %v10143_v41 }
0x1d6f   :  { %8336 = vmatmul.mubr.msk.bf16.gmra.mxu1 %vm1107_vm11, %v8600_v59 }
0x1d70   :  { %8355 = vmatprep.mubr.msk.bf16.mxu1 %vm8863_vm6, %v10143_v41 }
0x1e1f   :  { %v6478_v1 = vpop.f32.mrf.mxu1 }
0x1e20   :  { %6503 = vrot.lane.b32.xlu1 %v6478_v1, %s8860_s0 }
0x1e21   :  { %v8329_v60 = vpop.f32.mrf.mxu1 }
0x1e23   :  { %v6481_v12 = vpop.f32.mrf.mxu1 }
0x1e24   :  { %6505 = vrot.lane.b32.xlu0 %v6481_v12, %s8860_s0 }
0x1e25   :  { %v8330_v55 = vpop.f32.mrf.mxu1 }
0x1e27   :  { %v6486_v53 = vpop.f32.mrf.mxu1 }
0x1e29   :  { %v8333_v52 = vpop.f32.mrf.mxu1 }
0x1e2b   :  { %v6489_v39 = vpop.f32.mrf.mxu1 }
0x1e2d   :  { %v8334_v11 = vpop.f32.mrf.mxu1 }
0x1e2f   :  { %v6494_v7 = vpop.f32.mrf.mxu1 }
0x1e30   :  { %6515 = vrot.lane.b32.xlu1 %v6494_v7, %s8861_s2 }
0x1e31   :  { %v8337_v3 = vpop.f32.mrf.mxu1 }
0x1e33   :  { %v6497_v48 = vpop.f32.mrf.mxu1 }
0x1e34   :  { %6533 = vperm.xlu1 %8420, %v6529_v50   ;;  %6517 = vrot.lane.b32.xlu0 %v6497_v48, %s8861_s2 }
0x1e35   :  { %v8338_v0 = vpop.f32.mrf.mxu1 }
0x1e38   :  { %6538 = vperm.xlu0 %8421, %v6530_v38  }
0x1e92   :  { %v6504_v61 = vpop.permute.xlu1 %6503 }
0x1e93   :  { %v6509_v4 = vsel %vm119_vm3, 0.0, %v6504_v61 }
0x1e94   :  { %v6511_v57 = vmul.f32 %v10048_v23, %v6509_v4 }
0x1e96   :  { %v6506_v33 = vpop.permute.xlu0 %6505  ;;  %v6525_v6 = vadd.f32 %v6511_v57, %v6486_v53  ;;  %v8604_v57 = vld [vmem:[#allocation2 + $0x4e0] sm:$0xff]  }
0x1e97   :  { %v6510_v54 = vsel %vm119_vm3, 0.0, %v6506_v33 }
0x1e98   :  { %v6512_v20 = vmul.f32 %v10048_v23, %v6510_v54  ;;  %v8608_v54 = vld [vmem:[#allocation2 + $0x5c8] sm:$0xff]  }
0x1e9a   :  { %v6526_v14 = vadd.f32 %v6512_v20, %v6489_v39 }
0x1ea2   :  { %v6516_v17 = vpop.permute.xlu1 %6515 }
0x1ea3   :  { %v6521_v24 = vsel %vm524_vm8, %v6516_v17, 0.0 }
0x1ea4   :  { %v6523_v29 = vmul.f32 %v10052_v34, %v6521_v24  ;;  %v8606_v24 = vld [vmem:[#allocation2 + $0x5d0] ss:$0 sps:$4 sm:$0xff]  }
0x1ea6   :  { %v6518_v8 = vpop.permute.xlu0 %6517  ;;  %v6527_v62 = vadd.f32 %v6525_v6, %v6523_v29  ;;  %v8610_v29 = vld [vmem:[#allocation2 + $0x5c0] sm:$0xff]  }
0x1ea7   :  { %v6522_v5 = vsel %vm524_vm8, %v6518_v8, 0.0 }
0x1ea8   :  { %v6524_v30 = vmul.f32 %v10052_v34, %v6522_v5  ;;  %v8609_v5 = vld [vmem:[#allocation2 + $0x5d4] sm:$0xff]  }
0x1eaa   :  { %v6528_v31 = vadd.f32 %v6526_v14, %v6524_v30 }
0x1eaf   :  { %v6534_v26 = vpop.permute.xlu1 %6533 }
0x1eb0   :  { %v6541_v36 = vadd.f32 %v6534_v26, %v6527_v62 }
0x1eb2   :  { %8787 = vtanh.f32 %v6541_v36  ;;  %v8611_v36 = vld [vmem:[#allocation2 + $0x438] sm:$0xff]  }
0x1eb3   :  { %v6539_v47 = vpop.permute.xlu0 %6538 }
0x1eb4   :  { %v6542_v51 = vadd.f32 %v6539_v47, %v6528_v31 }
0x1eb6   :  { %8789 = vtanh.f32 %v6542_v51 }
0x1ebf   :  { %v8788_v18 = vpop.eup %8787 }
0x1ec3   :  { %v8790_v16 = vpop.eup %8789 }
0x1ec4   :  { %v6551_v56 = vpack.c.bf16 %v8790_v16, %v8788_v18 }
0x1ec6   :  { %8340 = vmatpush3.bf16.msra.mxu0 %v6551_v56 }
0x1ec7   :  { %8359 = vmatprep.subr.bf16.mxu0 %v10143_v41 }
0x1ec9   :  { %8342 = vmatmul.mubr.msk.bf16.vlgmr.msra.gmra.mxu0 %vm576_vm9, %v8601_v32 }
0x1eca   :  { %8345 = vmatprep.mubr.msk.bf16.mxu0 %vm8863_vm6, %v10143_v41  ;;  %8360 = vmatpush3.bf16.msra.mxu0 %v6760_v45 }
0x1ecb   :  { %8361 = vmatprep.subr.bf16.mxu0 %v10143_v41 }
0x1ed1   :  { %8346 = vmatmul.mubr.msk.bf16.gmra.mxu0 %vm576_vm9, %v8602_v9 }
0x1ed2   :  { %8349 = vmatprep.mubr.msk.bf16.mxu0 %vm8863_vm6, %v10143_v41 }
0x1ed9   :  { %8350 = vmatmul.mubr.msk.bf16.gmra.mxu0 %vm576_vm9, %v8603_v44 }
0x1eda   :  { %8365 = vmatprep.mubr.msk.bf16.mxu0 %vm8863_vm6, %v10143_v41 }
0x1f89   :  { %v6610_v25 = vpop.f32.mrf.mxu0 }
0x1f8a   :  { %6635 = vrot.lane.b32.xlu1 %v6610_v25, %s8860_s0 }
0x1f8b   :  { %v8343_v28 = vpop.f32.mrf.mxu0 }
0x1f8c   :  { %v10145_v28 = vld [vmem:[#allocation8_spill] sm:$0xff] }
0x1f8d   :  { %v6613_v21 = vpop.f32.mrf.mxu0 }
0x1f8e   :  { %6637 = vrot.lane.b32.xlu0 %v6613_v21, %s8860_s0 }
0x1f8f   :  { %v8344_v2 = vpop.f32.mrf.mxu0 }
0x1f91   :  { %v6618_v13 = vpop.f32.mrf.mxu0 }
0x1f93   :  { %v8347_v40 = vpop.f32.mrf.mxu0 }
0x1f95   :  { %v6621_v63 = vpop.f32.mrf.mxu0 }
0x1f97   :  { %v8348_v22 = vpop.f32.mrf.mxu0 }
0x1f98   :  { %v6950_v22 = vld [vmem:[#allocation4 + $0x2d0] sm:$0xff] }
0x1f99   :  { %v6626_v49 = vpop.f32.mrf.mxu0 }
0x1f9a   :  { %6647 = vrot.lane.b32.xlu1 %v6626_v49, %s8861_s2 }
0x1f9b   :  { %v8351_v37 = vpop.f32.mrf.mxu0 }
0x1f9c   :  { %v8613_v37 = vld [vmem:[#allocation2 + $0x444] sm:$0xff]  }
0x1f9d   :  { %v6629_v15 = vpop.f32.mrf.mxu0 }
0x1f9e   :  { %6665 = vperm.xlu1 %8420, %v6661_v10   ;;  %6649 = vrot.lane.b32.xlu0 %v6629_v15, %s8861_s2 }
0x1f9f   :  { %v8352_v58 = vpop.f32.mrf.mxu0 }
0x1fa2   :  { %6866 = vperm.xlu1 %8420, %v6863_v43   ;;  %6670 = vperm.xlu0 %8421, %v6662_v19   ;;  %v8807_v43 = vld [vmem:[#allocation4 + $0x360] ss:$0 sm:$0xff] }
0x1ffc   :  { %v6636_v27 = vpop.permute.xlu1 %6635 }
0x1ffd   :  { %v6641_v59 = vsel %vm119_vm3, 0.0, %v6636_v27  ;;  %v8808_v27 = vld [vmem:[#allocation4 + $0x368] ss:$0 sm:$0xff] }
0x1ffe   :  { %v6643_v12 = vmul.f32 %v10048_v23, %v6641_v59 }
0x2000   :  { %v6638_v46 = vpop.permute.xlu0 %6637  ;;  %v6657_v11 = vadd.f32 %v6643_v12, %v6618_v13  ;;  %v8612_v13 = vld [vmem:[#allocation2 + $0x440] ss:$0 sps:$4 sm:$0xff]  }
0x2001   :  { %v6642_v55 = vsel %vm119_vm3, 0.0, %v6638_v46 }
0x2002   :  { %v6644_v39 = vmul.f32 %v10048_v23, %v6642_v55  ;;  %v6821_v23 = vsel %vm168_vm5, %v8606_v24, 0 }
0x2004   :  { %v6658_v48 = vadd.f32 %v6644_v39, %v6621_v63 }
0x200c   :  { %v6648_v42 = vpop.permute.xlu1 %6647 }
0x200d   :  { %v6653_v1 = vsel %vm524_vm8, %v6648_v42, 0.0 }
0x200e   :  { %v6655_v53 = vmul.f32 %v10052_v34, %v6653_v1 }
0x2010   :  { %v6650_v60 = vpop.permute.xlu0 %6649  ;;  %v6659_v3 = vadd.f32 %v6657_v11, %v6655_v53  ;;  %v8614_v53 = vld [vmem:[#allocation2 + $0x44c] ss:$0 sps:$4 sm:$0xff]   ;;  %v7051_v11 = vld [vmem:[#allocation4 + $0x358] sm:$0x7] }
0x2011   :  { %v6654_v52 = vsel %vm524_vm8, %v6650_v60, 0.0 }
0x2012   :  { %v6656_v7 = vmul.f32 %v10052_v34, %v6654_v52  ;;  %v8607_v34 = vld [vmem:[#allocation2 + $0x5dc] sm:$0xff]  }
0x2013   :  { %8362 = vmatpush3.bf16.msra.mxu0 %v8607_v34 }
0x2014   :  { %v6660_v0 = vadd.f32 %v6658_v48, %v6656_v7  ;;  %8363 = vmatprep.subr.bf16.mxu0 %v10143_v41  ;;  %v7041_v7 = vld [vmem:[#allocation4 + $0x2d8] sm:$0xff] }
0x2017   :  { %8364 = vmatpush3.bf16.msra.mxu0 %v8609_v5 }
0x2019   :  { %v6666_v50 = vpop.permute.xlu1 %6665 }
0x201a   :  { %v6673_v38 = vadd.f32 %v6666_v50, %v6659_v3 }
0x201c   :  { %8791 = vtanh.f32 %v6673_v38 }
0x201d   :  { %v6671_v61 = vpop.permute.xlu0 %6670  ;;  %v6867_v16 = vpop.permute.xlu1 %6866 }
0x201e   :  { %v6674_v33 = vadd.f32 %v6671_v61, %v6660_v0 }
0x2020   :  { %8793 = vtanh.f32 %v6674_v33 }
0x2029   :  { %v8792_v17 = vpop.eup %8791 }
0x202d   :  { %v8794_v4 = vpop.eup %8793 }
0x202e   :  { %v6679_v8 = vpack.c.bf16 %v8794_v4, %v8792_v17 }
0x2030   :  { %8354 = vmatpush3.bf16.msra.mxu1 %v6679_v8 }
0x2031   :  { %8369 = vmatprep.subr.bf16.mxu1 %v10143_v41 }
0x2033   :  { %8356 = vmatmul.mubr.msk.bf16.vlgmr.msra.gmra.mxu1 %vm576_vm9, %v8604_v57 }
0x2034   :  { %8370 = vmatpush3.bf16.msra.mxu1 %v6821_v23  ;;  %8375 = vmatprep.mubr.msk.bf16.mxu1 %vm8863_vm6, %v10143_v41 }
0x2035   :  { %8371 = vmatprep.subr.bf16.mxu1 %v10143_v41 }
0x2038   :  { %8372 = vmatpush3.bf16.msra.mxu1 %v8608_v54 }
0x2039   :  { %8373 = vmatprep.subr.bf16.mxu1 %v10143_v41 }
0x203c   :  { %8374 = vmatpush3.bf16.msra.mxu1 %v8610_v29  ;;  %v7049_v29 = vld [vmem:[#allocation2 + $0x4e8] sm:$0x3] }
0x20f3   :  { %v6722_v20 = vpop.f32.mrf.mxu1 }
0x20f4   :  { %v6734_v6 = vpack.c.bf16 %v6722_v20, %v6722_v20 }
0x20f5   :  { %v8357_v30 = vpop.f32.mrf.mxu1 }
0x20f6   :  { %8376 = vmatmul.mubr.msk.bf16.vlgmr.msra.gmra.mxu1 %vm708_vm10, %v6734_v6 }
0x20f7   :  { %v6725_v62 = vpop.f32.mrf.mxu1  ;;  %8387 = vmatprep.mubr.msk.bf16.mxu1 %vm10146_vm0, %v8613_v37 }
0x20f8   :  { %v6740_v26 = vpack.c.bf16 %v6725_v62, %v6725_v62 }
0x20f9   :  { %v8358_v14 = vpop.f32.mrf.mxu1 }
0x20fa   :  { %8366 = vmatmul.mubr.msk.bf16.vlgmr.msra.gmra.mxu0 %vm708_vm10, %v6740_v26 }
0x20fb   :  { %8381 = vmatprep.mubr.msk.bf16.mxu0 %vm576_vm9, %v8611_v36 }
0x21b6   :  { %v6857_v31 = vpop.f32.mrf.mxu1 }
0x21b8   :  { %v8377_v47 = vpop.f32.mrf.mxu1 }
0x21ba   :  { %v6796_v51 = vpop.f32.mrf.mxu0  ;;  %v6860_v18 = vpop.f32.mrf.mxu1 }
0x21bb   :  { %v6858_v56 = vadd.f32 %v6857_v31, %v6796_v51 }
0x21bc   :  { %v8367_v32 = vpop.f32.mrf.mxu0  ;;  %v8378_v9 = vpop.f32.mrf.mxu1 }
0x21bd   :  { %v6869_v44 = vadd.f32 %v6867_v16, %v6858_v56 }
0x21be   :  { %v6799_v25 = vpop.f32.mrf.mxu0 }
0x21bf   :  { %v6873_v21 = vpack.c.bf16 %v10145_v28, %v6869_v44 }
0x21c0   :  { %v8368_v2 = vpop.f32.mrf.mxu0 }
0x21c1   :  { %8379 = vmatprep.subr.bf16.mxu0 %v6873_v21 }
0x21c2   :  { %8380 = vmatpush3.bf16.msra.mxu0 %v6873_v21 }
0x21c3   :  { %8391 = vmatprep.subr.bf16.mxu0 %v10143_v41 }
0x21c5   :  { %8382 = vmatmul.mubr.msk.bf16.vlgmr.msra.gmra.mxu0 %vm576_vm9, %v8612_v13 }
0x21c6   :  { %8393 = vmatprep.mubr.msk.bf16.mxu0 %vm8863_vm6, %v10143_v41  ;;  %vm10150_vm6 = vmmov %vm10146_vm0 }
0x2285   :  { %v8383_v40 = vpop.f32.mrf.mxu0 }
0x2286   :  { %6943 = vrot.lane.b32.xlu1 %v8383_v40, %s8861_s2 }
0x2287   :  { %v6922_v63 = vpop.f32.mrf.mxu0 }
0x2288   :  { %6937 = vrot.lane.b32.xlu0 %v6922_v63, %s8860_s0 }
0x2289   :  { %v8384_v49 = vpop.f32.mrf.mxu0 }
0x228b   :  { %v6925_v35 = vpop.f32.mrf.mxu0 }
0x228c   :  { %6953 = vperm.xlu0 %8421, %v6950_v22  }
0x22f8   :  { %v6944_v58 = vpop.permute.xlu1 %6943 }
0x22f9   :  { %v6946_v41 = vsel %vm10147_vm1, %v6944_v58, 0.0 }
0x22fa   :  { %v6938_v10 = vpop.permute.xlu0 %6937  ;;  %v6947_v46 = vmul.f32 %v8808_v27, %v6946_v41 }
0x22fb   :  { %v6940_v15 = vsel %vm119_vm3, 0.0, %v6938_v10 }
0x22fc   :  { %v6941_v19 = vmul.f32 %v8807_v43, %v6940_v15 }
0x22fe   :  { %v6948_v45 = vadd.f32 %v6941_v19, %v6925_v35 }
0x2300   :  { %v6949_v42 = vadd.f32 %v6948_v45, %v6947_v46 }
0x2307   :  { %v6954_v59 = vpop.permute.xlu0 %6953 }
0x2308   :  { %v6956_v1 = vadd.f32 %v6954_v59, %v6949_v42 }
0x230a   :  { %8795 = vtanh.f32 %v6956_v1 }
0x2317   :  { %v8796_v60 = vpop.eup %8795 }
0x2318   :  { %v6961_v12 = vpack.c.bf16 %v8796_v60, %v8796_v60 }
0x231a   :  { %8408 = vmatprep.subr.msk.bf16.mxu1 %vm168_vm5, %v6961_v12  ;;  %v6977_v55 = vsel %vm168_vm5, %v6961_v12, 0 }
0x231b   :  { %8386 = vmatpush3.bf16.msra.mxu1 %v6977_v55 }
0x231e   :  { %8388 = vmatmul.mubr.msk.bf16.vlgmr.msra.gmra.mxu1 %vm10148_vm2, %v8614_v53 }
0x23de   :  { %v8389_v52 = vpop.f32.mrf.mxu1 }
0x23df   :  { %7034 = vrot.lane.b32.xlu0 %v8389_v52, %s8861_s2 }
0x23e0   :  { %v7013_v39 = vpop.f32.mrf.mxu1 }
0x23e1   :  { %7028 = vrot.lane.b32.xlu1 %v7013_v39, %s8860_s0 }
0x23e2   :  { %v8390_v3 = vpop.f32.mrf.mxu1 }
0x23e3   :  { %7054 = vperm.xlu0 %8421, %v7051_v11  }
0x23e4   :  { %v7016_v61 = vpop.f32.mrf.mxu1 }
0x23e5   :  { %7044 = vperm.xlu1 %8420, %v7041_v7  }
0x2451   :  { %v7035_v0 = vpop.permute.xlu0 %7034 }
0x2452   :  { %v7037_v33 = vsel %vm10149_vm4, %v7035_v0, 0.0 }
0x2453   :  { %v7029_v50 = vpop.permute.xlu1 %7028  ;;  %v7038_v4 = vmul.f32 %v8808_v27, %v7037_v33 }
0x2454   :  { %v7031_v48 = vsel %vm119_vm3, 0.0, %v7029_v50  ;;  %vm7103_vm3 = vcmask 649216  }
0x2455   :  { %v7032_v38 = vmul.f32 %v8807_v43, %v7031_v48 }
0x2457   :  { %v7039_v17 = vadd.f32 %v7032_v38, %v7016_v61 }
0x2459   :  { %v7040_v24 = vadd.f32 %v7039_v17, %v7038_v4 }
0x245e   :  { %v7055_v5 = vpop.permute.xlu0 %7054 }
0x2460   :  { %v7045_v8 = vpop.permute.xlu1 %7044 }
0x2461   :  { %v7047_v57 = vadd.f32 %v7045_v8, %v7040_v24 }
0x2463   :  { %8797 = vtanh.f32 %v7047_v57 }
0x2470   :  { %v8798_v23 = vpop.eup %8797 }
0x2471   :  { %v7050_v54 = vpack.c.bf16 %v8798_v23, %v8798_v23 }
0x2473   :  { %v7061_v34 = vsel %vm168_vm5, %v7050_v54, 0 }
0x2474   :  { %8392 = vmatpush3.bf16.msra.mxu0 %v7061_v34 }
0x2477   :  { %8394 = vmatmul.mubr.msk.bf16.vlgmr.msra.gmra.mxu0 %vm10150_vm6, %v7049_v29 }
0x2537   :  { %v7097_v20 = vpop.f32.mrf.mxu0 }
0x2538   :  { %v7098_v6 = vadd.f32 %v7097_v20, %v7055_v5 }
0x2539   :  { %v8395_v30 = vpop.f32.mrf.mxu0 }
0x253a   :  { %7104 = vst.msk [vmem:[%s10118_s3] sm:$0x7] %vm7103_vm3, %v7098_v6 }
0x253b   :  { %v7100_v62 = vpop.f32.mrf.mxu0 }
0x253d   :  { %v8396_v26 = vpop.f32.mrf.mxu0 }
0x253e   :  { %7109 = vsyncpa [#allocation3], 1 }
0x253f   :  { %7110 = vsyncpa [#allocation5], 1 }

</bundles_post_ra>
